<compile_context>
chip_gen: v6e
topology: v6e:2x2x1
jax: 0.10.0
libtpu: 0.0.40
codegen_flags: <defaults>
</compile_context>

<pallas_src>
import functools

import jax
import jax.numpy as jnp
import numpy as np
from jax.experimental import pallas as pl
from jax.experimental.pallas import tpu as pltpu


def _round_up(v, m):
    return ((v + m - 1) // m) * m


def _tpu_generation_params():
    """Generation-aware knobs: (vmem_budget, target_rows, vmem_limit_cap, prefer_split)."""
    vmem_cap = None
    try:
        vmem_cap = int(pltpu.get_tpu_info().vmem_capacity_bytes)
    except Exception:
        pass
    if vmem_cap is None:
        try:
            kind = jax.devices()[0].device_kind.lower()
            vmem_cap = (64 << 20) if "v7" in kind else (128 << 20)
        except Exception:
            vmem_cap = 64 << 20          # conservative: assume smallest VMEM
    if vmem_cap <= (72 << 20):           # v7x-class: 64 MiB VMEM, 2 TensorCores
        return (12 << 20), 1024, (44 << 20), True
    return (40 << 20), 2048, (96 << 20), False   # v5e / v6e: 128 MiB VMEM, 1 TC


def _working_set_bytes(nb, seq_len, cp, in_item, out_item):
    """Conservative per-grid-step VMEM working set (double-buffered blocks +
    double-buffered fused weight/decay + all intermediates)."""
    m = nb * seq_len
    return int(
        2 * (cp * 3 * cp * in_item + 3 * cp * 4)   # fused W (x2 buffers) + f32 bias
        + 2 * seq_len * seq_len * 4                # decay (x2 buffers)
        + 2 * m * cp * in_item                     # input block (x2 buffers)
        + 2 * m * cp * out_item                    # output block (x2 buffers)
        + m * 3 * cp * 4                           # f32 qkv projection
        + m * 3 * cp * in_item                     # q/k/v casts fed to the MXU
        + m * cp * 4                               # f32 output accumulator
        + 3 * nb * seq_len * seq_len * 4           # scores / exp / e*decay (f32)
        + nb * seq_len * seq_len * in_item)        # attn cast


def _pick_row_block(n_rows, seq_len, cp, in_item, out_item,
                    target_rows, vmem_budget, prefer_split):
    """Largest divisor nb of n_rows whose corrected working set fits the budget."""
    best = 1
    for nb in range(1, n_rows + 1):
        if n_rows % nb:
            continue
        if nb * seq_len > target_rows:
            continue
        if _working_set_bytes(nb, seq_len, cp, in_item, out_item) <= vmem_budget:
            best = nb
    # Only on 2-TensorCore parts (v7x) prefer >= 2 grid steps so the "parallel"
    # axis can be sharded across both cores, as long as M stays MXU-friendly.
    if (prefer_split and best == n_rows and n_rows % 2 == 0
            and (n_rows // 2) * seq_len >= 256):
        best = n_rows // 2
    return best


# ---------------------------------------------------------------------------
# Pallas kernel: a block of `nb` attention rows of padded length Lp, padded
# model dim Cp.
# ---------------------------------------------------------------------------
def _masa_block_kernel(x_ref, w_ref, b_ref, d_ref, o_ref, *,
                       nb, seq_len, valid_len, cp):
    # x_ref: (nb, Lp, Cp)   row block (bf16/f32), lane dim = padded d_model
    # w_ref: (Cp, 3*Cp)     fused, pre-transposed [Wq^T*scale | Wk^T | Wv^T]
    # b_ref: (1, 3*Cp)      fused f32 bias (bq already scaled)
    # d_ref: (Lp, Lp)       precomputed Manhattan decay gamma**|i-j| (f32)
    # o_ref: (nb, Lp, Cp)
    mm_dtype = x_ref.dtype
    x = x_ref[...].reshape(nb * seq_len, cp)

    # Single fused QKV projection on the MXU with f32 accumulation.
    qkv = jnp.dot(x, w_ref[...], preferred_element_type=jnp.float32)
    qkv = (qkv + b_ref[...]).reshape(nb, seq_len, 3 * cp)

    # 1/sqrt(d_model) is already folded into Wq/bq; cast operands back to the
    # MXU dtype so both attention matmuls also run at bf16 throughput.
    q = qkv[:, :, 0 * cp:1 * cp].astype(mm_dtype)
    k = qkv[:, :, 1 * cp:2 * cp].astype(mm_dtype)
    v = qkv[:, :, 2 * cp:3 * cp].astype(mm_dtype)

    # TODO(synk): for small seq_len (< MXU width) pack several rows' K/V into
    # one wide RHS with a block-diagonal mask to raise MXU occupancy here.
    s = jnp.einsum("nld,nmd->nlm", q, k, preferred_element_type=jnp.float32)
    if valid_len < seq_len:   # mask zero-padded key columns before the softmax
        col = jax.lax.broadcasted_iota(jnp.int32, (1, 1, seq_len), 2)
        s = jnp.where(col < valid_len, s, -1e30)

    s_max = jnp.max(s, axis=-1, keepdims=True)
    e = jnp.exp(s - s_max)
    denom = jnp.sum(e, axis=-1, keepdims=True)

    attn = (e * d_ref[...][None, :, :]).astype(mm_dtype)
    out = jnp.einsum("nlm,nmd->nld", attn, v, preferred_element_type=jnp.float32)
    # Deferred softmax divide on the (Lp, Cp) output; EUP approximate reciprocal.
    out = out * pl.reciprocal(denom, approx=True)

    o_ref[...] = out.astype(o_ref.dtype)


def _masa_stage(x_rows, w_fused, b_fused, decay, *, valid_len, out_dtype):
    """x_rows: (N, Lp, Cp). Returns (N, Lp, Cp) in out_dtype."""
    n_rows, lp, cp = x_rows.shape
    in_item = jnp.dtype(x_rows.dtype).itemsize
    out_item = jnp.dtype(out_dtype).itemsize

    vmem_budget, target_rows, vmem_cap, prefer_split = _tpu_generation_params()
    nb = _pick_row_block(n_rows, lp, cp, in_item, out_item,
                         target_rows, vmem_budget, prefer_split)
    grid = (n_rows // nb,)

    kernel = functools.partial(_masa_block_kernel, nb=nb, seq_len=lp,
                               valid_len=valid_len, cp=cp)

    flops = int(2 * n_rows * lp * cp * 3 * cp          # fused QKV GEMM
                + 4 * n_rows * lp * lp * cp)           # QK^T + attn@V
    transcendentals = int(n_rows * lp * lp + n_rows * lp)   # exp + reciprocal
    bytes_accessed = int(in_item * n_rows * lp * cp        # x in
                         + out_item * n_rows * lp * cp     # out
                         + in_item * cp * 3 * cp           # fused weight
                         + 4 * 3 * cp + 4 * lp * lp)       # bias + decay

    est = _working_set_bytes(nb, lp, cp, in_item, out_item)
    vmem_limit = int(min(max(2 * est, 32 << 20), vmem_cap))

    # TODO(synk): the fused weight / bias / decay have constant index_maps; with
    # pipeline_mode=pl.Buffered(1) they could drop to a single VMEM buffer each.
    return pl.pallas_call(
        kernel,
        out_shape=jax.ShapeDtypeStruct((n_rows, lp, cp), out_dtype),
        grid=grid,
        in_specs=[
            pl.BlockSpec((nb, lp, cp), lambda i: (i, 0, 0)),   # row block
            pl.BlockSpec((cp, 3 * cp), lambda i: (0, 0)),      # fused W^T (resident)
            pl.BlockSpec((1, 3 * cp), lambda i: (0, 0)),       # fused bias (resident)
            pl.BlockSpec((lp, lp), lambda i: (0, 0)),          # decay (resident)
        ],
        out_specs=pl.BlockSpec((nb, lp, cp), lambda i: (i, 0, 0)),
        compiler_params=pltpu.CompilerParams(
            dimension_semantics=("parallel",),
            vmem_limit_bytes=vmem_limit),
        cost_estimate=pl.CostEstimate(
            flops=flops, transcendentals=transcendentals,
            bytes_accessed=bytes_accessed),
    )(x_rows, w_fused, b_fused, decay)


def _fuse_qkv(params, c, cp, mm_dtype, scale):
    """Fuse the three Linear layers (zero-padded to Cp lanes) into one matmul;
    fold 1/sqrt(d_model) into Wq / bq."""
    wq, bq, wk, bk, wv, bv = params
    w = jnp.zeros((cp, 3 * cp), jnp.float32)
    w = w.at[:c, 0 * cp:0 * cp + c].set(wq.T.astype(jnp.float32) * scale)
    w = w.at[:c, 1 * cp:1 * cp + c].set(wk.T.astype(jnp.float32))
    w = w.at[:c, 2 * cp:2 * cp + c].set(wv.T.astype(jnp.float32))
    b = jnp.zeros((1, 3 * cp), jnp.float32)
    b = b.at[0, 0 * cp:0 * cp + c].set(bq.astype(jnp.float32) * scale)
    b = b.at[0, 1 * cp:1 * cp + c].set(bk.astype(jnp.float32))
    b = b.at[0, 2 * cp:2 * cp + c].set(bv.astype(jnp.float32))
    return w.astype(mm_dtype), b


def _decay_matrix(size, gamma, dtype=jnp.float32):
    idx = jnp.arange(size)
    dist = jnp.abs(idx[:, None] - idx[None, :]).astype(dtype)
    return jnp.power(jnp.asarray(gamma, dtype), dist)


# ---------------------------------------------------------------------------
# Full forward (decomposed=True branch of the PyTorch module).
# ---------------------------------------------------------------------------
def manhattan_self_attention(x, params, gamma=0.9, mxu_dtype=jnp.bfloat16):
    """x: (B, C, H, W) with C == d_model. Returns (B, C, H, W).

    `mxu_dtype` sets the matmul-operand dtype (bf16 default; f32 accumulation
    and f32 softmax/decay math always). Pass mxu_dtype=None for full-f32
    numerics matching the PyTorch module bit-for-bit-ish.
    """
    B, C, H, W = x.shape
    d_model = C
    cp = _round_up(C, 128)            # lane-dense padding of d_model
    wp = _round_up(W, 8)              # sublane-aligned sequence lengths
    hp = _round_up(H, 8)
    mm_dtype = jnp.float32 if mxu_dtype is None else mxu_dtype
    scale = 1.0 / float(d_model) ** 0.5
    w_fused, b_fused = _fuse_qkv(params, C, cp, mm_dtype, scale)
    decay_w = _decay_matrix(wp, gamma)
    decay_h = _decay_matrix(hp, gamma)

    def prep(rows, lp):
        """(N, L, c_in) -> (N, lp, cp) zero-padded, cast to the MXU dtype."""
        n, l, c_in = rows.shape
        if lp != l or cp != c_in:
            rows = jnp.pad(rows, ((0, 0), (0, lp - l), (0, cp - c_in)))
        return rows.astype(mm_dtype)

    # --- stage 1: attention along width per (batch, height) row -------------
    # (faithfully mirrors PyTorch's x.permute(0,2,1,3).reshape(B*H, W, C),
    #  including the C/W interleaving that reshape performs; padding/casting
    #  happen strictly AFTER this reshape so the semantics are unchanged)
    x_h = jnp.transpose(x, (0, 2, 1, 3)).reshape(B * H, W, C)
    out_h = _masa_stage(prep(x_h, wp), w_fused, b_fused, decay_w,
                        valid_len=W, out_dtype=mm_dtype)

    # --- stage 2: attention along height per (batch, width) column ----------
    # Drop seq/lane padding before the relayout so the HBM round trip moves as
    # few (and as narrow, bf16) bytes as possible.
    # TODO(synk): fold this transpose into stage 2's index_map (read columns of
    # the 4-D stage-1 output directly) to remove the HBM round trip entirely.
    out_h = out_h[:, :W, :C]
    x_w = jnp.transpose(out_h.reshape(B, H, W, C), (0, 2, 1, 3)).reshape(B * W, H, C)
    out_w = _masa_stage(prep(x_w, hp), w_fused, b_fused, decay_h,
                        valid_len=H, out_dtype=jnp.float32)

    out = out_w[:, :H, :C].reshape(B, W, H, C)
    return jnp.transpose(out, (0, 3, 2, 1)).astype(x.dtype)   # -> (B, C, H, W)


# ---------------------------------------------------------------------------
# Pure-JAX reference (same math, no Pallas) for the correctness check.
# ---------------------------------------------------------------------------
def _reference(x, params, gamma=0.9):
    B, C, H, W = x.shape
    d_model = C
    wq, bq, wk, bk, wv, bv = params

    def dense(z, w, b):
        return jnp.einsum("nlc,oc->nlo", z, w) + b

    def stage(rows, decay):
        q = dense(rows, wq, bq)
        k = dense(rows, wk, bk)
        v = dense(rows, wv, bv)
        s = jnp.einsum("nld,nmd->nlm", q, k) / (d_model ** 0.5)
        a = jax.nn.softmax(s, axis=-1) * decay[None]
        return jnp.einsum("nlm,nmd->nld", a, v)

    x_h = jnp.transpose(x, (0, 2, 1, 3)).reshape(B * H, W, C)
    out_h = stage(x_h, _decay_matrix(W, gamma, x.dtype)).reshape(B, H, W, C)
    x_w = jnp.transpose(out_h, (0, 2, 1, 3)).reshape(B * W, H, C)
    out_w = stage(x_w, _decay_matrix(H, gamma, x.dtype)).reshape(B, W, H, C)
    return jnp.transpose(out_w, (0, 3, 2, 1))


if __name__ == "__main__":
    # Small, deterministic setup: d_model == channels; asymmetric H/W.
    B, C, H, W = 2, 32, 8, 16
    d_model, gamma = C, 0.9

    key = jax.random.PRNGKey(0)
    kx, kq, kbq, kk, kbk, kv, kbv = jax.random.split(key, 7)

    x = jax.random.normal(kx, (B, C, H, W), dtype=jnp.float32)

    bound = 1.0 / (d_model ** 0.5)  # PyTorch nn.Linear default init range
    wq = jax.random.uniform(kq, (d_model, d_model), jnp.float32, -bound, bound)
    bq = jax.random.uniform(kbq, (d_model,), jnp.float32, -bound, bound)
    wk = jax.random.uniform(kk, (d_model, d_model), jnp.float32, -bound, bound)
    bk = jax.random.uniform(kbk, (d_model,), jnp.float32, -bound, bound)
    wv = jax.random.uniform(kv, (d_model, d_model), jnp.float32, -bound, bound)
    bv = jax.random.uniform(kbv, (d_model,), jnp.float32, -bound, bound)
    params = (wq, bq, wk, bk, wv, bv)

    ref = jax.block_until_ready(_reference(x, params, gamma))

    # 1) full-f32 path: must match the PyTorch-equivalent reference tightly.
    fwd_f32 = jax.jit(functools.partial(manhattan_self_attention,
                                        gamma=gamma, mxu_dtype=None))
    out_f32 = jax.block_until_ready(fwd_f32(x, params))
    assert out_f32.shape == (B, C, H, W), out_f32.shape
    np.testing.assert_allclose(np.asarray(out_f32), np.asarray(ref),
                               rtol=1e-2, atol=2e-3)

    # 2) default fast path: bf16 MXU operands, f32 accumulation/softmax.
    fwd = jax.jit(functools.partial(manhattan_self_attention, gamma=gamma))
    out = jax.block_until_ready(fwd(x, params))
    assert out.shape == (B, C, H, W), out.shape
    np.testing.assert_allclose(np.asarray(out), np.asarray(ref),
                               rtol=8e-2, atol=8e-2)

    print("KERNEL_OK")
</pallas_src>

<mosaic_0001>
module attributes {stable_mosaic.version = 11 : i64} {
  func.func @_masa_block_kernel(%arg0: i32, %arg1: memref<16x16x128xf32, #tpu.memory_space<vmem>>, %arg2: memref<128x384xf32, #tpu.memory_space<vmem>>, %arg3: memref<1x384xf32, #tpu.memory_space<vmem>>, %arg4: memref<16x16xf32, #tpu.memory_space<vmem>>, %arg5: memref<16x16x128xf32, #tpu.memory_space<vmem>>) attributes {dimension_semantics = [#tpu.dimension_semantics<parallel>], iteration_bounds = array<i64: 1>, scalar_prefetch = 0 : i64, scratch_operands = 0 : i64, tpu.core_type = #tpu.core_type<tc>, window_params = [{transform_indices = @transform_0, window_bounds = array<i64: 16, 16, 128>}, {pipeline_mode = #tpu.pipeline_mode<synchronous>, transform_indices = @transform_1, window_bounds = array<i64: 128, 384>}, {pipeline_mode = #tpu.pipeline_mode<synchronous>, transform_indices = @transform_2, window_bounds = array<i64: 1, 384>}, {pipeline_mode = #tpu.pipeline_mode<synchronous>, transform_indices = @transform_3, window_bounds = array<i64: 16, 16>}, {transform_indices = @transform_4, window_bounds = array<i64: 16, 16, 128>}]} {
    %c0 = arith.constant 0 : index
    %c0_0 = arith.constant 0 : index
    %c0_1 = arith.constant 0 : index
    %0 = vector.load %arg1[%c0, %c0_0, %c0_1] : memref<16x16x128xf32, #tpu.memory_space<vmem>>, vector<16x16x128xf32>
    %1 = vector.shape_cast %0 : vector<16x16x128xf32> to vector<256x128xf32>
    %c0_2 = arith.constant 0 : index
    %c0_3 = arith.constant 0 : index
    %2 = vector.load %arg2[%c0_2, %c0_3] : memref<128x384xf32, #tpu.memory_space<vmem>>, vector<128x384xf32>
    %cst = arith.constant dense<0.000000e+00> : vector<256x384xf32>
    %3 = tpu.matmul %1, %2, %cst {dimension_numbers = #tpu.dot_dimension_numbers<[1], [0], [0], [1], [0, 0, 1, 1], [], []>} : vector<256x128xf32>, vector<128x384xf32>, vector<256x384xf32> -> vector<256x384xf32>
    %c0_4 = arith.constant 0 : index
    %c0_5 = arith.constant 0 : index
    %4 = vector.load %arg3[%c0_4, %c0_5] : memref<1x384xf32, #tpu.memory_space<vmem>>, vector<1x384xf32>
    %5 = vector.broadcast %4 : vector<1x384xf32> to vector<256x384xf32>
    %6 = arith.addf %3, %5 : vector<256x384xf32>
    %7 = vector.shape_cast %6 : vector<256x384xf32> to vector<16x16x384xf32>
    %8 = vector.extract_strided_slice %7 {offsets = [0, 0, 0], sizes = [16, 16, 128], strides = [1, 1, 1]} : vector<16x16x384xf32> to vector<16x16x128xf32>
    %9 = vector.extract_strided_slice %7 {offsets = [0, 0, 128], sizes = [16, 16, 128], strides = [1, 1, 1]} : vector<16x16x384xf32> to vector<16x16x128xf32>
    %10 = vector.extract_strided_slice %7 {offsets = [0, 0, 256], sizes = [16, 16, 128], strides = [1, 1, 1]} : vector<16x16x384xf32> to vector<16x16x128xf32>
    "tpu.trace_start"() <{level = 10 : i32, message = "nld,nmd->nlm"}> : () -> ()
    %cst_6 = arith.constant dense<0.000000e+00> : vector<16x16x16xf32>
    %11 = tpu.matmul %8, %9, %cst_6 {dimension_numbers = #tpu.dot_dimension_numbers<[2], [2], [1], [1], [0, 0, 0, 1, 1, 1], [0], [0]>} : vector<16x16x128xf32>, vector<16x16x128xf32>, vector<16x16x16xf32> -> vector<16x16x16xf32>
    "tpu.trace_stop"() : () -> ()
    %cst_7 = arith.constant dense<0xFF800000> : vector<16x16xf32>
    %12 = vector.multi_reduction <maximumf>, %11, %cst_7 [2] : vector<16x16x16xf32> to vector<16x16xf32>
    %13 = vector.shape_cast %12 : vector<16x16xf32> to vector<16x16x1xf32>
    %14 = vector.broadcast %13 : vector<16x16x1xf32> to vector<16x16x16xf32>
    %15 = arith.subf %11, %14 : vector<16x16x16xf32>
    %16 = math.exp %15 : vector<16x16x16xf32>
    %cst_8 = arith.constant dense<0.000000e+00> : vector<16x16xf32>
    %17 = vector.multi_reduction <add>, %16, %cst_8 [2] : vector<16x16x16xf32> to vector<16x16xf32>
    %18 = vector.shape_cast %17 : vector<16x16xf32> to vector<16x16x1xf32>
    %c0_9 = arith.constant 0 : index
    %c0_10 = arith.constant 0 : index
    %19 = vector.load %arg4[%c0_9, %c0_10] : memref<16x16xf32, #tpu.memory_space<vmem>>, vector<16x16xf32>
    %20 = vector.shape_cast %19 : vector<16x16xf32> to vector<1x16x16xf32>
    %21 = vector.broadcast %20 : vector<1x16x16xf32> to vector<16x16x16xf32>
    %22 = arith.mulf %16, %21 : vector<16x16x16xf32>
    "tpu.trace_start"() <{level = 10 : i32, message = "nlm,nmd->nld"}> : () -> ()
    %cst_11 = arith.constant dense<0.000000e+00> : vector<16x16x128xf32>
    %23 = tpu.matmul %22, %10, %cst_11 {dimension_numbers = #tpu.dot_dimension_numbers<[2], [1], [1], [2], [0, 0, 0, 1, 1, 2], [0], [0]>} : vector<16x16x16xf32>, vector<16x16x128xf32>, vector<16x16x128xf32> -> vector<16x16x128xf32>
    "tpu.trace_stop"() : () -> ()
    %24 = tpu.reciprocal %18 {approx = true} : vector<16x16x1xf32> -> vector<16x16x1xf32>
    %25 = vector.broadcast %24 : vector<16x16x1xf32> to vector<16x16x128xf32>
    %26 = arith.mulf %23, %25 : vector<16x16x128xf32>
    %c0_12 = arith.constant 0 : index
    %c0_13 = arith.constant 0 : index
    %c0_14 = arith.constant 0 : index
    %27 = vector.load %arg5[%c0_12, %c0_13, %c0_14] : memref<16x16x128xf32, #tpu.memory_space<vmem>>, vector<16x16x128xf32>
    tpu.vector_store %arg5[%c0_12, %c0_13, %c0_14], %26 {strides = array<i32>} : memref<16x16x128xf32, #tpu.memory_space<vmem>>, vector<16x16x128xf32>,
    return
  }
  func.func @transform_0(%arg0: i32) -> (i32, i32, i32) {
    %c0_i32 = arith.constant 0 : i32
    %c0_i32_0 = arith.constant 0 : i32
    %c0_i32_1 = arith.constant 0 : i32
    return %arg0, %c0_i32, %c0_i32_0 : i32, i32, i32
  }
  func.func @transform_1(%arg0: i32) -> (i32, i32) {
    %c0_i32 = arith.constant 0 : i32
    %c0_i32_0 = arith.constant 0 : i32
    %c0_i32_1 = arith.constant 0 : i32
    return %c0_i32, %c0_i32_0 : i32, i32
  }
  func.func @transform_2(%arg0: i32) -> (i32, i32) {
    %c0_i32 = arith.constant 0 : i32
    %c0_i32_0 = arith.constant 0 : i32
    %c0_i32_1 = arith.constant 0 : i32
    return %c0_i32, %c0_i32_0 : i32, i32
  }
  func.func @transform_3(%arg0: i32) -> (i32, i32) {
    %c0_i32 = arith.constant 0 : i32
    %c0_i32_0 = arith.constant 0 : i32
    %c0_i32_1 = arith.constant 0 : i32
    return %c0_i32, %c0_i32_0 : i32, i32
  }
  func.func @transform_4(%arg0: i32) -> (i32, i32, i32) {
    %c0_i32 = arith.constant 0 : i32
    %c0_i32_0 = arith.constant 0 : i32
    %c0_i32_1 = arith.constant 0 : i32
    return %arg0, %c0_i32, %c0_i32_0 : i32, i32, i32
  }
}

module attributes {stable_mosaic.version = 11 : i64} {
  func.func @_masa_block_kernel(%arg0: i32, %arg1: memref<32x8x128xf32, #tpu.memory_space<vmem>>, %arg2: memref<128x384xf32, #tpu.memory_space<vmem>>, %arg3: memref<1x384xf32, #tpu.memory_space<vmem>>, %arg4: memref<8x8xf32, #tpu.memory_space<vmem>>, %arg5: memref<32x8x128xf32, #tpu.memory_space<vmem>>) attributes {dimension_semantics = [#tpu.dimension_semantics<parallel>], iteration_bounds = array<i64: 1>, scalar_prefetch = 0 : i64, scratch_operands = 0 : i64, tpu.core_type = #tpu.core_type<tc>, window_params = [{transform_indices = @transform_0, window_bounds = array<i64: 32, 8, 128>}, {pipeline_mode = #tpu.pipeline_mode<synchronous>, transform_indices = @transform_1, window_bounds = array<i64: 128, 384>}, {pipeline_mode = #tpu.pipeline_mode<synchronous>, transform_indices = @transform_2, window_bounds = array<i64: 1, 384>}, {pipeline_mode = #tpu.pipeline_mode<synchronous>, transform_indices = @transform_3, window_bounds = array<i64: 8, 8>}, {transform_indices = @transform_4, window_bounds = array<i64: 32, 8, 128>}]} {
    %c0 = arith.constant 0 : index
    %c0_0 = arith.constant 0 : index
    %c0_1 = arith.constant 0 : index
    %0 = vector.load %arg1[%c0, %c0_0, %c0_1] : memref<32x8x128xf32, #tpu.memory_space<vmem>>, vector<32x8x128xf32>
    %1 = vector.shape_cast %0 : vector<32x8x128xf32> to vector<256x128xf32>
    %c0_2 = arith.constant 0 : index
    %c0_3 = arith.constant 0 : index
    %2 = vector.load %arg2[%c0_2, %c0_3] : memref<128x384xf32, #tpu.memory_space<vmem>>, vector<128x384xf32>
    %cst = arith.constant dense<0.000000e+00> : vector<256x384xf32>
    %3 = tpu.matmul %1, %2, %cst {dimension_numbers = #tpu.dot_dimension_numbers<[1], [0], [0], [1], [0, 0, 1, 1], [], []>} : vector<256x128xf32>, vector<128x384xf32>, vector<256x384xf32> -> vector<256x384xf32>
    %c0_4 = arith.constant 0 : index
    %c0_5 = arith.constant 0 : index
    %4 = vector.load %arg3[%c0_4, %c0_5] : memref<1x384xf32, #tpu.memory_space<vmem>>, vector<1x384xf32>
    %5 = vector.broadcast %4 : vector<1x384xf32> to vector<256x384xf32>
    %6 = arith.addf %3, %5 : vector<256x384xf32>
    %7 = vector.shape_cast %6 : vector<256x384xf32> to vector<32x8x384xf32>
    %8 = vector.extract_strided_slice %7 {offsets = [0, 0, 0], sizes = [32, 8, 128], strides = [1, 1, 1]} : vector<32x8x384xf32> to vector<32x8x128xf32>
    %9 = vector.extract_strided_slice %7 {offsets = [0, 0, 128], sizes = [32, 8, 128], strides = [1, 1, 1]} : vector<32x8x384xf32> to vector<32x8x128xf32>
    %10 = vector.extract_strided_slice %7 {offsets = [0, 0, 256], sizes = [32, 8, 128], strides = [1, 1, 1]} : vector<32x8x384xf32> to vector<32x8x128xf32>
    "tpu.trace_start"() <{level = 10 : i32, message = "nld,nmd->nlm"}> : () -> ()
    %cst_6 = arith.constant dense<0.000000e+00> : vector<32x8x8xf32>
    %11 = tpu.matmul %8, %9, %cst_6 {dimension_numbers = #tpu.dot_dimension_numbers<[2], [2], [1], [1], [0, 0, 0, 1, 1, 1], [0], [0]>} : vector<32x8x128xf32>, vector<32x8x128xf32>, vector<32x8x8xf32> -> vector<32x8x8xf32>
    "tpu.trace_stop"() : () -> ()
    %cst_7 = arith.constant dense<0xFF800000> : vector<32x8xf32>
    %12 = vector.multi_reduction <maximumf>, %11, %cst_7 [2] : vector<32x8x8xf32> to vector<32x8xf32>
    %13 = vector.shape_cast %12 : vector<32x8xf32> to vector<32x8x1xf32>
    %14 = vector.broadcast %13 : vector<32x8x1xf32> to vector<32x8x8xf32>
    %15 = arith.subf %11, %14 : vector<32x8x8xf32>
    %16 = math.exp %15 : vector<32x8x8xf32>
    %cst_8 = arith.constant dense<0.000000e+00> : vector<32x8xf32>
    %17 = vector.multi_reduction <add>, %16, %cst_8 [2] : vector<32x8x8xf32> to vector<32x8xf32>
    %18 = vector.shape_cast %17 : vector<32x8xf32> to vector<32x8x1xf32>
    %c0_9 = arith.constant 0 : index
    %c0_10 = arith.constant 0 : index
    %19 = vector.load %arg4[%c0_9, %c0_10] : memref<8x8xf32, #tpu.memory_space<vmem>>, vector<8x8xf32>
    %20 = vector.shape_cast %19 : vector<8x8xf32> to vector<1x8x8xf32>
    %21 = vector.broadcast %20 : vector<1x8x8xf32> to vector<32x8x8xf32>
    %22 = arith.mulf %16, %21 : vector<32x8x8xf32>
    "tpu.trace_start"() <{level = 10 : i32, message = "nlm,nmd->nld"}> : () -> ()
    %cst_11 = arith.constant dense<0.000000e+00> : vector<32x8x128xf32>
    %23 = tpu.matmul %22, %10, %cst_11 {dimension_numbers = #tpu.dot_dimension_numbers<[2], [1], [1], [2], [0, 0, 0, 1, 1, 2], [0], [0]>} : vector<32x8x8xf32>, vector<32x8x128xf32>, vector<32x8x128xf32> -> vector<32x8x128xf32>
    "tpu.trace_stop"() : () -> ()
    %24 = tpu.reciprocal %18 {approx = true} : vector<32x8x1xf32> -> vector<32x8x1xf32>
    %25 = vector.broadcast %24 : vector<32x8x1xf32> to vector<32x8x128xf32>
    %26 = arith.mulf %23, %25 : vector<32x8x128xf32>
    %c0_12 = arith.constant 0 : index
    %c0_13 = arith.constant 0 : index
    %c0_14 = arith.constant 0 : index
    %27 = vector.load %arg5[%c0_12, %c0_13, %c0_14] : memref<32x8x128xf32, #tpu.memory_space<vmem>>, vector<32x8x128xf32>
    tpu.vector_store %arg5[%c0_12, %c0_13, %c0_14], %26 {strides = array<i32>} : memref<32x8x128xf32, #tpu.memory_space<vmem>>, vector<32x8x128xf32>,
    return
  }
  func.func @transform_0(%arg0: i32) -> (i32, i32, i32) {
    %c0_i32 = arith.constant 0 : i32
    %c0_i32_0 = arith.constant 0 : i32
    %c0_i32_1 = arith.constant 0 : i32
    return %arg0, %c0_i32, %c0_i32_0 : i32, i32, i32
  }
  func.func @transform_1(%arg0: i32) -> (i32, i32) {
    %c0_i32 = arith.constant 0 : i32
    %c0_i32_0 = arith.constant 0 : i32
    %c0_i32_1 = arith.constant 0 : i32
    return %c0_i32, %c0_i32_0 : i32, i32
  }
  func.func @transform_2(%arg0: i32) -> (i32, i32) {
    %c0_i32 = arith.constant 0 : i32
    %c0_i32_0 = arith.constant 0 : i32
    %c0_i32_1 = arith.constant 0 : i32
    return %c0_i32, %c0_i32_0 : i32, i32
  }
  func.func @transform_3(%arg0: i32) -> (i32, i32) {
    %c0_i32 = arith.constant 0 : i32
    %c0_i32_0 = arith.constant 0 : i32
    %c0_i32_1 = arith.constant 0 : i32
    return %c0_i32, %c0_i32_0 : i32, i32
  }
  func.func @transform_4(%arg0: i32) -> (i32, i32, i32) {
    %c0_i32 = arith.constant 0 : i32
    %c0_i32_0 = arith.constant 0 : i32
    %c0_i32_1 = arith.constant 0 : i32
    return %arg0, %c0_i32, %c0_i32_0 : i32, i32, i32
  }
}

</mosaic_0001>

<bundles_post_ra>
// kernel: manhattan_self_attention.2
= control target key start
LH: loop header
LB: loop body
LE: loop exit
PB: predicated region body
PF: predicated region fallthrough
CT: control target
= control target key end

     0   :  { %v4156_v3 = vmov 0.0   ;;  %vm1796_vm0 = vcmask 130048   ;;  %s5054_s1 = inlined_call_operand.vmem [shape: f32[128,384], index: 1, kind: input, shape index: {}]   ;;  %s5055_s0 = inlined_call_operand.vmem [shape: f32[16,16,128], index: 0, kind: input, shape index: {}]   ;;  %s5056_s2 = inlined_call_operand.vmem [shape: f32[1,384], index: 2, kind: input, shape index: {}]   ;;  %s5057_s3 = inlined_call_operand.vmem [shape: f32[16,16], index: 3, kind: input, shape index: {}]   ;;  %s5058_s4 = inlined_call_operand.vmem [shape: f32[16,16,128], index: 4, kind: output, shape index: {}]  }
   0x1   :  { %v95_v0 = vld [vmem:[%s5054_s1 + $0x170] sm:$0xff]  ;;  %v94_v1 = vld [vmem:[%s5054_s1 + $0x168] sm:$0xff]  ;;  %v92_v2 = vld [vmem:[%s5054_s1 + $0x158] sm:$0xff]  ;;  %178 = vmatprep.mubr.f32.mxu0 %v4156_v3 }
   0x2   :  { %114 = vmatprep.subr.mxu0 %v95_v0  ;;  %v91_v4 = vld [vmem:[%s5054_s1 + $0x150] sm:$0xff]  ;;  %v89_v5 = vld [vmem:[%s5054_s1 + $0x140] sm:$0xff]  ;;  %v88_v6 = vld [vmem:[%s5054_s1 + $0x138] sm:$0xff] }
   0x3   :  { %115 = vmatpush1.msra.mxu0 %v94_v1  ;;  %v86_v7 = vld [vmem:[%s5054_s1 + $0x128] sm:$0xff]  ;;  %v85_v8 = vld [vmem:[%s5054_s1 + $0x120] sm:$0xff]  ;;  %v83_v9 = vld [vmem:[%s5054_s1 + $0x110] sm:$0xff] }
   0x4   :  { %116 = vmatprep.subr.mxu0 %v92_v2  ;;  %v82_v10 = vld [vmem:[%s5054_s1 + $0x108] sm:$0xff]  ;;  %v80_v11 = vld [vmem:[%s5054_s1 + $0xf8] sm:$0xff]  ;;  %v79_v12 = vld [vmem:[%s5054_s1 + $0xf0] sm:$0xff] }
   0x5   :  { %117 = vmatpush1.msra.mxu0 %v91_v4  ;;  %v77_v13 = vld [vmem:[%s5054_s1 + $0xe0] sm:$0xff]  ;;  %v76_v15 = vld [vmem:[%s5054_s1 + $0xd8] sm:$0xff]  ;;  %v74_v16 = vld [vmem:[%s5054_s1 + $0xc8] sm:$0xff] }
   0x6   :  { %118 = vmatprep.subr.mxu0 %v89_v5  ;;  %v4225_v14 = vld [vmem:[%s5055_s0] sm:$0xff]  ;;  %v71_v18 = vld [vmem:[%s5054_s1 + $0xb0] sm:$0xff]  ;;  %v70_v19 = vld [vmem:[%s5054_s1 + $0xa8] sm:$0xff] }
   0x7   :  { %119 = vmatpush1.msra.mxu0 %v88_v6  ;;  %3755 = vmatprep.mubr.f32.mxu1 %v4225_v14  ;;  %v73_v17 = vld [vmem:[%s5054_s1 + $0xc0] sm:$0xff]  ;;  %v68_v20 = vld [vmem:[%s5054_s1 + $0x98] sm:$0xff]  ;;  %v67_v21 = vld [vmem:[%s5054_s1 + $0x90] sm:$0xff] }
   0x8   :  { %120 = vmatprep.subr.mxu0 %v86_v7  ;;  %v65_v22 = vld [vmem:[%s5054_s1 + $0x80] sm:$0xff]  ;;  %v64_v23 = vld [vmem:[%s5054_s1 + $0x78] sm:$0xff]  ;;  %v62_v25 = vld [vmem:[%s5054_s1 + $0x68] sm:$0xff] }
   0x9   :  { %121 = vmatpush1.msra.mxu0 %v85_v8  ;;  %v96_v24 = vld [vmem:[%s5054_s1 + $0x178] sm:$0xff]  ;;  %v93_v26 = vld [vmem:[%s5054_s1 + $0x160] sm:$0xff]  ;;  %v90_v28 = vld [vmem:[%s5054_s1 + $0x148] sm:$0xff] }
   0xa   :  { %122 = vmatprep.subr.mxu0 %v83_v9  ;;  %3723 = vmatprep.subr.mxu1 %v96_v24  ;;  %v61_v27 = vld [vmem:[%s5054_s1 + $0x60] sm:$0xff]  ;;  %v59_v29 = vld [vmem:[%s5054_s1 + $0x50] sm:$0xff]  ;;  %v58_v30 = vld [vmem:[%s5054_s1 + $0x48] sm:$0xff] }
   0xb   :  { %123 = vmatpush1.msra.mxu0 %v82_v10  ;;  %3724 = vmatpush3.msra.mxu1 %v96_v24  ;;  %v87_v31 = vld [vmem:[%s5054_s1 + $0x130] sm:$0xff]  ;;  %v56_v32 = vld [vmem:[%s5054_s1 + $0x38] sm:$0xff]  ;;  %v53_v35 = vld [vmem:[%s5054_s1 + $0x20] sm:$0xff] }
   0xc   :  { %124 = vmatprep.subr.mxu0 %v80_v11  ;;  %3725 = vmatprep.subr.mxu1 %v93_v26  ;;  %v55_v33 = vld [vmem:[%s5054_s1 + $0x30] sm:$0xff]  ;;  %v84_v34 = vld [vmem:[%s5054_s1 + $0x118] sm:$0xff]  ;;  %v81_v37 = vld [vmem:[%s5054_s1 + $0x100] sm:$0xff] }
   0xd   :  { %125 = vmatpush1.msra.mxu0 %v79_v12  ;;  %3726 = vmatpush3.msra.mxu1 %v93_v26  ;;  %v52_v36 = vld [vmem:[%s5054_s1 + $0x18] sm:$0xff]  ;;  %v50_v38 = vld [vmem:[%s5054_s1 + $0x8] sm:$0xff]  ;;  %v49_v39 = vld [vmem:[%s5054_s1] sm:$0xff] }
   0xe   :  { %126 = vmatprep.subr.mxu0 %v77_v13  ;;  %3727 = vmatprep.subr.mxu1 %v90_v28  ;;  %v78_v40 = vld [vmem:[%s5054_s1 + $0xe8] sm:$0xff]  ;;  %v75_v41 = vld [vmem:[%s5054_s1 + $0xd0] sm:$0xff]  ;;  %v72_v42 = vld [vmem:[%s5054_s1 + $0xb8] sm:$0xff] }
   0xf   :  { %127 = vmatpush1.msra.mxu0 %v76_v15  ;;  %3728 = vmatpush3.msra.mxu1 %v90_v28  ;;  %v18_v43 = vld [vmem:[%s5055_s0 + $0x8] sm:$0xff]  ;;  %v69_v44 = vld [vmem:[%s5054_s1 + $0xa0] sm:$0xff]  ;;  %v19_v46 = vld [vmem:[%s5055_s0 + $0x10] sm:$0xff] }
  0x10   :  { %128 = vmatprep.subr.mxu0 %v74_v16  ;;  %3729 = vmatprep.subr.mxu1 %v87_v31  ;;  %v66_v45 = vld [vmem:[%s5054_s1 + $0x88] sm:$0xff]  ;;  %v63_v47 = vld [vmem:[%s5054_s1 + $0x70] sm:$0xff]  ;;  %v60_v48 = vld [vmem:[%s5054_s1 + $0x58] sm:$0xff] }
  0x11   :  { %129 = vmatpush1.msra.mxu0 %v73_v17  ;;  %3730 = vmatpush3.msra.mxu1 %v87_v31  ;;  %v20_v49 = vld [vmem:[%s5055_s0 + $0x18] sm:$0xff]  ;;  %v57_v50 = vld [vmem:[%s5054_s1 + $0x40] sm:$0xff]  ;;  %v54_v51 = vld [vmem:[%s5054_s1 + $0x28] sm:$0xff] }
  0x12   :  { %130 = vmatprep.subr.mxu0 %v71_v18  ;;  %3731 = vmatprep.subr.mxu1 %v84_v34  ;;  %v21_v52 = vld [vmem:[%s5055_s0 + $0x20] sm:$0xff]  ;;  %v51_v53 = vld [vmem:[%s5054_s1 + $0x10] sm:$0xff]  ;;  %v22_v54 = vld [vmem:[%s5055_s0 + $0x28] sm:$0xff]  ;;  %v99_v18 = vlaneseq }
  0x13   :  { %131 = vmatpush1.msra.mxu0 %v70_v19  ;;  %3732 = vmatpush3.msra.mxu1 %v84_v34  ;;  %v23_v55 = vld [vmem:[%s5055_s0 + $0x30] sm:$0xff]  ;;  %v24_v56 = vld [vmem:[%s5055_s0 + $0x38] sm:$0xff]  ;;  %v25_v57 = vld [vmem:[%s5055_s0 + $0x40] sm:$0xff] }
  0x14   :  { %132 = vmatprep.subr.mxu0 %v68_v20  ;;  %3733 = vmatprep.subr.mxu1 %v81_v37  ;;  %v26_v58 = vld [vmem:[%s5055_s0 + $0x48] sm:$0xff]  ;;  %v27_v59 = vld [vmem:[%s5055_s0 + $0x50] sm:$0xff]  ;;  %v28_v60 = vld [vmem:[%s5055_s0 + $0x58] sm:$0xff]  ;;  %v100_v19 = vshrl.u32 %v99_v18, 7 }
  0x15   :  { %133 = vmatpush1.msra.mxu0 %v67_v21  ;;  %3734 = vmatpush3.msra.mxu1 %v81_v37  ;;  %v29_v61 = vld [vmem:[%s5055_s0 + $0x60] sm:$0xff]  ;;  %v30_v62 = vld [vmem:[%s5055_s0 + $0x68] sm:$0xff]  ;;  %v31_v63 = vld [vmem:[%s5055_s0 + $0x70] sm:$0xff] }
  0x16   :  { %134 = vmatprep.subr.mxu0 %v65_v22  ;;  %3735 = vmatprep.subr.mxu1 %v78_v40  ;;  %v32_v0 = vld [vmem:[%s5055_s0 + $0x78] sm:$0xff]  ;;  %v33_v1 = vld [vmem:[%s5055_s0 + $0x80] sm:$0xff]  ;;  %v34_v2 = vld [vmem:[%s5055_s0 + $0x88] sm:$0xff]  ;;  %v101_v20 = vsub.s32 0, %v100_v19 }
  0x17   :  { %135 = vmatpush1.msra.mxu0 %v64_v23  ;;  %3736 = vmatpush3.msra.mxu1 %v78_v40  ;;  %v35_v4 = vld [vmem:[%s5055_s0 + $0x90] sm:$0xff]  ;;  %v36_v5 = vld [vmem:[%s5055_s0 + $0x98] sm:$0xff]  ;;  %v37_v6 = vld [vmem:[%s5055_s0 + $0xa0] sm:$0xff] }
  0x18   :  { %136 = vmatprep.subr.mxu0 %v62_v25  ;;  %3737 = vmatprep.subr.mxu1 %v75_v41  ;;  %v38_v7 = vld [vmem:[%s5055_s0 + $0xa8] sm:$0xff]  ;;  %v39_v8 = vld [vmem:[%s5055_s0 + $0xb0] sm:$0xff]  ;;  %v40_v9 = vld [vmem:[%s5055_s0 + $0xb8] sm:$0xff]  ;;  %v105_v25 = vsub.s32 1, %v100_v19 }
  0x19   :  { %137 = vmatpush1.msra.mxu0 %v61_v27  ;;  %3738 = vmatpush3.msra.mxu1 %v75_v41  ;;  %v41_v10 = vld [vmem:[%s5055_s0 + $0xc0] sm:$0xff]  ;;  %v42_v11 = vld [vmem:[%s5055_s0 + $0xc8] sm:$0xff]  ;;  %v43_v12 = vld [vmem:[%s5055_s0 + $0xd0] sm:$0xff] }
  0x1a   :  { %138 = vmatprep.subr.mxu0 %v59_v29  ;;  %3739 = vmatprep.subr.mxu1 %v72_v42  ;;  %v44_v13 = vld [vmem:[%s5055_s0 + $0xd8] sm:$0xff]  ;;  %v46_v15 = vld [vmem:[%s5055_s0 + $0xe8] sm:$0xff]  ;;  %v47_v16 = vld [vmem:[%s5055_s0 + $0xf0] sm:$0xff] }
  0x1b   :  { %139 = vmatpush1.msra.mxu0 %v58_v30  ;;  %3740 = vmatpush3.msra.mxu1 %v72_v42  ;;  %v48_v17 = vld [vmem:[%s5055_s0 + $0xf8] sm:$0xff]  ;;  %v97_v21 = vld [vmem:[%s5056_s2] sm:$0x7] }
  0x1c   :  { %140 = vmatprep.subr.mxu0 %v56_v32  ;;  %3741 = vmatprep.subr.mxu1 %v69_v44  ;;  %v4461_v22 = vrot.slane %v97_v21, %v101_v20  ;;  %v4464_v28 = vrot.slane %v97_v21, %v105_v25 }
  0x1d   :  { %141 = vmatpush1.msra.mxu0 %v55_v33  ;;  %3742 = vmatpush3.msra.mxu1 %v69_v44 }
  0x1e   :  { %142 = vmatprep.subr.mxu0 %v53_v35  ;;  %3743 = vmatprep.subr.mxu1 %v66_v45 }
  0x1f   :  { %143 = vmatpush1.msra.mxu0 %v52_v36  ;;  %3744 = vmatpush3.msra.mxu1 %v66_v45 }
  0x20   :  { %144 = vmatprep.subr.mxu0 %v50_v38  ;;  %3745 = vmatprep.subr.mxu1 %v63_v47 }
  0x21   :  { %145 = vmatpush1.msra.mxu0 %v49_v39  ;;  %3746 = vmatpush3.msra.mxu1 %v63_v47 }
  0x22   :  { %179 = vmatmul.mubr.f32.vlgmr.msra.gmra.mxu0 %v4225_v14  ;;  %3747 = vmatprep.subr.mxu1 %v60_v48  ;;  %v45_v14 = vld [vmem:[%s5055_s0 + $0xe0] sm:$0xff] }
  0x23   :  { %184 = vmatprep.mubr.f32.mxu0 %v4156_v3  ;;  %3748 = vmatpush3.msra.mxu1 %v60_v48 }
  0x24   :  { %3749 = vmatprep.subr.mxu1 %v57_v50 }
  0x25   :  { %3750 = vmatpush3.msra.mxu1 %v57_v50  ;;  %v109_v50 = vsub.s32 2, %v100_v19 }
  0x26   :  { %185 = vmatmul.mubr.f32.gmra.mxu0 %v18_v43  ;;  %3751 = vmatprep.subr.mxu1 %v54_v51 }
  0x27   :  { %190 = vmatprep.mubr.f32.mxu0 %v4156_v3  ;;  %3752 = vmatpush3.msra.mxu1 %v54_v51 }
  0x28   :  { %3753 = vmatprep.subr.mxu1 %v51_v53 }
  0x29   :  { %3754 = vmatpush3.msra.mxu1 %v51_v53 }
  0x2a   :  { %191 = vmatmul.mubr.f32.gmra.mxu0 %v19_v46  ;;  %3756 = vmatmul.mubr.f32.vlgmr.msra.gmra.mxu1 %v18_v43 }
  0x2b   :  { %196 = vmatprep.mubr.f32.mxu0 %v4156_v3  ;;  %3758 = vmatprep.mubr.f32.mxu1 %v19_v46 }
  0x2e   :  { %197 = vmatmul.mubr.f32.gmra.mxu0 %v20_v49  ;;  %3759 = vmatmul.mubr.f32.gmra.mxu1 %v20_v49 }
  0x2f   :  { %202 = vmatprep.mubr.f32.mxu0 %v4156_v3  ;;  %3761 = vmatprep.mubr.f32.mxu1 %v21_v52 }
  0x32   :  { %203 = vmatmul.mubr.f32.gmra.mxu0 %v21_v52  ;;  %3762 = vmatmul.mubr.f32.gmra.mxu1 %v22_v54 }
  0x33   :  { %208 = vmatprep.mubr.f32.mxu0 %v4156_v3  ;;  %3764 = vmatprep.mubr.f32.mxu1 %v23_v55 }
  0x36   :  { %209 = vmatmul.mubr.f32.gmra.mxu0 %v22_v54  ;;  %3765 = vmatmul.mubr.f32.gmra.mxu1 %v24_v56 }
  0x37   :  { %214 = vmatprep.mubr.f32.mxu0 %v4156_v3  ;;  %3767 = vmatprep.mubr.f32.mxu1 %v25_v57 }
  0x3a   :  { %215 = vmatmul.mubr.f32.gmra.mxu0 %v23_v55  ;;  %3768 = vmatmul.mubr.f32.gmra.mxu1 %v26_v58 }
  0x3b   :  { %220 = vmatprep.mubr.f32.mxu0 %v4156_v3  ;;  %3770 = vmatprep.mubr.f32.mxu1 %v27_v59 }
  0x3e   :  { %221 = vmatmul.mubr.f32.gmra.mxu0 %v24_v56  ;;  %3771 = vmatmul.mubr.f32.gmra.mxu1 %v28_v60  ;;  %v4486_v56 = vrot.slane %v97_v21, %v109_v50 }
  0x3f   :  { %226 = vmatprep.mubr.f32.mxu0 %v4156_v3  ;;  %3773 = vmatprep.mubr.f32.mxu1 %v29_v61 }
  0x40   :  { %5068 = vst [vmem:[#allocation2_spill] sm:$0xff] %v4486_v56 }
  0x42   :  { %227 = vmatmul.mubr.f32.gmra.mxu0 %v25_v57  ;;  %3774 = vmatmul.mubr.f32.gmra.mxu1 %v30_v62 }
  0x43   :  { %232 = vmatprep.mubr.f32.mxu0 %v4156_v3  ;;  %3776 = vmatprep.mubr.f32.mxu1 %v31_v63 }
  0x46   :  { %233 = vmatmul.mubr.f32.gmra.mxu0 %v26_v58  ;;  %3777 = vmatmul.mubr.f32.gmra.mxu1 %v32_v0 }
  0x47   :  { %238 = vmatprep.mubr.f32.mxu0 %v4156_v3  ;;  %3779 = vmatprep.mubr.f32.mxu1 %v33_v1 }
  0x4a   :  { %239 = vmatmul.mubr.f32.gmra.mxu0 %v27_v59  ;;  %3780 = vmatmul.mubr.f32.gmra.mxu1 %v34_v2 }
  0x4b   :  { %244 = vmatprep.mubr.f32.mxu0 %v4156_v3  ;;  %3782 = vmatprep.mubr.f32.mxu1 %v35_v4 }
  0x4e   :  { %245 = vmatmul.mubr.f32.gmra.mxu0 %v28_v60  ;;  %3783 = vmatmul.mubr.f32.gmra.mxu1 %v36_v5 }
  0x4f   :  { %250 = vmatprep.mubr.f32.mxu0 %v4156_v3  ;;  %3785 = vmatprep.mubr.f32.mxu1 %v37_v6 }
  0x52   :  { %251 = vmatmul.mubr.f32.gmra.mxu0 %v29_v61  ;;  %3786 = vmatmul.mubr.f32.gmra.mxu1 %v38_v7 }
  0x53   :  { %256 = vmatprep.mubr.f32.mxu0 %v4156_v3  ;;  %3788 = vmatprep.mubr.f32.mxu1 %v39_v8 }
  0x56   :  { %257 = vmatmul.mubr.f32.gmra.mxu0 %v30_v62  ;;  %3789 = vmatmul.mubr.f32.gmra.mxu1 %v40_v9 }
  0x57   :  { %262 = vmatprep.mubr.f32.mxu0 %v4156_v3  ;;  %3791 = vmatprep.mubr.f32.mxu1 %v41_v10 }
  0x5a   :  { %263 = vmatmul.mubr.f32.gmra.mxu0 %v31_v63  ;;  %3792 = vmatmul.mubr.f32.gmra.mxu1 %v42_v11 }
  0x5b   :  { %268 = vmatprep.mubr.f32.mxu0 %v4156_v3  ;;  %3794 = vmatprep.mubr.f32.mxu1 %v43_v12 }
  0x5e   :  { %269 = vmatmul.mubr.f32.gmra.mxu0 %v32_v0  ;;  %3795 = vmatmul.mubr.f32.gmra.mxu1 %v44_v13 }
  0x5f   :  { %274 = vmatprep.mubr.f32.mxu0 %v4156_v3  ;;  %3797 = vmatprep.mubr.f32.mxu1 %v45_v14 }
  0x62   :  { %275 = vmatmul.mubr.f32.gmra.mxu0 %v33_v1  ;;  %3798 = vmatmul.mubr.f32.gmra.mxu1 %v46_v15 }
  0x63   :  { %280 = vmatprep.mubr.f32.mxu0 %v4156_v3  ;;  %3800 = vmatprep.mubr.f32.mxu1 %v47_v16 }
  0x66   :  { %281 = vmatmul.mubr.f32.gmra.mxu0 %v34_v2  ;;  %3801 = vmatmul.mubr.f32.gmra.mxu1 %v48_v17 }
  0x67   :  { %286 = vmatprep.mubr.f32.mxu0 %v4156_v3 }
  0x6a   :  { %287 = vmatmul.mubr.f32.gmra.mxu0 %v35_v4 }
  0x6b   :  { %292 = vmatprep.mubr.f32.mxu0 %v4156_v3 }
  0x6e   :  { %293 = vmatmul.mubr.f32.gmra.mxu0 %v36_v5 }
  0x6f   :  { %298 = vmatprep.mubr.f32.mxu0 %v4156_v3 }
  0x72   :  { %299 = vmatmul.mubr.f32.gmra.mxu0 %v37_v6 }
  0x73   :  { %304 = vmatprep.mubr.f32.mxu0 %v4156_v3 }
  0x76   :  { %305 = vmatmul.mubr.f32.gmra.mxu0 %v38_v7 }
  0x77   :  { %310 = vmatprep.mubr.f32.mxu0 %v4156_v3 }
  0x7a   :  { %311 = vmatmul.mubr.f32.gmra.mxu0 %v39_v8 }
  0x7b   :  { %316 = vmatprep.mubr.f32.mxu0 %v4156_v3 }
  0x7e   :  { %317 = vmatmul.mubr.f32.gmra.mxu0 %v40_v9 }
  0x7f   :  { %322 = vmatprep.mubr.f32.mxu0 %v4156_v3 }
  0x82   :  { %323 = vmatmul.mubr.f32.gmra.mxu0 %v41_v10 }
  0x83   :  { %328 = vmatprep.mubr.f32.mxu0 %v4156_v3 }
  0x86   :  { %329 = vmatmul.mubr.f32.gmra.mxu0 %v42_v11 }
  0x87   :  { %334 = vmatprep.mubr.f32.mxu0 %v4156_v3 }
  0x8a   :  { %335 = vmatmul.mubr.f32.gmra.mxu0 %v43_v12 }
  0x8b   :  { %340 = vmatprep.mubr.f32.mxu0 %v4156_v3 }
  0x8e   :  { %341 = vmatmul.mubr.f32.gmra.mxu0 %v44_v13 }
  0x8f   :  { %346 = vmatprep.mubr.f32.mxu0 %v4156_v3 }
  0x92   :  { %347 = vmatmul.mubr.f32.gmra.mxu0 %v45_v14 }
  0x93   :  { %352 = vmatprep.mubr.f32.mxu0 %v4156_v3 }
  0x96   :  { %353 = vmatmul.mubr.f32.gmra.mxu0 %v46_v15 }
  0x97   :  { %358 = vmatprep.mubr.f32.mxu0 %v4156_v3 }
  0x9a   :  { %359 = vmatmul.mubr.f32.gmra.mxu0 %v47_v16 }
  0x9b   :  { %364 = vmatprep.mubr.f32.mxu0 %v4156_v3 }
  0x9e   :  { %365 = vmatmul.mubr.f32.gmra.mxu0 %v48_v17 }
  0xe2   :  { %v180_v23 = vpop.f32.mrf.mxu0 }
  0xe3   :  { %v181_v24 = vadd.f32 %v180_v23, %v4461_v22 }
  0xe4   :  { %v182_v26 = vpop.f32.mrf.mxu0 }
  0xe5   :  { %3807 = vmatprep.mubr.f32.mxu1 %v181_v24  ;;  %v183_v31 = vadd.f32 %v182_v26, %v4464_v28 }
  0xe6   :  { %v186_v27 = vpop.f32.mrf.mxu0 }
  0xe7   :  { %v187_v35 = vadd.f32 %v186_v27, %v4461_v22 }
  0xe8   :  { %v188_v3 = vpop.f32.mrf.mxu0 }
  0xe9   :  { %v189_v29 = vadd.f32 %v188_v3, %v4464_v28 }
  0xea   :  { %v192_v30 = vpop.f32.mrf.mxu0  ;;  %v4472_v41 = vpop.f32.mrf.mxu1 }
  0xeb   :  { %3803 = vmatprep.subr.mxu1 %v189_v29  ;;  %v193_v37 = vadd.f32 %v192_v30, %v4461_v22 }
  0xec   :  { %v194_v32 = vpop.f32.mrf.mxu0  ;;  %3804 = vmatpush3.xpose.msra.mxu1 %v189_v29  ;;  %v4474_v43 = vpop.f32.mrf.mxu1 }
  0xed   :  { %3805 = vmatprep.subr.mxu1 %v183_v31  ;;  %v195_v39 = vadd.f32 %v194_v32, %v4464_v28 }
  0xee   :  { %v198_v33 = vpop.f32.mrf.mxu0  ;;  %v4478_v47 = vpop.f32.mrf.mxu1 }
  0xef   :  { %v199_v45 = vadd.f32 %v198_v33, %v4461_v22 }
  0xf0   :  { %v200_v34 = vpop.f32.mrf.mxu0  ;;  %3806 = vmatpush3.xpose.msra.mxu1 %v183_v31  ;;  %v4482_v52 = vpop.f32.mrf.mxu1 }
  0xf1   :  { %v201_v36 = vadd.f32 %v200_v34, %v4464_v28 }
  0xf2   :  { %v204_v38 = vpop.f32.mrf.mxu0  ;;  %v4484_v54 = vpop.f32.mrf.mxu1 }
  0xf3   :  { %3808 = vmatmul.mubr.f32.vlgmr.msra.gmra.mxu1 %v187_v35  ;;  %3810 = vmatprep.subr.mxu1 %v201_v36  ;;  %v205_v48 = vadd.f32 %v204_v38, %v4461_v22 }
  0xf4   :  { %v206_v40 = vpop.f32.mrf.mxu0  ;;  %3811 = vmatpush3.xpose.msra.mxu1 %v201_v36  ;;  %3814 = vmatprep.mubr.f32.mxu1 %v193_v37  ;;  %v457_v57 = vpop.f32.mrf.mxu1 }
  0xf5   :  { %3812 = vmatprep.subr.mxu1 %v195_v39  ;;  %v207_v51 = vadd.f32 %v206_v40, %v4464_v28  ;;  %v4489_v59 = vadd.f32 %v457_v57, %v4486_v56 }
  0xf6   :  { %v210_v42 = vpop.f32.mrf.mxu0  ;;  %v4493_v62 = vpop.f32.mrf.mxu1 }
  0xf7   :  { %v211_v60 = vadd.f32 %v210_v42, %v4461_v22 }
  0xf8   :  { %v212_v44 = vpop.f32.mrf.mxu0  ;;  %3813 = vmatpush3.xpose.msra.mxu1 %v195_v39  ;;  %v467_v2 = vpop.f32.mrf.mxu1 }
  0xf9   :  { %v213_v46 = vadd.f32 %v212_v44, %v4464_v28  ;;  %v4498_v5 = vadd.f32 %v467_v2, %v4486_v56 }
  0xfa   :  { %v216_v49 = vpop.f32.mrf.mxu0  ;;  %v3769_v6 = vpop.f32.mrf.mxu1 }
  0xfb   :  { %3815 = vmatmul.mubr.f32.vlgmr.msra.gmra.mxu1 %v199_v45  ;;  %3817 = vmatprep.subr.mxu1 %v213_v46  ;;  %v217_v63 = vadd.f32 %v216_v49, %v4461_v22  ;;  %v4501_v8 = vadd.f32 %v3769_v6, %v4486_v56 }
  0xfc   :  { %v218_v53 = vpop.f32.mrf.mxu0  ;;  %3818 = vmatpush3.xpose.msra.mxu1 %v213_v46  ;;  %3821 = vmatprep.mubr.f32.mxu1 %v205_v48  ;;  %v477_v9 = vpop.f32.mrf.mxu1 }
  0xfd   :  { %3819 = vmatprep.subr.mxu1 %v207_v51  ;;  %v219_v1 = vadd.f32 %v218_v53, %v4464_v28  ;;  %v4504_v11 = vadd.f32 %v477_v9, %v4486_v56 }
  0xfe   :  { %v222_v55 = vpop.f32.mrf.mxu0  ;;  %v3772_v14 = vpop.f32.mrf.mxu1 }
  0xff   :  { %v223_v12 = vadd.f32 %v222_v55, %v4461_v22  ;;  %v4510_v17 = vadd.f32 %v3772_v14, %v4486_v56 }
 0x100   :  { %v224_v58 = vpop.f32.mrf.mxu0  ;;  %3820 = vmatpush3.xpose.msra.mxu1 %v207_v51  ;;  %v487_v19 = vpop.f32.mrf.mxu1 }
 0x101   :  { %v225_v61 = vadd.f32 %v224_v58, %v4464_v28  ;;  %v4514_v21 = vadd.f32 %v487_v19, %v4486_v56 }
 0x102   :  { %v228_v0 = vpop.f32.mrf.mxu0  ;;  %v3775_v23 = vpop.f32.mrf.mxu1 }
 0x103   :  { %3822 = vmatmul.mubr.f32.vlgmr.msra.gmra.mxu1 %v211_v60  ;;  %3824 = vmatprep.subr.mxu1 %v225_v61  ;;  %v229_v15 = vadd.f32 %v228_v0, %v4461_v22  ;;  %v4517_v25 = vadd.f32 %v3775_v23, %v4486_v56 }
 0x104   :  { %v230_v4 = vpop.f32.mrf.mxu0  ;;  %3825 = vmatpush3.xpose.msra.mxu1 %v225_v61  ;;  %3828 = vmatprep.mubr.f32.mxu1 %v217_v63  ;;  %v497_v26 = vpop.f32.mrf.mxu1 }
 0x105   :  { %3826 = vmatprep.subr.mxu1 %v219_v1  ;;  %v231_v18 = vadd.f32 %v230_v4, %v4464_v28  ;;  %v4520_v3 = vadd.f32 %v497_v26, %v4486_v56 }
 0x106   :  { %v234_v7 = vpop.f32.mrf.mxu0  ;;  %v3778_v31 = vpop.f32.mrf.mxu1 }
 0x107   :  { %v235_v29 = vadd.f32 %v234_v7, %v4461_v22  ;;  %v4526_v34 = vadd.f32 %v3778_v31, %v4486_v56 }
 0x108   :  { %v236_v10 = vpop.f32.mrf.mxu0  ;;  %3827 = vmatpush3.xpose.msra.mxu1 %v219_v1  ;;  %v507_v36 = vpop.f32.mrf.mxu1 }
 0x109   :  { %v237_v13 = vadd.f32 %v236_v10, %v4464_v28  ;;  %v4530_v38 = vadd.f32 %v507_v36, %v4486_v56 }
 0x10a   :  { %v240_v16 = vpop.f32.mrf.mxu0  ;;  %v3781_v39 = vpop.f32.mrf.mxu1 }
 0x10b   :  { %3829 = vmatmul.mubr.f32.vlgmr.msra.gmra.mxu1 %v223_v12  ;;  %3831 = vmatprep.subr.mxu1 %v237_v13  ;;  %v241_v32 = vadd.f32 %v240_v16, %v4461_v22  ;;  %v4533_v42 = vadd.f32 %v3781_v39, %v4486_v56 }
 0x10c   :  { %v242_v20 = vpop.f32.mrf.mxu0  ;;  %3832 = vmatpush3.xpose.msra.mxu1 %v237_v13  ;;  %3835 = vmatprep.mubr.f32.mxu1 %v229_v15  ;;  %v517_v44 = vpop.f32.mrf.mxu1 }
 0x10d   :  { %3833 = vmatprep.subr.mxu1 %v231_v18  ;;  %v243_v35 = vadd.f32 %v242_v20, %v4464_v28  ;;  %v4536_v46 = vadd.f32 %v517_v44, %v4486_v56 }
 0x10e   :  { %v246_v24 = vpop.f32.mrf.mxu0  ;;  %v3784_v50 = vpop.f32.mrf.mxu1 }
 0x10f   :  { %v247_v48 = vadd.f32 %v246_v24, %v4461_v22  ;;  %v4542_v55 = vadd.f32 %v3784_v50, %v4486_v56 }
 0x110   :  { %v248_v27 = vpop.f32.mrf.mxu0  ;;  %3834 = vmatpush3.xpose.msra.mxu1 %v231_v18  ;;  %v527_v58 = vpop.f32.mrf.mxu1 }
 0x111   :  { %v249_v30 = vadd.f32 %v248_v27, %v4464_v28  ;;  %v4546_v61 = vadd.f32 %v527_v58, %v4486_v56 }
 0x112   :  { %v252_v33 = vpop.f32.mrf.mxu0  ;;  %v3787_v63 = vpop.f32.mrf.mxu1 }
 0x113   :  { %3836 = vmatmul.mubr.f32.vlgmr.msra.gmra.mxu1 %v235_v29  ;;  %3838 = vmatprep.subr.mxu1 %v249_v30  ;;  %v253_v51 = vadd.f32 %v252_v33, %v4461_v22  ;;  %v4549_v1 = vadd.f32 %v3787_v63, %v4486_v56 }
 0x114   :  { %v254_v37 = vpop.f32.mrf.mxu0  ;;  %3839 = vmatpush3.xpose.msra.mxu1 %v249_v30  ;;  %3842 = vmatprep.mubr.f32.mxu1 %v241_v32  ;;  %v537_v2 = vpop.f32.mrf.mxu1 }
 0x115   :  { %3840 = vmatprep.subr.mxu1 %v243_v35  ;;  %v255_v57 = vadd.f32 %v254_v37, %v4464_v28  ;;  %v4552_v6 = vadd.f32 %v537_v2, %v4486_v56 }
 0x116   :  { %v258_v40 = vpop.f32.mrf.mxu0  ;;  %v3790_v10 = vpop.f32.mrf.mxu1 }
 0x117   :  { %v259_v7 = vadd.f32 %v258_v40, %v4461_v22  ;;  %v4558_v14 = vadd.f32 %v3790_v10, %v4486_v56 }
 0x118   :  { %v260_v45 = vpop.f32.mrf.mxu0  ;;  %3841 = vmatpush3.xpose.msra.mxu1 %v243_v35  ;;  %v547_v18 = vpop.f32.mrf.mxu1 }
 0x119   :  { %v261_v49 = vadd.f32 %v260_v45, %v4464_v28  ;;  %v4563_v20 = vadd.f32 %v547_v18, %v4486_v56 }
 0x11a   :  { %v264_v53 = vpop.f32.mrf.mxu0  ;;  %v3793_v23 = vpop.f32.mrf.mxu1 }
 0x11b   :  { %3843 = vmatmul.mubr.f32.vlgmr.msra.gmra.mxu1 %v247_v48  ;;  %3845 = vmatprep.subr.mxu1 %v261_v49  ;;  %v265_v12 = vadd.f32 %v264_v53, %v4461_v22  ;;  %v4566_v26 = vadd.f32 %v3793_v23, %v4486_v56 }
 0x11c   :  { %v266_v60 = vpop.f32.mrf.mxu0  ;;  %3846 = vmatpush3.xpose.msra.mxu1 %v261_v49  ;;  %3849 = vmatprep.mubr.f32.mxu1 %v253_v51  ;;  %v557_v27 = vpop.f32.mrf.mxu1 }
 0x11d   :  { %3847 = vmatprep.subr.mxu1 %v255_v57  ;;  %v267_v15 = vadd.f32 %v266_v60, %v4464_v28  ;;  %v4569_v30 = vadd.f32 %v557_v27, %v4486_v56 }
 0x11e   :  { %v270_v0 = vpop.f32.mrf.mxu0  ;;  %v3796_v33 = vpop.f32.mrf.mxu1 }
 0x11f   :  { %v271_v31 = vadd.f32 %v270_v0, %v4461_v22  ;;  %v4574_v36 = vadd.f32 %v3796_v33, %v4486_v56 }
 0x120   :  { %v272_v4 = vpop.f32.mrf.mxu0  ;;  %3848 = vmatpush3.xpose.msra.mxu1 %v255_v57  ;;  %v567_v40 = vpop.f32.mrf.mxu1 }
 0x121   :  { %v273_v9 = vadd.f32 %v272_v4, %v4464_v28  ;;  %v4579_v45 = vadd.f32 %v567_v40, %v4486_v56 }
 0x122   :  { %v276_v13 = vpop.f32.mrf.mxu0  ;;  %v3799_v48 = vpop.f32.mrf.mxu1 }
 0x123   :  { %v277_v16 = vadd.f32 %v276_v13, %v4461_v22  ;;  %3850 = vmatmul.mubr.f32.vlgmr.msra.gmra.mxu1 %v259_v7  ;;  %3852 = vmatprep.subr.mxu1 %v273_v9  ;;  %5069 = vst [vmem:[#allocation3_spill] sm:$0xff] %v4579_v45  ;;  %v4582_v50 = vadd.f32 %v3799_v48, %v4486_v56 }
 0x124   :  { %v278_v19 = vpop.f32.mrf.mxu0  ;;  %3853 = vmatpush3.xpose.msra.mxu1 %v273_v9  ;;  %3856 = vmatprep.mubr.f32.mxu1 %v265_v12  ;;  %v577_v51 = vpop.f32.mrf.mxu1 }
 0x125   :  { %3854 = vmatprep.subr.mxu1 %v267_v15  ;;  %3863 = vmatprep.mubr.f32.mxu0 %v277_v16  ;;  %v279_v37 = vadd.f32 %v278_v19, %v4464_v28  ;;  %5070 = vst [vmem:[#allocation4_spill] sm:$0xff] %v4582_v50  ;;  %v4585_v57 = vadd.f32 %v577_v51, %v4486_v56 }
 0x126   :  { %v282_v24 = vpop.f32.mrf.mxu0  ;;  %v3802_v63 = vpop.f32.mrf.mxu1 }
 0x127   :  { %5071 = vst [vmem:[#allocation5_spill] sm:$0xff] %v4585_v57  ;;  %v283_v58 = vadd.f32 %v282_v24, %v4461_v22  ;;  %v4590_v2 = vadd.f32 %v3802_v63, %v4486_v56 }
 0x128   :  { %v284_v29 = vpop.f32.mrf.mxu0  ;;  %3855 = vmatpush3.xpose.msra.mxu1 %v267_v15 }
 0x129   :  { %v285_v32 = vadd.f32 %v284_v29, %v4464_v28  ;;  %5072 = vst [vmem:[#allocation6_spill] sm:$0xff] %v4590_v2 }
 0x12a   :  { %v288_v35 = vpop.f32.mrf.mxu0 }
 0x12b   :  { %v289_v39 = vadd.f32 %v288_v35, %v4461_v22  ;;  %3857 = vmatmul.mubr.f32.vlgmr.msra.gmra.mxu1 %v271_v31  ;;  %3859 = vmatprep.subr.mxu0 %v285_v32 }
 0x12c   :  { %v290_v44 = vpop.f32.mrf.mxu0  ;;  %3860 = vmatpush3.xpose.msra.mxu0 %v285_v32 }
 0x12d   :  { %3861 = vmatprep.subr.mxu0 %v279_v37  ;;  %3870 = vmatprep.mubr.f32.mxu1 %v289_v39  ;;  %v291_v4 = vadd.f32 %v290_v44, %v4464_v28 }
 0x12e   :  { %v294_v49 = vpop.f32.mrf.mxu0 }
 0x12f   :  { %v295_v13 = vadd.f32 %v294_v49, %v4461_v22 }
 0x130   :  { %v296_v53 = vpop.f32.mrf.mxu0  ;;  %3862 = vmatpush3.xpose.msra.mxu0 %v279_v37 }
 0x131   :  { %v297_v60 = vadd.f32 %v296_v53, %v4464_v28 }
 0x132   :  { %v300_v0 = vpop.f32.mrf.mxu0 }
 0x133   :  { %v301_v7 = vadd.f32 %v300_v0, %v4461_v22  ;;  %3864 = vmatmul.mubr.f32.vlgmr.msra.gmra.mxu0 %v283_v58  ;;  %3866 = vmatprep.subr.mxu1 %v297_v60 }
 0x134   :  { %v302_v9 = vpop.f32.mrf.mxu0  ;;  %3867 = vmatpush3.xpose.msra.mxu1 %v297_v60 }
 0x135   :  { %3868 = vmatprep.subr.mxu1 %v291_v4  ;;  %3877 = vmatprep.mubr.f32.mxu0 %v301_v7  ;;  %v303_v18 = vadd.f32 %v302_v9, %v4464_v28 }
 0x136   :  { %v306_v10 = vpop.f32.mrf.mxu0 }
 0x137   :  { %v307_v29 = vadd.f32 %v306_v10, %v4461_v22 }
 0x138   :  { %v308_v12 = vpop.f32.mrf.mxu0  ;;  %3869 = vmatpush3.xpose.msra.mxu1 %v291_v4 }
 0x139   :  { %v309_v15 = vadd.f32 %v308_v12, %v4464_v28 }
 0x13a   :  { %v312_v16 = vpop.f32.mrf.mxu0 }
 0x13b   :  { %v313_v19 = vadd.f32 %v312_v16, %v4461_v22  ;;  %3871 = vmatmul.mubr.f32.vlgmr.msra.gmra.mxu1 %v295_v13  ;;  %3873 = vmatprep.subr.mxu0 %v309_v15 }
 0x13c   :  { %v314_v23 = vpop.f32.mrf.mxu0  ;;  %3874 = vmatpush3.xpose.msra.mxu0 %v309_v15 }
 0x13d   :  { %3875 = vmatprep.subr.mxu0 %v303_v18  ;;  %3884 = vmatprep.mubr.f32.mxu1 %v313_v19  ;;  %v315_v33 = vadd.f32 %v314_v23, %v4464_v28 }
 0x13e   :  { %v318_v24 = vpop.f32.mrf.mxu0 }
 0x13f   :  { %v319_v44 = vadd.f32 %v318_v24, %v4461_v22 }
 0x140   :  { %v320_v27 = vpop.f32.mrf.mxu0  ;;  %3876 = vmatpush3.xpose.msra.mxu0 %v303_v18 }
 0x141   :  { %v321_v31 = vadd.f32 %v320_v27, %v4464_v28 }
 0x142   :  { %v324_v32 = vpop.f32.mrf.mxu0 }
 0x143   :  { %v325_v35 = vadd.f32 %v324_v32, %v4461_v22  ;;  %3878 = vmatmul.mubr.f32.vlgmr.msra.gmra.mxu0 %v307_v29  ;;  %3880 = vmatprep.subr.mxu1 %v321_v31  ;;  %v443_v29 = vadd.f32 %v4472_v41, %v4486_v56  ;;  %v453_v41 = vadd.f32 %v4478_v47, %v4486_v56  ;;  %v4636_v47 = vpop.f32.mrf.mxu1 }
 0x144   :  { %v326_v37 = vpop.f32.mrf.mxu0  ;;  %3881 = vmatpush3.xpose.msra.mxu1 %v321_v31  ;;  %5073 = vst [vmem:[#allocation7_spill] sm:$0xff] %v4636_v47 }
 0x145   :  { %3882 = vmatprep.subr.mxu1 %v315_v33  ;;  %3891 = vmatprep.mubr.f32.mxu0 %v325_v35  ;;  %v327_v51 = vadd.f32 %v326_v37, %v4464_v28  ;;  %v438_v37 = vadd.f32 %v4474_v43, %v4486_v56 }
 0x146   :  { %v330_v39 = vpop.f32.mrf.mxu0 }
 0x147   :  { %v331_v0 = vadd.f32 %v330_v39, %v4461_v22 }
 0x148   :  { %v332_v40 = vpop.f32.mrf.mxu0  ;;  %3883 = vmatpush3.xpose.msra.mxu1 %v315_v33 }
 0x149   :  { %v333_v48 = vadd.f32 %v332_v40, %v4464_v28  ;;  %v4623_v40 = vadd.f32 %v4484_v54, %v4486_v56  ;;  %v4633_v54 = vadd.f32 %v4493_v62, %v4486_v56 }
 0x14a   :  { %v336_v49 = vpop.f32.mrf.mxu0 }
 0x14b   :  { %v337_v53 = vadd.f32 %v336_v49, %v4461_v22  ;;  %3885 = vmatmul.mubr.f32.vlgmr.msra.gmra.mxu1 %v319_v44  ;;  %3887 = vmatprep.subr.mxu0 %v333_v48 }
 0x14c   :  { %v338_v58 = vpop.f32.mrf.mxu0  ;;  %3888 = vmatpush3.xpose.msra.mxu0 %v333_v48 }
 0x14d   :  { %3889 = vmatprep.subr.mxu0 %v327_v51  ;;  %3898 = vmatprep.mubr.f32.mxu1 %v337_v53  ;;  %v339_v9 = vadd.f32 %v338_v58, %v4464_v28 }
 0x14e   :  { %v342_v60 = vpop.f32.mrf.mxu0 }
 0x14f   :  { %v343_v16 = vadd.f32 %v342_v60, %v4461_v22 }
 0x150   :  { %v344_v63 = vpop.f32.mrf.mxu0  ;;  %3890 = vmatpush3.xpose.msra.mxu0 %v327_v51 }
 0x151   :  { %v345_v4 = vadd.f32 %v344_v63, %v4464_v28 }
 0x152   :  { %v348_v7 = vpop.f32.mrf.mxu0 }
 0x153   :  { %v349_v10 = vadd.f32 %v348_v7, %v4461_v22  ;;  %3892 = vmatmul.mubr.f32.vlgmr.msra.gmra.mxu0 %v331_v0  ;;  %3894 = vmatprep.subr.mxu1 %v345_v4 }
 0x154   :  { %v350_v12 = vpop.f32.mrf.mxu0  ;;  %3895 = vmatpush3.xpose.msra.mxu1 %v345_v4 }
 0x155   :  { %3896 = vmatprep.subr.mxu1 %v339_v9  ;;  %3905 = vmatprep.mubr.f32.mxu0 %v349_v10  ;;  %v351_v23 = vadd.f32 %v350_v12, %v4464_v28 }
 0x156   :  { %v354_v13 = vpop.f32.mrf.mxu0 }
 0x157   :  { %v355_v33 = vadd.f32 %v354_v13, %v4461_v22 }
 0x158   :  { %v356_v15 = vpop.f32.mrf.mxu0  ;;  %3897 = vmatpush3.xpose.msra.mxu1 %v339_v9 }
 0x159   :  { %v357_v18 = vadd.f32 %v356_v15, %v4464_v28 }
 0x15a   :  { %v360_v19 = vpop.f32.mrf.mxu0 }
 0x15b   :  { %v361_v24 = vadd.f32 %v360_v19, %v4461_v22  ;;  %3899 = vmatmul.mubr.f32.vlgmr.msra.gmra.mxu1 %v343_v16  ;;  %3901 = vmatprep.subr.mxu0 %v357_v18 }
 0x15c   :  { %v362_v27 = vpop.f32.mrf.mxu0  ;;  %3902 = vmatpush3.xpose.msra.mxu0 %v357_v18 }
 0x15d   :  { %3903 = vmatprep.subr.mxu0 %v351_v23  ;;  %3912 = vmatprep.mubr.f32.mxu1 %v361_v24  ;;  %v363_v39 = vadd.f32 %v362_v27, %v4464_v28 }
 0x15e   :  { %v366_v31 = vpop.f32.mrf.mxu0 }
 0x15f   :  { %v367_v43 = vadd.f32 %v366_v31, %v4461_v22 }
 0x160   :  { %v368_v32 = vpop.f32.mrf.mxu0  ;;  %3904 = vmatpush3.xpose.msra.mxu0 %v351_v23 }
 0x161   :  { %v369_v35 = vadd.f32 %v368_v32, %v4464_v28  ;;  %3915 = vmatprep.subr.mxu0 %v443_v29  ;;  %v448_v28 = vadd.f32 %v4482_v52, %v4486_v56 }
 0x163   :  { %3906 = vmatmul.mubr.f32.vlgmr.msra.gmra.mxu0 %v355_v33  ;;  %3908 = vmatprep.subr.mxu1 %v369_v35 }
 0x164   :  { %3909 = vmatpush3.xpose.msra.mxu1 %v369_v35  ;;  %3916 = vmatpush3.msra.mxu0 %v443_v29 }
 0x165   :  { %3910 = vmatprep.subr.mxu1 %v363_v39  ;;  %3917 = vmatprep.subr.mxu0 %v438_v37 }
 0x166   :  { %3918 = vmatpush3.msra.mxu0 %v438_v37 }
 0x167   :  { %3929 = vmatprep.subr.mxu0 %v4623_v40 }
 0x168   :  { %3911 = vmatpush3.xpose.msra.mxu1 %v363_v39 }
 0x169   :  { %3922 = vmatprep.subr.mxu1 %v453_v41 }
 0x16b   :  { %3913 = vmatmul.mubr.f32.vlgmr.msra.gmra.mxu1 %v367_v43 }
 0x16c   :  { %3923 = vmatpush3.msra.mxu1 %v453_v41 }
 0x16d   :  { %3924 = vmatprep.subr.mxu1 %v448_v28 }
 0x16e   :  { %3925 = vmatpush3.msra.mxu1 %v448_v28 }
 0x16f   :  { %3936 = vmatprep.subr.mxu1 %v4633_v54 }
 0x1b3   :  { %v4638_v44 = vpop.f32.mrf.mxu1 }
 0x1b4   :  { %v1800_v22 = vsel %vm1796_vm0, %v4638_v44, -inf }
 0x1b5   :  { %1801 = vmax.xlane.f32.xlu1 %v1800_v22  ;;  %v4642_v52 = vpop.f32.mrf.mxu1 }
 0x1b6   :  { %v1797_v62 = vsel %vm1796_vm0, %v4642_v52, -inf }
 0x1b7   :  { %1798 = vmax.xlane.f32.xlu0 %v1797_v62 }
 0x1bb   :  { %v4646_v48 = vpop.f32.mrf.mxu1 }
 0x1bc   :  { %v1806_v49 = vsel %vm1796_vm0, %v4646_v48, -inf }
 0x1bd   :  { %1807 = vmax.xlane.f32.xlu1 %v1806_v49  ;;  %v4650_v51 = vpop.f32.mrf.mxu1 }
 0x1be   :  { %v1803_v53 = vsel %vm1796_vm0, %v4650_v51, -inf }
 0x1bf   :  { %1804 = vmax.xlane.f32.xlu0 %v1803_v53 }
 0x1c3   :  { %v4654_v58 = vpop.f32.mrf.mxu1 }
 0x1c4   :  { %v1812_v60 = vsel %vm1796_vm0, %v4654_v58, -inf }
 0x1c5   :  { %1813 = vmax.xlane.f32.xlu0 %v1812_v60  ;;  %v4658_v63 = vpop.f32.mrf.mxu1 }
 0x1c6   :  { %v1809_v0 = vsel %vm1796_vm0, %v4658_v63, -inf }
 0x1c9   :  { %1810 = vmax.xlane.f32.xlu0 %v1809_v0 }
 0x1cb   :  { %v4662_v4 = vpop.f32.mrf.mxu1 }
 0x1cc   :  { %v1818_v7 = vsel %vm1796_vm0, %v4662_v4, -inf }
 0x1cd   :  { %1819 = vmax.xlane.f32.xlu1 %v1818_v7  ;;  %v4666_v9 = vpop.f32.mrf.mxu1 }
 0x1ce   :  { %v1815_v10 = vsel %vm1796_vm0, %v4666_v9, -inf }
 0x1d1   :  { %1816 = vmax.xlane.f32.xlu1 %v1815_v10 }
 0x1d3   :  { %v4670_v12 = vpop.f32.mrf.mxu1 }
 0x1d4   :  { %v1824_v13 = vsel %vm1796_vm0, %v4670_v12, -inf }
 0x1d5   :  { %1825 = vmax.xlane.f32.xlu0 %v1824_v13  ;;  %v4674_v15 = vpop.f32.mrf.mxu1 }
 0x1d6   :  { %v1821_v16 = vsel %vm1796_vm0, %v4674_v15, -inf }
 0x1d9   :  { %1822 = vmax.xlane.f32.xlu0 %v1821_v16 }
 0x1db   :  { %v4678_v18 = vpop.f32.mrf.mxu1 }
 0x1dc   :  { %v1830_v19 = vsel %vm1796_vm0, %v4678_v18, -inf }
 0x1dd   :  { %1831 = vmax.xlane.f32.xlu1 %v1830_v19  ;;  %v4682_v23 = vpop.f32.mrf.mxu1 }
 0x1de   :  { %v1827_v24 = vsel %vm1796_vm0, %v4682_v23, -inf }
 0x1e1   :  { %1828 = vmax.xlane.f32.xlu1 %v1827_v24 }
 0x1e3   :  { %v4686_v27 = vpop.f32.mrf.mxu1 }
 0x1e4   :  { %v1836_v29 = vsel %vm1796_vm0, %v4686_v27, -inf }
 0x1e5   :  { %1837 = vmax.xlane.f32.xlu0 %v1836_v29  ;;  %v4690_v31 = vpop.f32.mrf.mxu1 }
 0x1e6   :  { %v1833_v32 = vsel %vm1796_vm0, %v4690_v31, -inf }
 0x1e9   :  { %1834 = vmax.xlane.f32.xlu0 %v1833_v32 }
 0x1eb   :  { %v4694_v33 = vpop.f32.mrf.mxu1 }
 0x1ec   :  { %v1842_v35 = vsel %vm1796_vm0, %v4694_v33, -inf }
 0x1ed   :  { %1843 = vmax.xlane.f32.xlu1 %v1842_v35  ;;  %v4698_v37 = vpop.f32.mrf.mxu1 }
 0x1ee   :  { %v1839_v39 = vsel %vm1796_vm0, %v4698_v37, -inf }
 0x1f1   :  { %1840 = vmax.xlane.f32.xlu1 %v1839_v39 }
 0x1f3   :  { %v4702_v41 = vpop.f32.mrf.mxu0 }
 0x1f4   :  { %v1848_v43 = vsel %vm1796_vm0, %v4702_v41, -inf }
 0x1f5   :  { %v4706_v28 = vpop.f32.mrf.mxu0  ;;  %1849 = vmax.xlane.f32.xlu0 %v1848_v43 }
 0x1f6   :  { %v1845_v22 = vsel %vm1796_vm0, %v4706_v28, -inf }
 0x1f9   :  { %1846 = vmax.xlane.f32.xlu0 %v1845_v22 }
 0x1fb   :  { %v4710_v62 = vpop.f32.mrf.mxu1 }
 0x1fc   :  { %v1854_v49 = vsel %vm1796_vm0, %v4710_v62, -inf }
 0x1fd   :  { %1855 = vmax.xlane.f32.xlu1 %v1854_v49  ;;  %v4714_v53 = vpop.f32.mrf.mxu1 }
 0x1fe   :  { %v1851_v60 = vsel %vm1796_vm0, %v4714_v53, -inf }
 0x201   :  { %1852 = vmax.xlane.f32.xlu1 %v1851_v60 }
 0x203   :  { %v4718_v0 = vpop.f32.mrf.mxu0 }
 0x204   :  { %v1860_v7 = vsel %vm1796_vm0, %v4718_v0, -inf }
 0x205   :  { %1861 = vmax.xlane.f32.xlu0 %v1860_v7  ;;  %v4722_v10 = vpop.f32.mrf.mxu0 }
 0x206   :  { %v1857_v13 = vsel %vm1796_vm0, %v4722_v10, -inf }
 0x209   :  { %1858 = vmax.xlane.f32.xlu0 %v1857_v13 }
 0x20b   :  { %v4726_v16 = vpop.f32.mrf.mxu1 }
 0x20c   :  { %v1866_v19 = vsel %vm1796_vm0, %v4726_v16, -inf }
 0x20d   :  { %1867 = vmax.xlane.f32.xlu1 %v1866_v19  ;;  %v4730_v24 = vpop.f32.mrf.mxu1 }
 0x20e   :  { %v1863_v29 = vsel %vm1796_vm0, %v4730_v24, -inf }
 0x211   :  { %1864 = vmax.xlane.f32.xlu1 %v1863_v29 }
 0x213   :  { %v4734_v32 = vpop.f32.mrf.mxu0 }
 0x214   :  { %v1872_v35 = vsel %vm1796_vm0, %v4734_v32, -inf }
 0x215   :  { %1873 = vmax.xlane.f32.xlu0 %v1872_v35  ;;  %v4738_v39 = vpop.f32.mrf.mxu0 }
 0x216   :  { %v1869_v43 = vsel %vm1796_vm0, %v4738_v39, -inf }
 0x219   :  { %1870 = vmax.xlane.f32.xlu0 %v1869_v43 }
 0x21b   :  { %v4742_v22 = vpop.f32.mrf.mxu1 }
 0x21c   :  { %v1878_v49 = vsel %vm1796_vm0, %v4742_v22, -inf }
 0x21d   :  { %1879 = vmax.xlane.f32.xlu1 %v1878_v49  ;;  %v4746_v60 = vpop.f32.mrf.mxu1 }
 0x21e   :  { %v1875_v7 = vsel %vm1796_vm0, %v4746_v60, -inf }
 0x221   :  { %1876 = vmax.xlane.f32.xlu1 %v1875_v7 }
 0x223   :  { %v4750_v13 = vpop.f32.mrf.mxu0 }
 0x224   :  { %5074 = vst [vmem:[#allocation8_spill] sm:$0xff] %v4750_v13  ;;  %v1884_v35 = vsel %vm1796_vm0, %v4750_v13, -inf }
 0x225   :  { %v4752_v19 = vpop.f32.mrf.mxu0 }
 0x226   :  { %5075 = vst [vmem:[#allocation9_spill] sm:$0xff] %v4752_v19  ;;  %v1881_v29 = vsel %vm1796_vm0, %v4752_v19, -inf }
 0x227   :  { %1882 = vmax.xlane.f32.xlu0 %v1881_v29 }
 0x22b   :  { %1885 = vmax.xlane.f32.xlu0 %v1884_v35  ;;  %v4758_v43 = vpop.f32.mrf.mxu1 }
 0x22c   :  { %5076 = vst [vmem:[#allocation10_spill] sm:$0xff] %v4758_v43  ;;  %v1890_v7 = vsel %vm1796_vm0, %v4758_v43, -inf }
 0x22d   :  { %v4760_v49 = vpop.f32.mrf.mxu1 }
 0x22e   :  { %5077 = vst [vmem:[#allocation11_spill] sm:$0xff] %v4760_v49  ;;  %v1887_v47 = vsel %vm1796_vm0, %v4760_v49, -inf }
 0x22f   :  { %1888 = vmax.xlane.f32.xlu1 %v1887_v47 }
 0x233   :  { %1891 = vmax.xlane.f32.xlu1 %v1890_v7 }
 0x23e   :  { %v1802_v56 = vpop.xlane.xlu1 %1801 }
 0x23f   :  { %v1894_v57 = vsub.f32 %v4638_v44, %v1802_v56 }
 0x240   :  { %v1799_v29 = vpop.xlane.xlu0 %1798 }
 0x241   :  { %v1927_v2 = vmul.f32 1.442695, %v1894_v57  ;;  %v1893_v13 = vsub.f32 %v4642_v52, %v1799_v29  ;;  %v4774_v57 = vld [vmem:[%s5057_s3] sm:$0xff] }
 0x243   :  { %4028 = vpow2.f32 %v1927_v2  ;;  %v1925_v35 = vmul.f32 1.442695, %v1893_v13 }
 0x245   :  { %4030 = vpow2.f32 %v1925_v35 }
 0x246   :  { %v1808_v45 = vpop.xlane.xlu1 %1807 }
 0x247   :  { %v1896_v19 = vsub.f32 %v4646_v48, %v1808_v45  ;;  %v4780_v45 = vld [vmem:[%s5057_s3 + $0x8] sm:$0xff] }
 0x248   :  { %v1805_v50 = vpop.xlane.xlu0 %1804 }
 0x249   :  { %v1931_v49 = vmul.f32 1.442695, %v1896_v19  ;;  %v1895_v47 = vsub.f32 %v4650_v51, %v1805_v50 }
 0x24b   :  { %4032 = vpow2.f32 %v1931_v49  ;;  %v1929_v43 = vmul.f32 1.442695, %v1895_v47 }
 0x24d   :  { %4034 = vpow2.f32 %v1929_v43 }
 0x24e   :  { %v1814_v7 = vpop.xlane.xlu0 %1813 }
 0x24f   :  { %v1898_v56 = vsub.f32 %v4654_v58, %v1814_v7 }
 0x250   :  { %v4029_v44 = vpop.eup %4028 }
 0x251   :  { %v1935_v2 = vmul.f32 1.442695, %v1898_v56  ;;  %v1992_v52 = vsel %vm1796_vm0, %v4029_v44, 0.0  ;;  %v2088_v19 = vmul.f32 %v4029_v44, %v4780_v45 }
 0x252   :  { %v4031_v50 = vpop.eup %4030  ;;  %v1811_v48 = vpop.xlane.xlu0 %1810  ;;  %1993 = vadd.xlane.f32.xlu1 %v1992_v52 }
 0x253   :  { %4036 = vpow2.f32 %v1935_v2  ;;  %v1897_v51 = vsub.f32 %v4658_v63, %v1811_v48  ;;  %v1989_v58 = vsel %vm1796_vm0, %v4031_v50, 0.0  ;;  %v2087_v13 = vmul.f32 %v4031_v50, %v4774_v57 }
 0x254   :  { %1990 = vadd.xlane.f32.xlu0 %v1989_v58 }
 0x255   :  { %v1933_v43 = vmul.f32 1.442695, %v1897_v51  ;;  %3919 = vmatprep.mubr.msk.f32.mxu0 %vm1796_vm0, %v2087_v13 }
 0x256   :  { %3920 = vmatmul.mubr.msk.f32.vlgmr.msra.gmra.mxu0 %vm1796_vm0, %v2088_v19  ;;  %v1820_v49 = vpop.xlane.xlu1 %1819 }
 0x257   :  { %4038 = vpow2.f32 %v1933_v43  ;;  %3930 = vmatpush3.msra.mxu0 %v4623_v40  ;;  %v1900_v29 = vsub.f32 %v4662_v4, %v1820_v49 }
 0x258   :  { %v4033_v35 = vpop.eup %4032  ;;  %3931 = vmatprep.subr.mxu0 %v4489_v59 }
 0x259   :  { %v1939_v63 = vmul.f32 1.442695, %v1900_v29  ;;  %3932 = vmatpush3.msra.mxu0 %v4489_v59  ;;  %v1998_v47 = vsel %vm1796_vm0, %v4033_v35, 0.0  ;;  %v2090_v2 = vmul.f32 %v4033_v35, %v4780_v45 }
 0x25a   :  { %v4035_v7 = vpop.eup %4034  ;;  %3943 = vmatprep.subr.mxu0 %v4501_v8  ;;  %v1817_v56 = vpop.xlane.xlu1 %1816  ;;  %1999 = vadd.xlane.f32.xlu1 %v1998_v47 }
 0x25b   :  { %4040 = vpow2.f32 %v1939_v63  ;;  %v1899_v44 = vsub.f32 %v4666_v9, %v1817_v56  ;;  %v1995_v40 = vsel %vm1796_vm0, %v4035_v7, 0.0  ;;  %v2089_v4 = vmul.f32 %v4035_v7, %v4774_v57 }
 0x25c   :  { %1996 = vadd.xlane.f32.xlu0 %v1995_v40 }
 0x25d   :  { %v1937_v52 = vmul.f32 1.442695, %v1899_v44  ;;  %3926 = vmatprep.mubr.msk.f32.mxu1 %vm1796_vm0, %v2089_v4 }
 0x25e   :  { %3927 = vmatmul.mubr.msk.f32.vlgmr.msra.gmra.mxu1 %vm1796_vm0, %v2090_v2  ;;  %v1826_v59 = vpop.xlane.xlu0 %1825 }
 0x25f   :  { %4042 = vpow2.f32 %v1937_v52  ;;  %3937 = vmatpush3.msra.mxu1 %v4633_v54  ;;  %v1902_v50 = vsub.f32 %v4670_v12, %v1826_v59 }
 0x260   :  { %v4037_v48 = vpop.eup %4036  ;;  %3938 = vmatprep.subr.mxu1 %v4498_v5 }
 0x261   :  { %v1943_v9 = vmul.f32 1.442695, %v1902_v50  ;;  %3939 = vmatpush3.msra.mxu1 %v4498_v5  ;;  %v2004_v51 = vsel %vm1796_vm0, %v4037_v48, 0.0  ;;  %v2092_v29 = vmul.f32 %v4037_v48, %v4780_v45 }
 0x262   :  { %3950 = vmatprep.subr.mxu1 %v4510_v17  ;;  %v1823_v58 = vpop.xlane.xlu0 %1822  ;;  %2005 = vadd.xlane.f32.xlu1 %v2004_v51 }
 0x263   :  { %4044 = vpow2.f32 %v1943_v9  ;;  %v1901_v13 = vsub.f32 %v4674_v15, %v1823_v58 }
 0x264   :  { %v4039_v19 = vpop.eup %4038 }
 0x265   :  { %v1941_v43 = vmul.f32 1.442695, %v1901_v13  ;;  %v2001_v54 = vsel %vm1796_vm0, %v4039_v19, 0.0  ;;  %v2091_v12 = vmul.f32 %v4039_v19, %v4774_v57 }
 0x266   :  { %v1832_v49 = vpop.xlane.xlu1 %1831  ;;  %2002 = vadd.xlane.f32.xlu0 %v2001_v54 }
 0x267   :  { %4046 = vpow2.f32 %v1941_v43  ;;  %v1904_v5 = vsub.f32 %v4678_v18, %v1832_v49  ;;  %3933 = vmatprep.mubr.msk.f32.mxu0 %vm1796_vm0, %v2091_v12 }
 0x268   :  { %v4041_v35 = vpop.eup %4040  ;;  %3934 = vmatmul.mubr.msk.f32.vlgmr.msra.gmra.mxu0 %vm1796_vm0, %v2092_v29 }
 0x269   :  { %v1947_v63 = vmul.f32 1.442695, %v1904_v5  ;;  %3944 = vmatpush3.msra.mxu0 %v4501_v8  ;;  %v2010_v15 = vsel %vm1796_vm0, %v4041_v35, 0.0  ;;  %v2094_v4 = vmul.f32 %v4041_v35, %v4780_v45 }
 0x26a   :  { %3945 = vmatprep.subr.mxu0 %v4504_v11  ;;  %v1829_v47 = vpop.xlane.xlu1 %1828  ;;  %2011 = vadd.xlane.f32.xlu1 %v2010_v15 }
 0x26b   :  { %4048 = vpow2.f32 %v1947_v63  ;;  %3946 = vmatpush3.msra.mxu0 %v4504_v11  ;;  %v1903_v7 = vsub.f32 %v4682_v23, %v1829_v47 }
 0x26c   :  { %v4043_v18 = vpop.eup %4042  ;;  %3957 = vmatprep.subr.mxu0 %v4517_v25 }
 0x26d   :  { %v1945_v56 = vmul.f32 1.442695, %v1903_v7  ;;  %v2007_v44 = vsel %vm1796_vm0, %v4043_v18, 0.0  ;;  %v2093_v40 = vmul.f32 %v4043_v18, %v4774_v57 }
 0x26e   :  { %v1838_v8 = vpop.xlane.xlu0 %1837  ;;  %2008 = vadd.xlane.f32.xlu0 %v2007_v44 }
 0x26f   :  { %4050 = vpow2.f32 %v1945_v56  ;;  %v1906_v2 = vsub.f32 %v4686_v27, %v1838_v8  ;;  %3940 = vmatprep.mubr.msk.f32.mxu1 %vm1796_vm0, %v2093_v40 }
 0x270   :  { %v4045_v11 = vpop.eup %4044  ;;  %3941 = vmatmul.mubr.msk.f32.vlgmr.msra.gmra.mxu1 %vm1796_vm0, %v2094_v4 }
 0x271   :  { %v1951_v23 = vmul.f32 1.442695, %v1906_v2  ;;  %3951 = vmatpush3.msra.mxu1 %v4510_v17  ;;  %v2016_v52 = vsel %vm1796_vm0, %v4045_v11, 0.0  ;;  %v2096_v58 = vmul.f32 %v4045_v11, %v4780_v45 }
 0x272   :  { %3952 = vmatprep.subr.mxu1 %v4514_v21  ;;  %v1835_v59 = vpop.xlane.xlu0 %1834  ;;  %2017 = vadd.xlane.f32.xlu1 %v2016_v52 }
 0x273   :  { %4052 = vpow2.f32 %v1951_v23  ;;  %3953 = vmatpush3.msra.mxu1 %v4514_v21  ;;  %v1905_v50 = vsub.f32 %v4690_v31, %v1835_v59 }
 0x274   :  { %v4047_v27 = vpop.eup %4046  ;;  %3964 = vmatprep.subr.mxu1 %v4526_v34 }
 0x275   :  { %v1949_v48 = vmul.f32 1.442695, %v1905_v50  ;;  %v2013_v9 = vsel %vm1796_vm0, %v4047_v27, 0.0  ;;  %v2095_v51 = vmul.f32 %v4047_v27, %v4774_v57 }
 0x276   :  { %2014 = vadd.xlane.f32.xlu0 %v2013_v9  ;;  %v1844_v17 = vpop.xlane.xlu1 %1843 }
 0x277   :  { %4054 = vpow2.f32 %v1949_v48  ;;  %v1908_v13 = vsub.f32 %v4694_v33, %v1844_v17  ;;  %3947 = vmatprep.mubr.msk.f32.mxu0 %vm1796_vm0, %v2095_v51 }
 0x278   :  { %v4049_v21 = vpop.eup %4048  ;;  %3948 = vmatmul.mubr.msk.f32.vlgmr.msra.gmra.mxu0 %vm1796_vm0, %v2096_v58 }
 0x279   :  { %v1955_v31 = vmul.f32 1.442695, %v1908_v13  ;;  %3958 = vmatpush3.msra.mxu0 %v4517_v25  ;;  %v2022_v19 = vsel %vm1796_vm0, %v4049_v21, 0.0  ;;  %v2098_v5 = vmul.f32 %v4049_v21, %v4780_v45 }
 0x27a   :  { %3959 = vmatprep.subr.mxu0 %v4520_v3  ;;  %v1841_v43 = vpop.xlane.xlu1 %1840  ;;  %2023 = vadd.xlane.f32.xlu1 %v2022_v19 }
 0x27b   :  { %4056 = vpow2.f32 %v1955_v31  ;;  %3960 = vmatpush3.msra.mxu0 %v4520_v3  ;;  %v1907_v54 = vsub.f32 %v4698_v37, %v1841_v43 }
 0x27c   :  { %v4051_v33 = vpop.eup %4050  ;;  %3971 = vmatprep.subr.mxu0 %v4533_v42 }
 0x27d   :  { %v1953_v12 = vmul.f32 1.442695, %v1907_v54  ;;  %v2019_v49 = vsel %vm1796_vm0, %v4051_v33, 0.0  ;;  %v2097_v29 = vmul.f32 %v4051_v33, %v4774_v57 }
 0x27e   :  { %2020 = vadd.xlane.f32.xlu0 %v2019_v49  ;;  %v1850_v25 = vpop.xlane.xlu0 %1849 }
 0x27f   :  { %4058 = vpow2.f32 %v1953_v12  ;;  %v1910_v35 = vsub.f32 %v4702_v41, %v1850_v25  ;;  %3954 = vmatprep.mubr.msk.f32.mxu1 %vm1796_vm0, %v2097_v29 }
 0x280   :  { %v4053_v3 = vpop.eup %4052  ;;  %3955 = vmatmul.mubr.msk.f32.vlgmr.msra.gmra.mxu1 %vm1796_vm0, %v2098_v5 }
 0x281   :  { %v1959_v37 = vmul.f32 1.442695, %v1910_v35  ;;  %3965 = vmatpush3.msra.mxu1 %v4526_v34  ;;  %v2028_v63 = vsel %vm1796_vm0, %v4053_v3, 0.0  ;;  %v2100_v44 = vmul.f32 %v4053_v3, %v4780_v45 }
 0x282   :  { %3966 = vmatprep.subr.mxu1 %v4530_v38  ;;  %v1847_v15 = vpop.xlane.xlu0 %1846  ;;  %2029 = vadd.xlane.f32.xlu1 %v2028_v63 }
 0x283   :  { %4060 = vpow2.f32 %v1959_v37  ;;  %3967 = vmatpush3.msra.mxu1 %v4530_v38  ;;  %v1909_v47 = vsub.f32 %v4706_v28, %v1847_v15 }
 0x284   :  { %v4055_v41 = vpop.eup %4054  ;;  %3978 = vmatprep.subr.mxu1 %v4542_v55 }
 0x285   :  { %v1957_v7 = vmul.f32 1.442695, %v1909_v47  ;;  %v2025_v18 = vsel %vm1796_vm0, %v4055_v41, 0.0  ;;  %v2099_v56 = vmul.f32 %v4055_v41, %v4774_v57 }
 0x286   :  { %2026 = vadd.xlane.f32.xlu0 %v2025_v18  ;;  %v1856_v34 = vpop.xlane.xlu1 %1855 }
 0x287   :  { %4062 = vpow2.f32 %v1957_v7  ;;  %v1912_v40 = vsub.f32 %v4710_v62, %v1856_v34  ;;  %3961 = vmatprep.mubr.msk.f32.mxu0 %vm1796_vm0, %v2099_v56  ;;  %v5078_v56 = vld [vmem:[#allocation4_spill] sm:$0xff] }
 0x288   :  { %v4057_v38 = vpop.eup %4056  ;;  %3962 = vmatmul.mubr.msk.f32.vlgmr.msra.gmra.mxu0 %vm1796_vm0, %v2100_v44 }
 0x289   :  { %v1963_v28 = vmul.f32 1.442695, %v1912_v40  ;;  %3972 = vmatpush3.msra.mxu0 %v4533_v42  ;;  %v2034_v8 = vsel %vm1796_vm0, %v4057_v38, 0.0  ;;  %v2102_v59 = vmul.f32 %v4057_v38, %v4780_v45 }
 0x28a   :  { %3973 = vmatprep.subr.mxu0 %v4536_v46  ;;  %v1853_v4 = vpop.xlane.xlu1 %1852  ;;  %2035 = vadd.xlane.f32.xlu1 %v2034_v8 }
 0x28b   :  { %4064 = vpow2.f32 %v1963_v28  ;;  %3974 = vmatpush3.msra.mxu0 %v4536_v46  ;;  %v1911_v2 = vsub.f32 %v4714_v53, %v1853_v4  ;;  %v5080_v4 = vld [vmem:[#allocation3_spill] sm:$0xff] }
 0x28c   :  { %v4059_v62 = vpop.eup %4058  ;;  %3985 = vmatprep.subr.mxu0 %v4549_v1 }
 0x28d   :  { %v1961_v11 = vmul.f32 1.442695, %v1911_v2  ;;  %v2031_v23 = vsel %vm1796_vm0, %v4059_v62, 0.0  ;;  %v2101_v52 = vmul.f32 %v4059_v62, %v4774_v57 }
 0x28e   :  { %v1862_v42 = vpop.xlane.xlu0 %1861  ;;  %2032 = vadd.xlane.f32.xlu0 %v2031_v23 }
 0x28f   :  { %4066 = vpow2.f32 %v1961_v11  ;;  %v1914_v50 = vsub.f32 %v4718_v0, %v1862_v42  ;;  %3968 = vmatprep.mubr.msk.f32.mxu1 %vm1796_vm0, %v2101_v52  ;;  %v5081_v11 = vld [vmem:[#allocation6_spill] sm:$0xff]  ;;  %v5082_v52 = vld [vmem:[#allocation8_spill] sm:$0xff] }
 0x290   :  { %v4061_v46 = vpop.eup %4060  ;;  %3969 = vmatmul.mubr.msk.f32.vlgmr.msra.gmra.mxu1 %vm1796_vm0, %v2102_v59 }
 0x291   :  { %v1967_v53 = vmul.f32 1.442695, %v1914_v50  ;;  %3979 = vmatpush3.msra.mxu1 %v4542_v55  ;;  %v2040_v27 = vsel %vm1796_vm0, %v4061_v46, 0.0  ;;  %v2104_v13 = vmul.f32 %v4061_v46, %v4780_v45 }
 0x292   :  { %3980 = vmatprep.subr.mxu1 %v4546_v61  ;;  %v1859_v48 = vpop.xlane.xlu0 %1858  ;;  %2041 = vadd.xlane.f32.xlu1 %v2040_v27 }
 0x293   :  { %4068 = vpow2.f32 %v1967_v53  ;;  %v1913_v9 = vsub.f32 %v4722_v10, %v1859_v48  ;;  %3981 = vmatpush3.msra.mxu1 %v4546_v61  ;;  %v5083_v48 = vld [vmem:[#allocation11_spill] sm:$0xff] }
 0x294   :  { %v4063_v0 = vpop.eup %4062  ;;  %3992 = vmatprep.subr.mxu1 %v4558_v14 }
 0x295   :  { %v1965_v51 = vmul.f32 1.442695, %v1913_v9  ;;  %v2037_v17 = vsel %vm1796_vm0, %v4063_v0, 0.0  ;;  %v2103_v58 = vmul.f32 %v4063_v0, %v4774_v57 }
 0x296   :  { %2038 = vadd.xlane.f32.xlu0 %v2037_v17  ;;  %v1868_v55 = vpop.xlane.xlu1 %1867 }
 0x297   :  { %4070 = vpow2.f32 %v1965_v51  ;;  %v1916_v21 = vsub.f32 %v4726_v16, %v1868_v55  ;;  %3975 = vmatprep.mubr.msk.f32.mxu0 %vm1796_vm0, %v2103_v58  ;;  %v5084_v51 = vld [vmem:[#allocation5_spill] sm:$0xff] }
 0x298   :  { %v4065_v10 = vpop.eup %4064  ;;  %3976 = vmatmul.mubr.msk.f32.vlgmr.msra.gmra.mxu0 %vm1796_vm0, %v2104_v13  ;;  %v5085_v13 = vld [vmem:[#allocation10_spill] sm:$0xff] }
 0x299   :  { %v1971_v61 = vmul.f32 1.442695, %v1916_v21  ;;  %3986 = vmatpush3.msra.mxu0 %v4549_v1  ;;  %v2046_v31 = vsel %vm1796_vm0, %v4065_v10, 0.0  ;;  %v2106_v49 = vmul.f32 %v4065_v10, %v4780_v45 }
 0x29a   :  { %3987 = vmatprep.subr.mxu0 %v4552_v6  ;;  %v1865_v19 = vpop.xlane.xlu1 %1864  ;;  %2047 = vadd.xlane.f32.xlu1 %v2046_v31 }
 0x29b   :  { %4072 = vpow2.f32 %v1971_v61  ;;  %3988 = vmatpush3.msra.mxu0 %v4552_v6  ;;  %v1915_v43 = vsub.f32 %v4730_v24, %v1865_v19 }
 0x29c   :  { %v4067_v16 = vpop.eup %4066  ;;  %3999 = vmatprep.subr.mxu0 %v4566_v26 }
 0x29d   :  { %v1969_v54 = vmul.f32 1.442695, %v1915_v43  ;;  %v2043_v33 = vsel %vm1796_vm0, %v4067_v16, 0.0  ;;  %v2105_v12 = vmul.f32 %v4067_v16, %v4774_v57  ;;  %v5086_v43 = vld [vmem:[#allocation2_spill] sm:$0xff]  ;;  %v5087_v16 = vld [vmem:[#allocation7_spill] sm:$0xff] }
 0x29e   :  { %v1874_v1 = vpop.xlane.xlu0 %1873  ;;  %2044 = vadd.xlane.f32.xlu0 %v2043_v33 }
 0x29f   :  { %4074 = vpow2.f32 %v1969_v54  ;;  %v1918_v29 = vsub.f32 %v4734_v32, %v1874_v1  ;;  %3982 = vmatprep.mubr.msk.f32.mxu1 %vm1796_vm0, %v2105_v12  ;;  %v588_v54 = vadd.f32 %v5087_v16, %v5086_v43 }
 0x2a0   :  { %v4069_v6 = vpop.eup %4068  ;;  %3983 = vmatmul.mubr.msk.f32.vlgmr.msra.gmra.mxu1 %vm1796_vm0, %v2106_v49 }
 0x2a1   :  { %v1975_v24 = vmul.f32 1.442695, %v1918_v29  ;;  %3993 = vmatpush3.msra.mxu1 %v4558_v14  ;;  %v2052_v25 = vsel %vm1796_vm0, %v4069_v6, 0.0  ;;  %v2108_v15 = vmul.f32 %v4069_v6, %v4780_v45 }
 0x2a2   :  { %3994 = vmatprep.subr.mxu1 %v4563_v20  ;;  %v1871_v5 = vpop.xlane.xlu0 %1870  ;;  %2053 = vadd.xlane.f32.xlu1 %v2052_v25 }
 0x2a3   :  { %4076 = vpow2.f32 %v1975_v24  ;;  %v1917_v35 = vsub.f32 %v4738_v39, %v1871_v5  ;;  %3995 = vmatpush3.msra.mxu1 %v4563_v20 }
 0x2a4   :  { %v4071_v32 = vpop.eup %4070  ;;  %4006 = vmatprep.subr.mxu1 %v4574_v36 }
 0x2a5   :  { %v1973_v3 = vmul.f32 1.442695, %v1917_v35  ;;  %v2049_v37 = vsel %vm1796_vm0, %v4071_v32, 0.0  ;;  %v2107_v63 = vmul.f32 %v4071_v32, %v4774_v57 }
 0x2a6   :  { %2050 = vadd.xlane.f32.xlu0 %v2049_v37  ;;  %v1880_v14 = vpop.xlane.xlu1 %1879 }
 0x2a7   :  { %4078 = vpow2.f32 %v1973_v3  ;;  %v1920_v47 = vsub.f32 %v4742_v22, %v1880_v14  ;;  %3989 = vmatprep.mubr.msk.f32.mxu0 %vm1796_vm0, %v2107_v63 }
 0x2a8   :  { %v4073_v39 = vpop.eup %4072  ;;  %3990 = vmatmul.mubr.msk.f32.vlgmr.msra.gmra.mxu0 %vm1796_vm0, %v2108_v15 }
 0x2a9   :  { %v1979_v20 = vmul.f32 1.442695, %v1920_v47  ;;  %4000 = vmatpush3.msra.mxu0 %v4566_v26  ;;  %v2058_v41 = vsel %vm1796_vm0, %v4073_v39, 0.0  ;;  %v2110_v26 = vmul.f32 %v4073_v39, %v4780_v45 }
 0x2aa   :  { %4001 = vmatprep.subr.mxu0 %v4569_v30  ;;  %v1877_v7 = vpop.xlane.xlu1 %1876  ;;  %2059 = vadd.xlane.f32.xlu1 %v2058_v41 }
 0x2ab   :  { %4080 = vpow2.f32 %v1979_v20  ;;  %4002 = vmatpush3.msra.mxu0 %v4569_v30  ;;  %v1919_v18 = vsub.f32 %v4746_v60, %v1877_v7  ;;  %v5079_v30 = vld [vmem:[#allocation9_spill] sm:$0xff] }
 0x2ac   :  { %v4075_v22 = vpop.eup %4074  ;;  %4013 = vmatprep.subr.mxu0 %v5078_v56 }
 0x2ad   :  { %v1977_v34 = vmul.f32 1.442695, %v1919_v18  ;;  %v2055_v44 = vsel %vm1796_vm0, %v4075_v22, 0.0  ;;  %v2109_v40 = vmul.f32 %v4075_v22, %v4774_v57 }
 0x2ae   :  { %2056 = vadd.xlane.f32.xlu0 %v2055_v44 }
 0x2af   :  { %4082 = vpow2.f32 %v1977_v34  ;;  %3996 = vmatprep.mubr.msk.f32.mxu1 %vm1796_vm0, %v2109_v40 }
 0x2b0   :  { %v4077_v38 = vpop.eup %4076  ;;  %v1883_v28 = vpop.xlane.xlu0 %1882  ;;  %3997 = vmatmul.mubr.msk.f32.vlgmr.msra.gmra.mxu1 %vm1796_vm0, %v2110_v26 }
 0x2b1   :  { %v1921_v60 = vsub.f32 %v5079_v30, %v1883_v28  ;;  %4007 = vmatpush3.msra.mxu1 %v4574_v36  ;;  %v2064_v8 = vsel %vm1796_vm0, %v4077_v38, 0.0  ;;  %v2112_v36 = vmul.f32 %v4077_v38, %v4780_v45 }
 0x2b2   :  { %4008 = vmatprep.subr.mxu1 %v5080_v4  ;;  %2065 = vadd.xlane.f32.xlu1 %v2064_v8 }
 0x2b3   :  { %v1981_v2 = vmul.f32 1.442695, %v1921_v60  ;;  %4009 = vmatpush3.msra.mxu1 %v5080_v4 }
 0x2b4   :  { %v4079_v62 = vpop.eup %4078  ;;  %4020 = vmatprep.subr.mxu1 %v5081_v11  ;;  %v1886_v23 = vpop.xlane.xlu0 %1885 }
 0x2b5   :  { %4084 = vpow2.f32 %v1981_v2  ;;  %v1922_v42 = vsub.f32 %v5082_v52, %v1886_v23  ;;  %v2061_v59 = vsel %vm1796_vm0, %v4079_v62, 0.0  ;;  %v2111_v50 = vmul.f32 %v4079_v62, %v4774_v57 }
 0x2b6   :  { %2062 = vadd.xlane.f32.xlu0 %v2061_v59 }
 0x2b7   :  { %v1983_v46 = vmul.f32 1.442695, %v1922_v42  ;;  %4003 = vmatprep.mubr.msk.f32.mxu0 %vm1796_vm0, %v2111_v50 }
 0x2b8   :  { %v4081_v53 = vpop.eup %4080  ;;  %4004 = vmatmul.mubr.msk.f32.vlgmr.msra.gmra.mxu0 %vm1796_vm0, %v2112_v36  ;;  %v1889_v27 = vpop.xlane.xlu1 %1888 }
 0x2b9   :  { %4086 = vpow2.f32 %v1983_v46  ;;  %4014 = vmatpush3.msra.mxu0 %v5078_v56  ;;  %v1923_v9 = vsub.f32 %v5083_v48, %v1889_v27  ;;  %v2070_v0 = vsel %vm1796_vm0, %v4081_v53, 0.0  ;;  %v2114_v31 = vmul.f32 %v4081_v53, %v4780_v45 }
 0x2ba   :  { %4015 = vmatprep.subr.mxu0 %v5084_v51  ;;  %2071 = vadd.xlane.f32.xlu1 %v2070_v0 }
 0x2bb   :  { %v1985_v17 = vmul.f32 1.442695, %v1923_v9  ;;  %4016 = vmatpush3.msra.mxu0 %v5084_v51 }
 0x2bc   :  { %v4083_v58 = vpop.eup %4082  ;;  %v1892_v55 = vpop.xlane.xlu1 %1891 }
 0x2bd   :  { %4088 = vpow2.f32 %v1985_v17  ;;  %v1924_v21 = vsub.f32 %v5085_v13, %v1892_v55  ;;  %v2067_v10 = vsel %vm1796_vm0, %v4083_v58, 0.0  ;;  %v2113_v61 = vmul.f32 %v4083_v58, %v4774_v57 }
 0x2be   :  { %2068 = vadd.xlane.f32.xlu0 %v2067_v10 }
 0x2bf   :  { %v1987_v19 = vmul.f32 1.442695, %v1924_v21  ;;  %4010 = vmatprep.mubr.msk.f32.mxu1 %vm1796_vm0, %v2113_v61 }
 0x2c0   :  { %4011 = vmatmul.mubr.msk.f32.vlgmr.msra.gmra.mxu1 %vm1796_vm0, %v2114_v31 }
 0x2c1   :  { %4090 = vpow2.f32 %v1987_v19  ;;  %4021 = vmatpush3.msra.mxu1 %v5081_v11 }
 0x2c2   :  { %v4085_v33 = vpop.eup %4084  ;;  %4022 = vmatprep.subr.mxu1 %v588_v54 }
 0x2c3   :  { %4023 = vmatpush3.msra.mxu1 %v588_v54  ;;  %v2073_v12 = vsel %vm1796_vm0, %v4085_v33, 0.0  ;;  %v2115_v1 = vmul.f32 %v4085_v33, %v4774_v57 }
 0x2c4   :  { %2074 = vadd.xlane.f32.xlu0 %v2073_v12 }
 0x2c5   :  { %4017 = vmatprep.mubr.msk.f32.mxu0 %vm1796_vm0, %v2115_v1 }
 0x2c6   :  { %v4087_v49 = vpop.eup %4086 }
 0x2c7   :  { %v2076_v29 = vsel %vm1796_vm0, %v4087_v49, 0.0  ;;  %v2116_v6 = vmul.f32 %v4087_v49, %v4780_v45 }
 0x2c8   :  { %2077 = vadd.xlane.f32.xlu1 %v2076_v29 }
 0x2c9   :  { %4018 = vmatmul.mubr.msk.f32.vlgmr.msra.gmra.mxu0 %vm1796_vm0, %v2116_v6 }
 0x2ca   :  { %v4089_v24 = vpop.eup %4088 }
 0x2cb   :  { %v2079_v25 = vsel %vm1796_vm0, %v4089_v24, 0.0  ;;  %v2117_v5 = vmul.f32 %v4089_v24, %v4774_v57 }
 0x2cc   :  { %2080 = vadd.xlane.f32.xlu0 %v2079_v25 }
 0x2cd   :  { %4024 = vmatprep.mubr.msk.f32.mxu1 %vm1796_vm0, %v2117_v5 }
 0x2ce   :  { %v4091_v35 = vpop.eup %4090 }
 0x2cf   :  { %v2082_v32 = vsel %vm1796_vm0, %v4091_v35, 0.0  ;;  %v2118_v3 = vmul.f32 %v4091_v35, %v4780_v45 }
 0x2d0   :  { %2083 = vadd.xlane.f32.xlu1 %v2082_v32 }
 0x2d1   :  { %4025 = vmatmul.mubr.msk.f32.vlgmr.msra.gmra.mxu1 %vm1796_vm0, %v2118_v3 }
 0x2db   :  { %v1994_v37 = vpop.xlane.xlu1 %1993 }
 0x2dc   :  { %4092 = vrcp.f32 %v1994_v37 }
 0x2dd   :  { %v1991_v63 = vpop.xlane.xlu0 %1990 }
 0x2de   :  { %4094 = vrcp.f32 %v1991_v63 }
 0x2e3   :  { %v2000_v14 = vpop.xlane.xlu1 %1999 }
 0x2e4   :  { %4096 = vrcp.f32 %v2000_v14 }
 0x2e5   :  { %v1997_v15 = vpop.xlane.xlu0 %1996 }
 0x2e6   :  { %4098 = vrcp.f32 %v1997_v15 }
 0x2e9   :  { %v4093_v57 = vpop.eup %4092 }
 0x2eb   :  { %v4095_v20 = vpop.eup %4094  ;;  %v2006_v41 = vpop.xlane.xlu1 %2005 }
 0x2ec   :  { %4100 = vrcp.f32 %v2006_v41 }
 0x2ef   :  { %v2003_v18 = vpop.xlane.xlu0 %2002 }
 0x2f0   :  { %4102 = vrcp.f32 %v2003_v18 }
 0x2f1   :  { %v4097_v22 = vpop.eup %4096 }
 0x2f3   :  { %v4099_v44 = vpop.eup %4098  ;;  %v2012_v40 = vpop.xlane.xlu1 %2011 }
 0x2f4   :  { %4104 = vrcp.f32 %v2012_v40 }
 0x2f7   :  { %v2009_v28 = vpop.xlane.xlu0 %2008 }
 0x2f8   :  { %4106 = vrcp.f32 %v2009_v28 }
 0x2f9   :  { %v4101_v30 = vpop.eup %4100 }
 0x2fb   :  { %v2018_v60 = vpop.xlane.xlu1 %2017 }
 0x2fc   :  { %4108 = vrcp.f32 %v2018_v60 }
 0x2fd   :  { %v4103_v2 = vpop.eup %4102 }
 0x2ff   :  { %v2015_v62 = vpop.xlane.xlu0 %2014 }
 0x300   :  { %4110 = vrcp.f32 %v2015_v62 }
 0x301   :  { %v4105_v52 = vpop.eup %4104 }
 0x303   :  { %v2024_v42 = vpop.xlane.xlu1 %2023 }
 0x304   :  { %4112 = vrcp.f32 %v2024_v42 }
 0x305   :  { %v4107_v36 = vpop.eup %4106 }
 0x307   :  { %v2021_v46 = vpop.xlane.xlu0 %2020 }
 0x308   :  { %4114 = vrcp.f32 %v2021_v46 }
 0x309   :  { %v4109_v48 = vpop.eup %4108 }
 0x30b   :  { %v2030_v9 = vpop.xlane.xlu1 %2029 }
 0x30c   :  { %4116 = vrcp.f32 %v2030_v9 }
 0x30d   :  { %v4111_v17 = vpop.eup %4110 }
 0x30f   :  { %v2027_v58 = vpop.xlane.xlu0 %2026 }
 0x310   :  { %4118 = vrcp.f32 %v2027_v58 }
 0x311   :  { %v4113_v21 = vpop.eup %4112 }
 0x313   :  { %v2036_v10 = vpop.xlane.xlu1 %2035 }
 0x314   :  { %4120 = vrcp.f32 %v2036_v10 }
 0x315   :  { %v4115_v19 = vpop.eup %4114 }
 0x316   :  { %v3921_v47 = vpop.f32.mrf.mxu0 }
 0x317   :  { %v3448_v39 = vmul.f32 %v4093_v57, %v3921_v47  ;;  %v2033_v43 = vpop.xlane.xlu0 %2032 }
 0x318   :  { %v2191_v7 = vpop.f32.mrf.mxu0  ;;  %4122 = vrcp.f32 %v2033_v43 }
 0x319   :  { %3480 = vst [vmem:[%s5058_s4 + $0x8] sm:$0xff] %v3448_v39  ;;  %v3447_v45 = vmul.f32 %v4095_v20, %v2191_v7  ;;  %v4117_v33 = vpop.eup %4116 }
 0x31b   :  { %3479 = vst [vmem:[%s5058_s4] sm:$0xff] %v3447_v45  ;;  %v2042_v12 = vpop.xlane.xlu1 %2041 }
 0x31c   :  { %4124 = vrcp.f32 %v2042_v12 }
 0x31d   :  { %v4119_v29 = vpop.eup %4118 }
 0x31e   :  { %v3928_v56 = vpop.f32.mrf.mxu1 }
 0x31f   :  { %v3450_v34 = vmul.f32 %v4097_v22, %v3928_v56  ;;  %v2039_v6 = vpop.xlane.xlu0 %2038 }
 0x320   :  { %v2272_v26 = vpop.f32.mrf.mxu1  ;;  %4126 = vrcp.f32 %v2039_v6 }
 0x321   :  { %3482 = vst [vmem:[%s5058_s4 + $0x18] sm:$0xff] %v3450_v34  ;;  %v3449_v38 = vmul.f32 %v4099_v44, %v2272_v26  ;;  %v4121_v5 = vpop.eup %4120 }
 0x323   :  { %3481 = vst [vmem:[%s5058_s4 + $0x10] sm:$0xff] %v3449_v38  ;;  %v2048_v35 = vpop.xlane.xlu1 %2047 }
 0x324   :  { %4128 = vrcp.f32 %v2048_v35 }
 0x325   :  { %v4123_v37 = vpop.eup %4122 }
 0x327   :  { %v2045_v63 = vpop.xlane.xlu0 %2044 }
 0x328   :  { %v3935_v8 = vpop.f32.mrf.mxu0  ;;  %4130 = vrcp.f32 %v2045_v63 }
 0x329   :  { %v3452_v4 = vmul.f32 %v4101_v30, %v3935_v8  ;;  %v4125_v57 = vpop.eup %4124 }
 0x32a   :  { %v2353_v11 = vpop.f32.mrf.mxu0 }
 0x32b   :  { %3484 = vst [vmem:[%s5058_s4 + $0x28] sm:$0xff] %v3452_v4  ;;  %v3451_v23 = vmul.f32 %v4103_v2, %v2353_v11  ;;  %v2054_v47 = vpop.xlane.xlu1 %2053 }
 0x32c   :  { %4132 = vrcp.f32 %v2054_v47 }
 0x32d   :  { %3483 = vst [vmem:[%s5058_s4 + $0x20] sm:$0xff] %v3451_v23  ;;  %v4127_v41 = vpop.eup %4126 }
 0x32f   :  { %v2051_v7 = vpop.xlane.xlu0 %2050 }
 0x330   :  { %v3942_v59 = vpop.f32.mrf.mxu1  ;;  %4134 = vrcp.f32 %v2051_v7 }
 0x331   :  { %v3454_v50 = vmul.f32 %v4105_v52, %v3942_v59  ;;  %v4129_v22 = vpop.eup %4128 }
 0x332   :  { %v2434_v53 = vpop.f32.mrf.mxu1 }
 0x333   :  { %3486 = vst [vmem:[%s5058_s4 + $0x38] sm:$0xff] %v3454_v50  ;;  %v3453_v27 = vmul.f32 %v4107_v36, %v2434_v53  ;;  %v2060_v56 = vpop.xlane.xlu1 %2059 }
 0x334   :  { %4136 = vrcp.f32 %v2060_v56 }
 0x335   :  { %3485 = vst [vmem:[%s5058_s4 + $0x30] sm:$0xff] %v3453_v27  ;;  %v4131_v40 = vpop.eup %4130 }
 0x337   :  { %v2057_v26 = vpop.xlane.xlu0 %2056 }
 0x338   :  { %v3949_v0 = vpop.f32.mrf.mxu0  ;;  %4138 = vrcp.f32 %v2057_v26 }
 0x339   :  { %v3456_v51 = vmul.f32 %v4109_v48, %v3949_v0  ;;  %v4133_v30 = vpop.eup %4132 }
 0x33a   :  { %v2515_v55 = vpop.f32.mrf.mxu0 }
 0x33b   :  { %3488 = vst [vmem:[%s5058_s4 + $0x48] sm:$0xff] %v3456_v51  ;;  %v3455_v13 = vmul.f32 %v4111_v17, %v2515_v55  ;;  %v2066_v60 = vpop.xlane.xlu1 %2065 }
 0x33c   :  { %4140 = vrcp.f32 %v2066_v60 }
 0x33d   :  { %3487 = vst [vmem:[%s5058_s4 + $0x40] sm:$0xff] %v3455_v13  ;;  %v4135_v2 = vpop.eup %4134 }
 0x33f   :  { %v2063_v62 = vpop.xlane.xlu0 %2062 }
 0x340   :  { %v3956_v61 = vpop.f32.mrf.mxu1  ;;  %4142 = vrcp.f32 %v2063_v62 }
 0x341   :  { %v3458_v31 = vmul.f32 %v4113_v21, %v3956_v61  ;;  %v4137_v52 = vpop.eup %4136 }
 0x342   :  { %v2596_v16 = vpop.f32.mrf.mxu1 }
 0x343   :  { %3490 = vst [vmem:[%s5058_s4 + $0x58] sm:$0xff] %v3458_v31  ;;  %v3457_v54 = vmul.f32 %v4115_v19, %v2596_v16  ;;  %v2072_v42 = vpop.xlane.xlu1 %2071 }
 0x344   :  { %4144 = vrcp.f32 %v2072_v42 }
 0x345   :  { %3489 = vst [vmem:[%s5058_s4 + $0x50] sm:$0xff] %v3457_v54  ;;  %v4139_v36 = vpop.eup %4138 }
 0x347   :  { %v2069_v46 = vpop.xlane.xlu0 %2068 }
 0x348   :  { %v3963_v1 = vpop.f32.mrf.mxu0  ;;  %4146 = vrcp.f32 %v2069_v46 }
 0x349   :  { %v3460_v49 = vmul.f32 %v4117_v33, %v3963_v1  ;;  %v4141_v48 = vpop.eup %4140 }
 0x34a   :  { %v2677_v24 = vpop.f32.mrf.mxu0 }
 0x34b   :  { %3492 = vst [vmem:[%s5058_s4 + $0x68] sm:$0xff] %v3460_v49  ;;  %v3459_v25 = vmul.f32 %v4119_v29, %v2677_v24 }
 0x34d   :  { %3491 = vst [vmem:[%s5058_s4 + $0x60] sm:$0xff] %v3459_v25  ;;  %v4143_v17 = vpop.eup %4142  ;;  %v2075_v55 = vpop.xlane.xlu0 %2074 }
 0x350   :  { %v3970_v32 = vpop.f32.mrf.mxu1 }
 0x351   :  { %v3462_v3 = vmul.f32 %v4121_v5, %v3970_v32  ;;  %v2078_v0 = vpop.xlane.xlu1 %2077  ;;  %v4145_v21 = vpop.eup %4144 }
 0x352   :  { %v2758_v14 = vpop.f32.mrf.mxu1  ;;  %4148 = vrcp.f32 %v2078_v0 }
 0x353   :  { %3494 = vst [vmem:[%s5058_s4 + $0x78] sm:$0xff] %v3462_v3  ;;  %v3461_v15 = vmul.f32 %v4123_v37, %v2758_v14  ;;  %4150 = vrcp.f32 %v2075_v55 }
 0x355   :  { %3493 = vst [vmem:[%s5058_s4 + $0x70] sm:$0xff] %v3461_v15  ;;  %v4147_v19 = vpop.eup %4146  ;;  %v2081_v16 = vpop.xlane.xlu0 %2080 }
 0x358   :  { %v3977_v39 = vpop.f32.mrf.mxu0 }
 0x359   :  { %v3464_v20 = vmul.f32 %v4125_v57, %v3977_v39  ;;  %v2084_v61 = vpop.xlane.xlu1 %2083 }
 0x35a   :  { %v2839_v45 = vpop.f32.mrf.mxu0  ;;  %4152 = vrcp.f32 %v2084_v61 }
 0x35b   :  { %3496 = vst [vmem:[%s5058_s4 + $0x88] sm:$0xff] %v3464_v20  ;;  %v3463_v18 = vmul.f32 %v4127_v41, %v2839_v45  ;;  %4154 = vrcp.f32 %v2081_v16 }
 0x35d   :  { %3495 = vst [vmem:[%s5058_s4 + $0x80] sm:$0xff] %v3463_v18 }
 0x35f   :  { %v4149_v33 = vpop.eup %4148 }
 0x360   :  { %v3984_v34 = vpop.f32.mrf.mxu1  ;;  %v4151_v49 = vpop.eup %4150 }
 0x361   :  { %v3466_v44 = vmul.f32 %v4129_v22, %v3984_v34 }
 0x362   :  { %v2920_v38 = vpop.f32.mrf.mxu1 }
 0x363   :  { %3498 = vst [vmem:[%s5058_s4 + $0x98] sm:$0xff] %v3466_v44  ;;  %v3465_v28 = vmul.f32 %v4131_v40, %v2920_v38 }
 0x365   :  { %3497 = vst [vmem:[%s5058_s4 + $0x90] sm:$0xff] %v3465_v28 }
 0x367   :  { %v4153_v24 = vpop.eup %4152 }
 0x368   :  { %v3991_v8 = vpop.f32.mrf.mxu0  ;;  %v4155_v35 = vpop.eup %4154 }
 0x369   :  { %v3468_v4 = vmul.f32 %v4133_v30, %v3991_v8 }
 0x36a   :  { %v3001_v11 = vpop.f32.mrf.mxu0 }
 0x36b   :  { %3500 = vst [vmem:[%s5058_s4 + $0xa8] sm:$0xff] %v3468_v4  ;;  %v3467_v23 = vmul.f32 %v4135_v2, %v3001_v11 }
 0x36d   :  { %3499 = vst [vmem:[%s5058_s4 + $0xa0] sm:$0xff] %v3467_v23 }
 0x370   :  { %v3998_v59 = vpop.f32.mrf.mxu1 }
 0x371   :  { %v3470_v50 = vmul.f32 %v4137_v52, %v3998_v59 }
 0x372   :  { %v3082_v53 = vpop.f32.mrf.mxu1 }
 0x373   :  { %3502 = vst [vmem:[%s5058_s4 + $0xb8] sm:$0xff] %v3470_v50  ;;  %v3469_v27 = vmul.f32 %v4139_v36, %v3082_v53 }
 0x375   :  { %3501 = vst [vmem:[%s5058_s4 + $0xb0] sm:$0xff] %v3469_v27 }
 0x378   :  { %v4005_v9 = vpop.f32.mrf.mxu0 }
 0x379   :  { %v3472_v51 = vmul.f32 %v4141_v48, %v4005_v9 }
 0x37a   :  { %v3163_v58 = vpop.f32.mrf.mxu0 }
 0x37b   :  { %3504 = vst [vmem:[%s5058_s4 + $0xc8] sm:$0xff] %v3472_v51  ;;  %v3471_v13 = vmul.f32 %v4143_v17, %v3163_v58 }
 0x37d   :  { %3503 = vst [vmem:[%s5058_s4 + $0xc0] sm:$0xff] %v3471_v13 }
 0x380   :  { %v4012_v10 = vpop.f32.mrf.mxu1 }
 0x381   :  { %v3474_v31 = vmul.f32 %v4145_v21, %v4012_v10 }
 0x382   :  { %v3244_v43 = vpop.f32.mrf.mxu1 }
 0x383   :  { %3506 = vst [vmem:[%s5058_s4 + $0xd8] sm:$0xff] %v3474_v31  ;;  %v3473_v54 = vmul.f32 %v4147_v19, %v3244_v43 }
 0x385   :  { %3505 = vst [vmem:[%s5058_s4 + $0xd0] sm:$0xff] %v3473_v54 }
 0x389   :  { %v4019_v12 = vpop.f32.mrf.mxu0 }
 0x38a   :  { %v3476_v1 = vmul.f32 %v4149_v33, %v4019_v12 }
 0x38b   :  { %v3325_v29 = vpop.f32.mrf.mxu0 }
 0x38c   :  { %3508 = vst [vmem:[%s5058_s4 + $0xe8] sm:$0xff] %v3476_v1  ;;  %v3475_v6 = vmul.f32 %v4151_v49, %v3325_v29 }
 0x38e   :  { %3507 = vst [vmem:[%s5058_s4 + $0xe0] sm:$0xff] %v3475_v6 }
 0x391   :  { %v4026_v25 = vpop.f32.mrf.mxu1 }
 0x392   :  { %v3478_v5 = vmul.f32 %v4153_v24, %v4026_v25 }
 0x393   :  { %v3406_v32 = vpop.f32.mrf.mxu1 }
 0x394   :  { %3510 = vst [vmem:[%s5058_s4 + $0xf8] sm:$0xff] %v3478_v5  ;;  %v3477_v3 = vmul.f32 %v4155_v35, %v3406_v32 }
 0x396   :  { %3509 = vst [vmem:[%s5058_s4 + $0xf0] sm:$0xff] %v3477_v3 }

// kernel: manhattan_self_attention.3
= control target key start
LH: loop header
LB: loop body
LE: loop exit
PB: predicated region body
PF: predicated region fallthrough
CT: control target
= control target key end

     0   :  { %v7390_v3 = vmov 0.0   ;;  %vm6333_vm0 = vmmov 0   ;;  %vm2836_vm1 = vcmask 64512   ;;  %s7385_s1 = inlined_call_operand.vmem [shape: f32[128,384], index: 1, kind: input, shape index: {}]   ;;  %s7386_s0 = inlined_call_operand.vmem [shape: f32[32,8,128], index: 0, kind: input, shape index: {}]   ;;  %s7387_s2 = inlined_call_operand.vmem [shape: f32[1,384], index: 2, kind: input, shape index: {}]   ;;  %s7388_s3 = inlined_call_operand.vmem [shape: f32[8,8], index: 3, kind: input, shape index: {}]   ;;  %s7389_s4 = inlined_call_operand.vmem [shape: f32[32,8,128], index: 4, kind: output, shape index: {}]  }
   0x1   :  { %v95_v0 = vld [vmem:[%s7385_s1 + $0x170] sm:$0xff]  ;;  %v94_v1 = vld [vmem:[%s7385_s1 + $0x168] sm:$0xff]  ;;  %v92_v2 = vld [vmem:[%s7385_s1 + $0x158] sm:$0xff]  ;;  %178 = vmatprep.mubr.f32.mxu0 %v7390_v3 }
   0x2   :  { %114 = vmatprep.subr.mxu0 %v95_v0  ;;  %v91_v4 = vld [vmem:[%s7385_s1 + $0x150] sm:$0xff]  ;;  %v89_v5 = vld [vmem:[%s7385_s1 + $0x140] sm:$0xff]  ;;  %v88_v6 = vld [vmem:[%s7385_s1 + $0x138] sm:$0xff] }
   0x3   :  { %115 = vmatpush1.msra.mxu0 %v94_v1  ;;  %v86_v7 = vld [vmem:[%s7385_s1 + $0x128] sm:$0xff]  ;;  %v85_v8 = vld [vmem:[%s7385_s1 + $0x120] sm:$0xff]  ;;  %v83_v9 = vld [vmem:[%s7385_s1 + $0x110] sm:$0xff] }
   0x4   :  { %116 = vmatprep.subr.mxu0 %v92_v2  ;;  %v82_v10 = vld [vmem:[%s7385_s1 + $0x108] sm:$0xff]  ;;  %v80_v11 = vld [vmem:[%s7385_s1 + $0xf8] sm:$0xff]  ;;  %v79_v12 = vld [vmem:[%s7385_s1 + $0xf0] sm:$0xff] }
   0x5   :  { %117 = vmatpush1.msra.mxu0 %v91_v4  ;;  %v77_v13 = vld [vmem:[%s7385_s1 + $0xe0] sm:$0xff]  ;;  %v76_v15 = vld [vmem:[%s7385_s1 + $0xd8] sm:$0xff]  ;;  %v74_v16 = vld [vmem:[%s7385_s1 + $0xc8] sm:$0xff] }
   0x6   :  { %118 = vmatprep.subr.mxu0 %v89_v5  ;;  %v6402_v14 = vld [vmem:[%s7386_s0] sm:$0xff]  ;;  %v71_v18 = vld [vmem:[%s7385_s1 + $0xb0] sm:$0xff]  ;;  %v70_v19 = vld [vmem:[%s7385_s1 + $0xa8] sm:$0xff] }
   0x7   :  { %119 = vmatpush1.msra.mxu0 %v88_v6  ;;  %5834 = vmatprep.mubr.f32.mxu1 %v6402_v14  ;;  %v73_v17 = vld [vmem:[%s7385_s1 + $0xc0] sm:$0xff]  ;;  %v68_v20 = vld [vmem:[%s7385_s1 + $0x98] sm:$0xff]  ;;  %v67_v21 = vld [vmem:[%s7385_s1 + $0x90] sm:$0xff] }
   0x8   :  { %120 = vmatprep.subr.mxu0 %v86_v7  ;;  %v65_v22 = vld [vmem:[%s7385_s1 + $0x80] sm:$0xff]  ;;  %v64_v23 = vld [vmem:[%s7385_s1 + $0x78] sm:$0xff]  ;;  %v62_v25 = vld [vmem:[%s7385_s1 + $0x68] sm:$0xff] }
   0x9   :  { %121 = vmatpush1.msra.mxu0 %v85_v8  ;;  %v96_v24 = vld [vmem:[%s7385_s1 + $0x178] sm:$0xff]  ;;  %v93_v26 = vld [vmem:[%s7385_s1 + $0x160] sm:$0xff]  ;;  %v90_v28 = vld [vmem:[%s7385_s1 + $0x148] sm:$0xff] }
   0xa   :  { %122 = vmatprep.subr.mxu0 %v83_v9  ;;  %5802 = vmatprep.subr.mxu1 %v96_v24  ;;  %v61_v27 = vld [vmem:[%s7385_s1 + $0x60] sm:$0xff]  ;;  %v59_v29 = vld [vmem:[%s7385_s1 + $0x50] sm:$0xff]  ;;  %v58_v30 = vld [vmem:[%s7385_s1 + $0x48] sm:$0xff] }
   0xb   :  { %123 = vmatpush1.msra.mxu0 %v82_v10  ;;  %5803 = vmatpush3.msra.mxu1 %v96_v24  ;;  %v87_v31 = vld [vmem:[%s7385_s1 + $0x130] sm:$0xff]  ;;  %v56_v32 = vld [vmem:[%s7385_s1 + $0x38] sm:$0xff]  ;;  %v53_v35 = vld [vmem:[%s7385_s1 + $0x20] sm:$0xff] }
   0xc   :  { %124 = vmatprep.subr.mxu0 %v80_v11  ;;  %5804 = vmatprep.subr.mxu1 %v93_v26  ;;  %v55_v33 = vld [vmem:[%s7385_s1 + $0x30] sm:$0xff]  ;;  %v84_v34 = vld [vmem:[%s7385_s1 + $0x118] sm:$0xff]  ;;  %v81_v37 = vld [vmem:[%s7385_s1 + $0x100] sm:$0xff] }
   0xd   :  { %125 = vmatpush1.msra.mxu0 %v79_v12  ;;  %5805 = vmatpush3.msra.mxu1 %v93_v26  ;;  %v52_v36 = vld [vmem:[%s7385_s1 + $0x18] sm:$0xff]  ;;  %v50_v38 = vld [vmem:[%s7385_s1 + $0x8] sm:$0xff]  ;;  %v49_v39 = vld [vmem:[%s7385_s1] sm:$0xff] }
   0xe   :  { %126 = vmatprep.subr.mxu0 %v77_v13  ;;  %5806 = vmatprep.subr.mxu1 %v90_v28  ;;  %v78_v40 = vld [vmem:[%s7385_s1 + $0xe8] sm:$0xff]  ;;  %v75_v41 = vld [vmem:[%s7385_s1 + $0xd0] sm:$0xff]  ;;  %v72_v42 = vld [vmem:[%s7385_s1 + $0xb8] sm:$0xff] }
   0xf   :  { %127 = vmatpush1.msra.mxu0 %v76_v15  ;;  %5807 = vmatpush3.msra.mxu1 %v90_v28  ;;  %v18_v43 = vld [vmem:[%s7386_s0 + $0x8] sm:$0xff]  ;;  %v69_v44 = vld [vmem:[%s7385_s1 + $0xa0] sm:$0xff]  ;;  %v19_v46 = vld [vmem:[%s7386_s0 + $0x10] sm:$0xff] }
  0x10   :  { %128 = vmatprep.subr.mxu0 %v74_v16  ;;  %5808 = vmatprep.subr.mxu1 %v87_v31  ;;  %v66_v45 = vld [vmem:[%s7385_s1 + $0x88] sm:$0xff]  ;;  %v63_v47 = vld [vmem:[%s7385_s1 + $0x70] sm:$0xff]  ;;  %v60_v48 = vld [vmem:[%s7385_s1 + $0x58] sm:$0xff] }
  0x11   :  { %129 = vmatpush1.msra.mxu0 %v73_v17  ;;  %5809 = vmatpush3.msra.mxu1 %v87_v31  ;;  %v20_v49 = vld [vmem:[%s7386_s0 + $0x18] sm:$0xff]  ;;  %v57_v50 = vld [vmem:[%s7385_s1 + $0x40] sm:$0xff]  ;;  %v54_v51 = vld [vmem:[%s7385_s1 + $0x28] sm:$0xff] }
  0x12   :  { %130 = vmatprep.subr.mxu0 %v71_v18  ;;  %5810 = vmatprep.subr.mxu1 %v84_v34  ;;  %v21_v52 = vld [vmem:[%s7386_s0 + $0x20] sm:$0xff]  ;;  %v51_v53 = vld [vmem:[%s7385_s1 + $0x10] sm:$0xff]  ;;  %v22_v54 = vld [vmem:[%s7386_s0 + $0x28] sm:$0xff]  ;;  %v99_v18 = vlaneseq }
  0x13   :  { %131 = vmatpush1.msra.mxu0 %v70_v19  ;;  %5811 = vmatpush3.msra.mxu1 %v84_v34  ;;  %v23_v55 = vld [vmem:[%s7386_s0 + $0x30] sm:$0xff]  ;;  %v24_v56 = vld [vmem:[%s7386_s0 + $0x38] sm:$0xff]  ;;  %v25_v57 = vld [vmem:[%s7386_s0 + $0x40] sm:$0xff] }
  0x14   :  { %132 = vmatprep.subr.mxu0 %v68_v20  ;;  %5812 = vmatprep.subr.mxu1 %v81_v37  ;;  %v26_v58 = vld [vmem:[%s7386_s0 + $0x48] sm:$0xff]  ;;  %v27_v59 = vld [vmem:[%s7386_s0 + $0x50] sm:$0xff]  ;;  %v28_v60 = vld [vmem:[%s7386_s0 + $0x58] sm:$0xff]  ;;  %v100_v19 = vshrl.u32 %v99_v18, 7 }
  0x15   :  { %133 = vmatpush1.msra.mxu0 %v67_v21  ;;  %5813 = vmatpush3.msra.mxu1 %v81_v37  ;;  %v29_v61 = vld [vmem:[%s7386_s0 + $0x60] sm:$0xff]  ;;  %v30_v62 = vld [vmem:[%s7386_s0 + $0x68] sm:$0xff]  ;;  %v31_v63 = vld [vmem:[%s7386_s0 + $0x70] sm:$0xff] }
  0x16   :  { %134 = vmatprep.subr.mxu0 %v65_v22  ;;  %5814 = vmatprep.subr.mxu1 %v78_v40  ;;  %v32_v0 = vld [vmem:[%s7386_s0 + $0x78] sm:$0xff]  ;;  %v33_v1 = vld [vmem:[%s7386_s0 + $0x80] sm:$0xff]  ;;  %v34_v2 = vld [vmem:[%s7386_s0 + $0x88] sm:$0xff]  ;;  %v105_v20 = vsub.s32 1, %v100_v19  ;;  %v101_v22 = vsub.s32 0, %v100_v19 }
  0x17   :  { %135 = vmatpush1.msra.mxu0 %v64_v23  ;;  %5815 = vmatpush3.msra.mxu1 %v78_v40  ;;  %v35_v4 = vld [vmem:[%s7386_s0 + $0x90] sm:$0xff]  ;;  %v36_v5 = vld [vmem:[%s7386_s0 + $0x98] sm:$0xff]  ;;  %v37_v6 = vld [vmem:[%s7386_s0 + $0xa0] sm:$0xff] }
  0x18   :  { %136 = vmatprep.subr.mxu0 %v62_v25  ;;  %5816 = vmatprep.subr.mxu1 %v75_v41  ;;  %v38_v7 = vld [vmem:[%s7386_s0 + $0xa8] sm:$0xff]  ;;  %v39_v8 = vld [vmem:[%s7386_s0 + $0xb0] sm:$0xff]  ;;  %v40_v9 = vld [vmem:[%s7386_s0 + $0xb8] sm:$0xff] }
  0x19   :  { %137 = vmatpush1.msra.mxu0 %v61_v27  ;;  %5817 = vmatpush3.msra.mxu1 %v75_v41  ;;  %v41_v10 = vld [vmem:[%s7386_s0 + $0xc0] sm:$0xff]  ;;  %v42_v11 = vld [vmem:[%s7386_s0 + $0xc8] sm:$0xff]  ;;  %v43_v12 = vld [vmem:[%s7386_s0 + $0xd0] sm:$0xff] }
  0x1a   :  { %138 = vmatprep.subr.mxu0 %v59_v29  ;;  %5818 = vmatprep.subr.mxu1 %v72_v42  ;;  %v44_v13 = vld [vmem:[%s7386_s0 + $0xd8] sm:$0xff]  ;;  %v46_v15 = vld [vmem:[%s7386_s0 + $0xe8] sm:$0xff]  ;;  %v47_v16 = vld [vmem:[%s7386_s0 + $0xf0] sm:$0xff] }
  0x1b   :  { %139 = vmatpush1.msra.mxu0 %v58_v30  ;;  %5819 = vmatpush3.msra.mxu1 %v72_v42  ;;  %v48_v17 = vld [vmem:[%s7386_s0 + $0xf8] sm:$0xff]  ;;  %v97_v21 = vld [vmem:[%s7387_s2] sm:$0x7] }
  0x1c   :  { %140 = vmatprep.subr.mxu0 %v56_v32  ;;  %5820 = vmatprep.subr.mxu1 %v69_v44  ;;  %v6644_v23 = vrot.slane %v97_v21, %v105_v20  ;;  %v6646_v25 = vrot.slane %v97_v21, %v101_v22 }
  0x1d   :  { %141 = vmatpush1.msra.mxu0 %v55_v33  ;;  %5821 = vmatpush3.msra.mxu1 %v69_v44 }
  0x1e   :  { %142 = vmatprep.subr.mxu0 %v53_v35  ;;  %5822 = vmatprep.subr.mxu1 %v66_v45 }
  0x1f   :  { %143 = vmatpush1.msra.mxu0 %v52_v36  ;;  %5823 = vmatpush3.msra.mxu1 %v66_v45 }
  0x20   :  { %144 = vmatprep.subr.mxu0 %v50_v38  ;;  %5824 = vmatprep.subr.mxu1 %v63_v47 }
  0x21   :  { %145 = vmatpush1.msra.mxu0 %v49_v39  ;;  %5825 = vmatpush3.msra.mxu1 %v63_v47 }
  0x22   :  { %179 = vmatmul.mubr.f32.vlgmr.msra.gmra.mxu0 %v6402_v14  ;;  %5962 = vmatprep.subr.mxu0 %v7390_v3  ;;  %v45_v14 = vld [vmem:[%s7386_s0 + $0xe0] sm:$0xff] }
  0x23   :  { %184 = vmatprep.mubr.f32.mxu0 %v7390_v3  ;;  %5826 = vmatprep.subr.mxu1 %v60_v48 }
  0x24   :  { %5827 = vmatpush3.msra.mxu1 %v60_v48 }
  0x25   :  { %5828 = vmatprep.subr.mxu1 %v57_v50 }
  0x26   :  { %185 = vmatmul.mubr.f32.gmra.mxu0 %v18_v43  ;;  %5829 = vmatpush3.msra.mxu1 %v57_v50 }
  0x27   :  { %190 = vmatprep.mubr.f32.mxu0 %v7390_v3  ;;  %5830 = vmatprep.subr.mxu1 %v54_v51 }
  0x28   :  { %5831 = vmatpush3.msra.mxu1 %v54_v51 }
  0x29   :  { %5832 = vmatprep.subr.mxu1 %v51_v53 }
  0x2a   :  { %191 = vmatmul.mubr.f32.gmra.mxu0 %v19_v46  ;;  %5833 = vmatpush3.msra.mxu1 %v51_v53 }
  0x2b   :  { %196 = vmatprep.mubr.f32.mxu0 %v7390_v3  ;;  %5835 = vmatmul.mubr.f32.vlgmr.msra.gmra.mxu1 %v18_v43  ;;  %v109_v43 = vsub.s32 2, %v100_v19 }
  0x2c   :  { %5882 = vmatprep.subr.mxu1 %v7390_v3  ;;  %5837 = vmatprep.mubr.f32.mxu1 %v19_v46 }
  0x2d   :  { %v6675_v50 = vrot.slane %v97_v21, %v109_v43 }
  0x2e   :  { %197 = vmatmul.mubr.f32.gmra.mxu0 %v20_v49 }
  0x2f   :  { %202 = vmatprep.mubr.f32.mxu0 %v7390_v3  ;;  %5838 = vmatmul.mubr.f32.gmra.mxu1 %v20_v49  ;;  %7397 = vst [vmem:[#allocation2_spill] sm:$0xff] %v6675_v50 }
  0x30   :  { %5840 = vmatprep.mubr.f32.mxu1 %v21_v52 }
  0x32   :  { %203 = vmatmul.mubr.f32.gmra.mxu0 %v21_v52 }
  0x33   :  { %208 = vmatprep.mubr.f32.mxu0 %v7390_v3  ;;  %5841 = vmatmul.mubr.f32.gmra.mxu1 %v22_v54 }
  0x34   :  { %5843 = vmatprep.mubr.f32.mxu1 %v23_v55 }
  0x36   :  { %209 = vmatmul.mubr.f32.gmra.mxu0 %v22_v54 }
  0x37   :  { %214 = vmatprep.mubr.f32.mxu0 %v7390_v3  ;;  %5844 = vmatmul.mubr.f32.gmra.mxu1 %v24_v56 }
  0x38   :  { %5846 = vmatprep.mubr.f32.mxu1 %v25_v57 }
  0x3a   :  { %215 = vmatmul.mubr.f32.gmra.mxu0 %v23_v55 }
  0x3b   :  { %220 = vmatprep.mubr.f32.mxu0 %v7390_v3  ;;  %5847 = vmatmul.mubr.f32.gmra.mxu1 %v26_v58 }
  0x3c   :  { %5849 = vmatprep.mubr.f32.mxu1 %v27_v59 }
  0x3e   :  { %221 = vmatmul.mubr.f32.gmra.mxu0 %v24_v56 }
  0x3f   :  { %226 = vmatprep.mubr.f32.mxu0 %v7390_v3  ;;  %5850 = vmatmul.mubr.f32.gmra.mxu1 %v28_v60 }
  0x40   :  { %5852 = vmatprep.mubr.f32.mxu1 %v29_v61 }
  0x42   :  { %227 = vmatmul.mubr.f32.gmra.mxu0 %v25_v57 }
  0x43   :  { %232 = vmatprep.mubr.f32.mxu0 %v7390_v3  ;;  %5853 = vmatmul.mubr.f32.gmra.mxu1 %v30_v62 }
  0x44   :  { %5855 = vmatprep.mubr.f32.mxu1 %v31_v63 }
  0x46   :  { %233 = vmatmul.mubr.f32.gmra.mxu0 %v26_v58 }
  0x47   :  { %238 = vmatprep.mubr.f32.mxu0 %v7390_v3  ;;  %5856 = vmatmul.mubr.f32.gmra.mxu1 %v32_v0 }
  0x48   :  { %5858 = vmatprep.mubr.f32.mxu1 %v33_v1 }
  0x4a   :  { %239 = vmatmul.mubr.f32.gmra.mxu0 %v27_v59 }
  0x4b   :  { %244 = vmatprep.mubr.f32.mxu0 %v7390_v3  ;;  %5859 = vmatmul.mubr.f32.gmra.mxu1 %v34_v2 }
  0x4c   :  { %5861 = vmatprep.mubr.f32.mxu1 %v35_v4 }
  0x4e   :  { %245 = vmatmul.mubr.f32.gmra.mxu0 %v28_v60 }
  0x4f   :  { %250 = vmatprep.mubr.f32.mxu0 %v7390_v3  ;;  %5862 = vmatmul.mubr.f32.gmra.mxu1 %v36_v5 }
  0x50   :  { %5864 = vmatprep.mubr.f32.mxu1 %v37_v6 }
  0x52   :  { %251 = vmatmul.mubr.f32.gmra.mxu0 %v29_v61 }
  0x53   :  { %256 = vmatprep.mubr.f32.mxu0 %v7390_v3  ;;  %5865 = vmatmul.mubr.f32.gmra.mxu1 %v38_v7 }
  0x54   :  { %5867 = vmatprep.mubr.f32.mxu1 %v39_v8 }
  0x56   :  { %257 = vmatmul.mubr.f32.gmra.mxu0 %v30_v62 }
  0x57   :  { %262 = vmatprep.mubr.f32.mxu0 %v7390_v3  ;;  %5868 = vmatmul.mubr.f32.gmra.mxu1 %v40_v9 }
  0x58   :  { %5870 = vmatprep.mubr.f32.mxu1 %v41_v10 }
  0x5a   :  { %263 = vmatmul.mubr.f32.gmra.mxu0 %v31_v63 }
  0x5b   :  { %268 = vmatprep.mubr.f32.mxu0 %v7390_v3  ;;  %5871 = vmatmul.mubr.f32.gmra.mxu1 %v42_v11 }
  0x5c   :  { %5873 = vmatprep.mubr.f32.mxu1 %v43_v12 }
  0x5e   :  { %269 = vmatmul.mubr.f32.gmra.mxu0 %v32_v0 }
  0x5f   :  { %274 = vmatprep.mubr.f32.mxu0 %v7390_v3  ;;  %5874 = vmatmul.mubr.f32.gmra.mxu1 %v44_v13 }
  0x60   :  { %5876 = vmatprep.mubr.f32.mxu1 %v45_v14 }
  0x62   :  { %275 = vmatmul.mubr.f32.gmra.mxu0 %v33_v1 }
  0x63   :  { %280 = vmatprep.mubr.f32.mxu0 %v7390_v3  ;;  %5877 = vmatmul.mubr.f32.gmra.mxu1 %v46_v15 }
  0x64   :  { %5879 = vmatprep.mubr.f32.mxu1 %v47_v16 }
  0x66   :  { %281 = vmatmul.mubr.f32.gmra.mxu0 %v34_v2 }
  0x67   :  { %286 = vmatprep.mubr.f32.mxu0 %v7390_v3  ;;  %5880 = vmatmul.mubr.f32.gmra.mxu1 %v48_v17 }
  0x68   :  { %5884 = vmatprep.mubr.msk.f32.mxu1 %vm6333_vm0, %v7390_v3 }
  0x6a   :  { %287 = vmatmul.mubr.f32.gmra.mxu0 %v35_v4 }
  0x6b   :  { %292 = vmatprep.mubr.f32.mxu0 %v7390_v3 }
  0x6e   :  { %293 = vmatmul.mubr.f32.gmra.mxu0 %v36_v5 }
  0x6f   :  { %298 = vmatprep.mubr.f32.mxu0 %v7390_v3 }
  0x72   :  { %299 = vmatmul.mubr.f32.gmra.mxu0 %v37_v6 }
  0x73   :  { %304 = vmatprep.mubr.f32.mxu0 %v7390_v3 }
  0x76   :  { %305 = vmatmul.mubr.f32.gmra.mxu0 %v38_v7 }
  0x77   :  { %310 = vmatprep.mubr.f32.mxu0 %v7390_v3 }
  0x7a   :  { %311 = vmatmul.mubr.f32.gmra.mxu0 %v39_v8 }
  0x7b   :  { %316 = vmatprep.mubr.f32.mxu0 %v7390_v3 }
  0x7e   :  { %317 = vmatmul.mubr.f32.gmra.mxu0 %v40_v9 }
  0x7f   :  { %322 = vmatprep.mubr.f32.mxu0 %v7390_v3 }
  0x82   :  { %323 = vmatmul.mubr.f32.gmra.mxu0 %v41_v10 }
  0x83   :  { %328 = vmatprep.mubr.f32.mxu0 %v7390_v3 }
  0x86   :  { %329 = vmatmul.mubr.f32.gmra.mxu0 %v42_v11 }
  0x87   :  { %334 = vmatprep.mubr.f32.mxu0 %v7390_v3 }
  0x8a   :  { %335 = vmatmul.mubr.f32.gmra.mxu0 %v43_v12 }
  0x8b   :  { %340 = vmatprep.mubr.f32.mxu0 %v7390_v3 }
  0x8e   :  { %341 = vmatmul.mubr.f32.gmra.mxu0 %v44_v13 }
  0x8f   :  { %346 = vmatprep.mubr.f32.mxu0 %v7390_v3 }
  0x92   :  { %347 = vmatmul.mubr.f32.gmra.mxu0 %v45_v14 }
  0x93   :  { %352 = vmatprep.mubr.f32.mxu0 %v7390_v3 }
  0x96   :  { %353 = vmatmul.mubr.f32.gmra.mxu0 %v46_v15 }
  0x97   :  { %358 = vmatprep.mubr.f32.mxu0 %v7390_v3 }
  0x9a   :  { %359 = vmatmul.mubr.f32.gmra.mxu0 %v47_v16 }
  0x9b   :  { %364 = vmatprep.mubr.f32.mxu0 %v7390_v3 }
  0x9e   :  { %365 = vmatmul.mubr.f32.gmra.mxu0 %v48_v17 }
  0x9f   :  { %5964 = vmatprep.mubr.msk.f32.mxu0 %vm6333_vm0, %v7390_v3 }
  0xe2   :  { %v180_v24 = vpop.f32.mrf.mxu0 }
  0xe3   :  { %v181_v29 = vadd.f32 %v180_v24, %v6646_v25 }
  0xe4   :  { %v182_v26 = vpop.f32.mrf.mxu0 }
  0xe5   :  { %v183_v27 = vadd.f32 %v182_v26, %v6644_v23 }
  0xe6   :  { %v186_v28 = vpop.f32.mrf.mxu0 }
  0xe7   :  { %5883 = vmatpush3.xpose.msra.mxu1 %v183_v27  ;;  %v187_v33 = vadd.f32 %v186_v28, %v6646_v25 }
  0xe8   :  { %v188_v30 = vpop.f32.mrf.mxu0  ;;  %5887 = vmatprep.subr.mxu1 %v7390_v3 }
  0xe9   :  { %v189_v31 = vadd.f32 %v188_v30, %v6644_v23 }
  0xea   :  { %v192_v32 = vpop.f32.mrf.mxu0  ;;  %5885 = vmatmul.mubr.f32.vlgmr.msra.gmra.mxu1 %v181_v29 }
  0xeb   :  { %5888 = vmatpush3.xpose.msra.mxu1 %v189_v31  ;;  %5889 = vmatprep.mubr.msk.f32.mxu1 %vm6333_vm0, %v7390_v3  ;;  %v193_v37 = vadd.f32 %v192_v32, %v6646_v25  ;;  %v6667_v45 = vpop.f32.mrf.mxu1 }
  0xec   :  { %v194_v34 = vpop.f32.mrf.mxu0  ;;  %5892 = vmatprep.subr.mxu1 %v7390_v3 }
  0xed   :  { %v195_v35 = vadd.f32 %v194_v34, %v6644_v23  ;;  %v6671_v47 = vpop.f32.mrf.mxu1 }
  0xee   :  { %v198_v36 = vpop.f32.mrf.mxu0  ;;  %5890 = vmatmul.mubr.f32.vlgmr.msra.gmra.mxu1 %v187_v33 }
  0xef   :  { %5893 = vmatpush3.xpose.msra.mxu1 %v195_v35  ;;  %5894 = vmatprep.mubr.msk.f32.mxu1 %vm6333_vm0, %v7390_v3  ;;  %v199_v41 = vadd.f32 %v198_v36, %v6646_v25  ;;  %v5839_v52 = vpop.f32.mrf.mxu1 }
  0xf0   :  { %v200_v38 = vpop.f32.mrf.mxu0  ;;  %5897 = vmatprep.subr.mxu1 %v7390_v3  ;;  %v6679_v54 = vadd.f32 %v5839_v52, %v6675_v50 }
  0xf1   :  { %v201_v39 = vadd.f32 %v200_v38, %v6644_v23  ;;  %v447_v55 = vpop.f32.mrf.mxu1 }
  0xf2   :  { %v204_v40 = vpop.f32.mrf.mxu0  ;;  %5895 = vmatmul.mubr.f32.vlgmr.msra.gmra.mxu1 %v193_v37  ;;  %v6686_v58 = vadd.f32 %v447_v55, %v6675_v50 }
  0xf3   :  { %5898 = vmatpush3.xpose.msra.mxu1 %v201_v39  ;;  %5899 = vmatprep.mubr.msk.f32.mxu1 %vm6333_vm0, %v7390_v3  ;;  %v205_v48 = vadd.f32 %v204_v40, %v6646_v25  ;;  %v5842_v60 = vpop.f32.mrf.mxu1 }
  0xf4   :  { %v206_v42 = vpop.f32.mrf.mxu0  ;;  %5902 = vmatprep.subr.mxu1 %v7390_v3  ;;  %v6690_v62 = vadd.f32 %v5842_v60, %v6675_v50 }
  0xf5   :  { %v207_v44 = vadd.f32 %v206_v42, %v6644_v23  ;;  %v457_v63 = vpop.f32.mrf.mxu1 }
  0xf6   :  { %v210_v46 = vpop.f32.mrf.mxu0  ;;  %5900 = vmatmul.mubr.f32.vlgmr.msra.gmra.mxu1 %v199_v41  ;;  %v6697_v2 = vadd.f32 %v457_v63, %v6675_v50 }
  0xf7   :  { %5903 = vmatpush3.xpose.msra.mxu1 %v207_v44  ;;  %5904 = vmatprep.mubr.msk.f32.mxu1 %vm6333_vm0, %v7390_v3  ;;  %v211_v56 = vadd.f32 %v210_v46, %v6646_v25  ;;  %v5845_v5 = vpop.f32.mrf.mxu1 }
  0xf8   :  { %v212_v49 = vpop.f32.mrf.mxu0  ;;  %5907 = vmatprep.subr.mxu1 %v7390_v3  ;;  %v6701_v7 = vadd.f32 %v5845_v5, %v6675_v50 }
  0xf9   :  { %v213_v51 = vadd.f32 %v212_v49, %v6644_v23  ;;  %v467_v8 = vpop.f32.mrf.mxu1 }
  0xfa   :  { %v216_v53 = vpop.f32.mrf.mxu0  ;;  %5905 = vmatmul.mubr.f32.vlgmr.msra.gmra.mxu1 %v205_v48  ;;  %v6708_v11 = vadd.f32 %v467_v8, %v6675_v50 }
  0xfb   :  { %5908 = vmatpush3.xpose.msra.mxu1 %v213_v51  ;;  %5909 = vmatprep.mubr.msk.f32.mxu1 %vm6333_vm0, %v7390_v3  ;;  %v217_v0 = vadd.f32 %v216_v53, %v6646_v25  ;;  %v5848_v13 = vpop.f32.mrf.mxu1 }
  0xfc   :  { %v218_v57 = vpop.f32.mrf.mxu0  ;;  %5912 = vmatprep.subr.mxu1 %v7390_v3  ;;  %v6712_v15 = vadd.f32 %v5848_v13, %v6675_v50 }
  0xfd   :  { %v219_v59 = vadd.f32 %v218_v57, %v6644_v23  ;;  %v477_v16 = vpop.f32.mrf.mxu1 }
  0xfe   :  { %v222_v61 = vpop.f32.mrf.mxu0  ;;  %5910 = vmatmul.mubr.f32.vlgmr.msra.gmra.mxu1 %v211_v56  ;;  %v6719_v19 = vadd.f32 %v477_v16, %v6675_v50 }
  0xff   :  { %5913 = vmatpush3.xpose.msra.mxu1 %v219_v59  ;;  %5914 = vmatprep.mubr.msk.f32.mxu1 %vm6333_vm0, %v7390_v3  ;;  %v223_v9 = vadd.f32 %v222_v61, %v6646_v25  ;;  %v5851_v21 = vpop.f32.mrf.mxu1 }
 0x100   :  { %v224_v1 = vpop.f32.mrf.mxu0  ;;  %5917 = vmatprep.subr.mxu1 %v7390_v3  ;;  %v6723_v24 = vadd.f32 %v5851_v21, %v6675_v50 }
 0x101   :  { %v225_v4 = vadd.f32 %v224_v1, %v6644_v23  ;;  %v487_v26 = vpop.f32.mrf.mxu1 }
 0x102   :  { %v228_v6 = vpop.f32.mrf.mxu0  ;;  %5915 = vmatmul.mubr.f32.vlgmr.msra.gmra.mxu1 %v217_v0  ;;  %v6730_v29 = vadd.f32 %v487_v26, %v6675_v50 }
 0x103   :  { %5918 = vmatpush3.xpose.msra.mxu1 %v225_v4  ;;  %5919 = vmatprep.mubr.msk.f32.mxu1 %vm6333_vm0, %v7390_v3  ;;  %v229_v17 = vadd.f32 %v228_v6, %v6646_v25  ;;  %v5854_v31 = vpop.f32.mrf.mxu1 }
 0x104   :  { %v230_v10 = vpop.f32.mrf.mxu0  ;;  %5922 = vmatprep.subr.mxu1 %v7390_v3  ;;  %v6734_v33 = vadd.f32 %v5854_v31, %v6675_v50 }
 0x105   :  { %v231_v12 = vadd.f32 %v230_v10, %v6644_v23  ;;  %v497_v34 = vpop.f32.mrf.mxu1 }
 0x106   :  { %v234_v14 = vpop.f32.mrf.mxu0  ;;  %5920 = vmatmul.mubr.f32.vlgmr.msra.gmra.mxu1 %v223_v9  ;;  %v6741_v37 = vadd.f32 %v497_v34, %v6675_v50 }
 0x107   :  { %5923 = vmatpush3.xpose.msra.mxu1 %v231_v12  ;;  %5924 = vmatprep.mubr.msk.f32.mxu1 %vm6333_vm0, %v7390_v3  ;;  %v235_v27 = vadd.f32 %v234_v14, %v6646_v25  ;;  %v5857_v39 = vpop.f32.mrf.mxu1 }
 0x108   :  { %v236_v18 = vpop.f32.mrf.mxu0  ;;  %5927 = vmatprep.subr.mxu1 %v7390_v3  ;;  %v6745_v41 = vadd.f32 %v5857_v39, %v6675_v50 }
 0x109   :  { %v237_v20 = vadd.f32 %v236_v18, %v6644_v23  ;;  %v507_v42 = vpop.f32.mrf.mxu1 }
 0x10a   :  { %v240_v22 = vpop.f32.mrf.mxu0  ;;  %5925 = vmatmul.mubr.f32.vlgmr.msra.gmra.mxu1 %v229_v17  ;;  %v6752_v46 = vadd.f32 %v507_v42, %v6675_v50 }
 0x10b   :  { %5928 = vmatpush3.xpose.msra.mxu1 %v237_v20  ;;  %5929 = vmatprep.mubr.msk.f32.mxu1 %vm6333_vm0, %v7390_v3  ;;  %v241_v35 = vadd.f32 %v240_v22, %v6646_v25  ;;  %v5860_v49 = vpop.f32.mrf.mxu1 }
 0x10c   :  { %v242_v28 = vpop.f32.mrf.mxu0  ;;  %5932 = vmatprep.subr.mxu1 %v7390_v3  ;;  %v6756_v52 = vadd.f32 %v5860_v49, %v6675_v50 }
 0x10d   :  { %v243_v30 = vadd.f32 %v242_v28, %v6644_v23  ;;  %v517_v53 = vpop.f32.mrf.mxu1 }
 0x10e   :  { %v246_v32 = vpop.f32.mrf.mxu0  ;;  %5930 = vmatmul.mubr.f32.vlgmr.msra.gmra.mxu1 %v235_v27  ;;  %v6763_v57 = vadd.f32 %v517_v53, %v6675_v50 }
 0x10f   :  { %5933 = vmatpush3.xpose.msra.mxu1 %v243_v30  ;;  %5934 = vmatprep.mubr.msk.f32.mxu1 %vm6333_vm0, %v7390_v3  ;;  %v247_v43 = vadd.f32 %v246_v32, %v6646_v25  ;;  %v5863_v60 = vpop.f32.mrf.mxu1 }
 0x110   :  { %v248_v36 = vpop.f32.mrf.mxu0  ;;  %5937 = vmatprep.subr.mxu1 %v7390_v3  ;;  %v6767_v63 = vadd.f32 %v5863_v60, %v6675_v50 }
 0x111   :  { %v249_v38 = vadd.f32 %v248_v36, %v6644_v23  ;;  %v527_v0 = vpop.f32.mrf.mxu1 }
 0x112   :  { %v252_v40 = vpop.f32.mrf.mxu0  ;;  %5935 = vmatmul.mubr.f32.vlgmr.msra.gmra.mxu1 %v241_v35  ;;  %v6774_v5 = vadd.f32 %v527_v0, %v6675_v50 }
 0x113   :  { %5938 = vmatpush3.xpose.msra.mxu1 %v249_v38  ;;  %5939 = vmatprep.mubr.msk.f32.mxu1 %vm6333_vm0, %v7390_v3  ;;  %v253_v55 = vadd.f32 %v252_v40, %v6646_v25  ;;  %v5866_v8 = vpop.f32.mrf.mxu1 }
 0x114   :  { %v254_v44 = vpop.f32.mrf.mxu0  ;;  %5942 = vmatprep.subr.mxu1 %v7390_v3  ;;  %v6778_v10 = vadd.f32 %v5866_v8, %v6675_v50 }
 0x115   :  { %v255_v48 = vadd.f32 %v254_v44, %v6644_v23  ;;  %v537_v12 = vpop.f32.mrf.mxu1 }
 0x116   :  { %v258_v51 = vpop.f32.mrf.mxu0  ;;  %5940 = vmatmul.mubr.f32.vlgmr.msra.gmra.mxu1 %v247_v43  ;;  %v6785_v16 = vadd.f32 %v537_v12, %v6675_v50 }
 0x117   :  { %5943 = vmatpush3.xpose.msra.mxu1 %v255_v48  ;;  %5944 = vmatprep.mubr.msk.f32.mxu1 %vm6333_vm0, %v7390_v3  ;;  %v259_v1 = vadd.f32 %v258_v51, %v6646_v25  ;;  %v5869_v18 = vpop.f32.mrf.mxu1 }
 0x118   :  { %v260_v56 = vpop.f32.mrf.mxu0  ;;  %5947 = vmatprep.subr.mxu1 %v7390_v3  ;;  %v6789_v21 = vadd.f32 %v5869_v18, %v6675_v50 }
 0x119   :  { %v261_v59 = vadd.f32 %v260_v56, %v6644_v23  ;;  %v547_v22 = vpop.f32.mrf.mxu1 }
 0x11a   :  { %v264_v61 = vpop.f32.mrf.mxu0  ;;  %5945 = vmatmul.mubr.f32.vlgmr.msra.gmra.mxu1 %v253_v55  ;;  %v6796_v28 = vadd.f32 %v547_v22, %v6675_v50 }
 0x11b   :  { %5948 = vmatpush3.xpose.msra.mxu1 %v261_v59  ;;  %5949 = vmatprep.mubr.msk.f32.mxu1 %vm6333_vm0, %v7390_v3  ;;  %v265_v13 = vadd.f32 %v264_v61, %v6646_v25  ;;  %v5872_v31 = vpop.f32.mrf.mxu1 }
 0x11c   :  { %v266_v4 = vpop.f32.mrf.mxu0  ;;  %5952 = vmatprep.subr.mxu1 %v7390_v3  ;;  %v6800_v34 = vadd.f32 %v5872_v31, %v6675_v50 }
 0x11d   :  { %v267_v6 = vadd.f32 %v266_v4, %v6644_v23  ;;  %v557_v35 = vpop.f32.mrf.mxu1 }
 0x11e   :  { %v270_v9 = vpop.f32.mrf.mxu0  ;;  %5950 = vmatmul.mubr.f32.vlgmr.msra.gmra.mxu1 %v259_v1  ;;  %7398 = vst [vmem:[#allocation3_spill] sm:$0xff] %v6800_v34  ;;  %v6807_v39 = vadd.f32 %v557_v35, %v6675_v50 }
 0x11f   :  { %5953 = vmatpush3.xpose.msra.mxu1 %v267_v6  ;;  %5954 = vmatprep.mubr.msk.f32.mxu1 %vm6333_vm0, %v7390_v3  ;;  %v271_v26 = vadd.f32 %v270_v9, %v6646_v25  ;;  %v5875_v42 = vpop.f32.mrf.mxu1 }
 0x120   :  { %v272_v14 = vpop.f32.mrf.mxu0  ;;  %5957 = vmatprep.subr.mxu1 %v7390_v3  ;;  %v6811_v44 = vadd.f32 %v5875_v42, %v6675_v50 }
 0x121   :  { %v273_v17 = vadd.f32 %v272_v14, %v6644_v23  ;;  %v567_v48 = vpop.f32.mrf.mxu1 }
 0x122   :  { %v276_v20 = vpop.f32.mrf.mxu0  ;;  %5955 = vmatmul.mubr.f32.vlgmr.msra.gmra.mxu1 %v265_v13  ;;  %7399 = vst [vmem:[#allocation4_spill] sm:$0xff] %v6811_v44  ;;  %v6818_v53 = vadd.f32 %v567_v48, %v6675_v50 }
 0x123   :  { %5958 = vmatpush3.xpose.msra.mxu1 %v273_v17  ;;  %5959 = vmatprep.mubr.msk.f32.mxu1 %vm6333_vm0, %v7390_v3  ;;  %v277_v36 = vadd.f32 %v276_v20, %v6646_v25  ;;  %v5878_v56 = vpop.f32.mrf.mxu1 }
 0x124   :  { %v278_v27 = vpop.f32.mrf.mxu0  ;;  %5967 = vmatprep.subr.mxu1 %v7390_v3  ;;  %7400 = vst [vmem:[#allocation5_spill] sm:$0xff] %v6818_v53  ;;  %v6822_v60 = vadd.f32 %v5878_v56, %v6675_v50 }
 0x125   :  { %v279_v30 = vadd.f32 %v278_v27, %v6644_v23  ;;  %v577_v61 = vpop.f32.mrf.mxu1 }
 0x126   :  { %v282_v32 = vpop.f32.mrf.mxu0  ;;  %5960 = vmatmul.mubr.f32.vlgmr.msra.gmra.mxu1 %v271_v26  ;;  %7401 = vst [vmem:[#allocation6_spill] sm:$0xff] %v6822_v60  ;;  %v6829_v4 = vadd.f32 %v577_v61, %v6675_v50 }
 0x127   :  { %5963 = vmatpush3.xpose.msra.mxu0 %v279_v30  ;;  %5969 = vmatprep.mubr.msk.f32.mxu1 %vm6333_vm0, %v7390_v3  ;;  %v283_v49 = vadd.f32 %v282_v32, %v6646_v25  ;;  %v5881_v8 = vpop.f32.mrf.mxu1 }
 0x128   :  { %v284_v38 = vpop.f32.mrf.mxu0  ;;  %5972 = vmatprep.subr.mxu0 %v7390_v3  ;;  %7402 = vst [vmem:[#allocation7_spill] sm:$0xff] %v6829_v4  ;;  %v6833_v12 = vadd.f32 %v5881_v8, %v6675_v50 }
 0x129   :  { %v285_v40 = vadd.f32 %v284_v38, %v6644_v23 }
 0x12a   :  { %v288_v43 = vpop.f32.mrf.mxu0  ;;  %5965 = vmatmul.mubr.f32.vlgmr.msra.gmra.mxu0 %v277_v36  ;;  %7403 = vst [vmem:[#allocation8_spill] sm:$0xff] %v6833_v12 }
 0x12b   :  { %5968 = vmatpush3.xpose.msra.mxu1 %v285_v40  ;;  %5974 = vmatprep.mubr.msk.f32.mxu0 %vm6333_vm0, %v7390_v3  ;;  %v289_v0 = vadd.f32 %v288_v43, %v6646_v25 }
 0x12c   :  { %v290_v51 = vpop.f32.mrf.mxu0  ;;  %5977 = vmatprep.subr.mxu1 %v7390_v3 }
 0x12d   :  { %v291_v55 = vadd.f32 %v290_v51, %v6644_v23 }
 0x12e   :  { %v294_v59 = vpop.f32.mrf.mxu0  ;;  %5970 = vmatmul.mubr.f32.vlgmr.msra.gmra.mxu1 %v283_v49 }
 0x12f   :  { %5973 = vmatpush3.xpose.msra.mxu0 %v291_v55  ;;  %5979 = vmatprep.mubr.msk.f32.mxu1 %vm6333_vm0, %v7390_v3  ;;  %v295_v13 = vadd.f32 %v294_v59, %v6646_v25 }
 0x130   :  { %v296_v1 = vpop.f32.mrf.mxu0  ;;  %5982 = vmatprep.subr.mxu0 %v7390_v3 }
 0x131   :  { %v297_v6 = vadd.f32 %v296_v1, %v6644_v23 }
 0x132   :  { %v300_v9 = vpop.f32.mrf.mxu0  ;;  %5975 = vmatmul.mubr.f32.vlgmr.msra.gmra.mxu0 %v289_v0 }
 0x133   :  { %5978 = vmatpush3.xpose.msra.mxu1 %v297_v6  ;;  %5984 = vmatprep.mubr.msk.f32.mxu0 %vm6333_vm0, %v7390_v3  ;;  %v301_v20 = vadd.f32 %v300_v9, %v6646_v25 }
 0x134   :  { %v302_v14 = vpop.f32.mrf.mxu0  ;;  %5987 = vmatprep.subr.mxu1 %v7390_v3 }
 0x135   :  { %v303_v17 = vadd.f32 %v302_v14, %v6644_v23 }
 0x136   :  { %v306_v18 = vpop.f32.mrf.mxu0  ;;  %5980 = vmatmul.mubr.f32.vlgmr.msra.gmra.mxu1 %v295_v13 }
 0x137   :  { %5983 = vmatpush3.xpose.msra.mxu0 %v303_v17  ;;  %5989 = vmatprep.mubr.msk.f32.mxu1 %vm6333_vm0, %v7390_v3  ;;  %v307_v30 = vadd.f32 %v306_v18, %v6646_v25 }
 0x138   :  { %v308_v22 = vpop.f32.mrf.mxu0  ;;  %5992 = vmatprep.subr.mxu0 %v7390_v3 }
 0x139   :  { %v309_v26 = vadd.f32 %v308_v22, %v6644_v23 }
 0x13a   :  { %v312_v27 = vpop.f32.mrf.mxu0  ;;  %5985 = vmatmul.mubr.f32.vlgmr.msra.gmra.mxu0 %v301_v20 }
 0x13b   :  { %5988 = vmatpush3.xpose.msra.mxu1 %v309_v26  ;;  %5994 = vmatprep.mubr.msk.f32.mxu0 %vm6333_vm0, %v7390_v3  ;;  %v313_v36 = vadd.f32 %v312_v27, %v6646_v25 }
 0x13c   :  { %v314_v31 = vpop.f32.mrf.mxu0  ;;  %5997 = vmatprep.subr.mxu1 %v7390_v3 }
 0x13d   :  { %v315_v32 = vadd.f32 %v314_v31, %v6644_v23 }
 0x13e   :  { %v318_v35 = vpop.f32.mrf.mxu0  ;;  %5990 = vmatmul.mubr.f32.vlgmr.msra.gmra.mxu1 %v307_v30 }
 0x13f   :  { %5993 = vmatpush3.xpose.msra.mxu0 %v315_v32  ;;  %5999 = vmatprep.mubr.msk.f32.mxu1 %vm6333_vm0, %v7390_v3  ;;  %v319_v43 = vadd.f32 %v318_v35, %v6646_v25 }
 0x140   :  { %v320_v38 = vpop.f32.mrf.mxu0  ;;  %6002 = vmatprep.subr.mxu0 %v7390_v3 }
 0x141   :  { %v321_v40 = vadd.f32 %v320_v38, %v6644_v23 }
 0x142   :  { %v324_v42 = vpop.f32.mrf.mxu0  ;;  %5995 = vmatmul.mubr.f32.vlgmr.msra.gmra.mxu0 %v313_v36 }
 0x143   :  { %5998 = vmatpush3.xpose.msra.mxu1 %v321_v40  ;;  %6004 = vmatprep.mubr.msk.f32.mxu0 %vm6333_vm0, %v7390_v3  ;;  %v325_v55 = vadd.f32 %v324_v42, %v6646_v25  ;;  %v438_v42 = vadd.f32 %v6671_v47, %v6675_v50 }
 0x144   :  { %v326_v48 = vpop.f32.mrf.mxu0  ;;  %6007 = vmatprep.subr.mxu1 %v7390_v3 }
 0x145   :  { %v327_v49 = vadd.f32 %v326_v48, %v6644_v23 }
 0x146   :  { %v330_v51 = vpop.f32.mrf.mxu0  ;;  %6000 = vmatmul.mubr.f32.vlgmr.msra.gmra.mxu1 %v319_v43 }
 0x147   :  { %6003 = vmatpush3.xpose.msra.mxu0 %v327_v49  ;;  %6009 = vmatprep.mubr.msk.f32.mxu1 %vm6333_vm0, %v7390_v3  ;;  %v331_v0 = vadd.f32 %v330_v51, %v6646_v25  ;;  %v443_v51 = vadd.f32 %v6667_v45, %v6675_v50 }
 0x148   :  { %v332_v56 = vpop.f32.mrf.mxu0  ;;  %6012 = vmatprep.subr.mxu0 %v7390_v3 }
 0x149   :  { %v333_v59 = vadd.f32 %v332_v56, %v6644_v23 }
 0x14a   :  { %v336_v61 = vpop.f32.mrf.mxu0  ;;  %6005 = vmatmul.mubr.f32.vlgmr.msra.gmra.mxu0 %v325_v55 }
 0x14b   :  { %6008 = vmatpush3.xpose.msra.mxu1 %v333_v59  ;;  %6014 = vmatprep.mubr.msk.f32.mxu0 %vm6333_vm0, %v7390_v3  ;;  %v337_v9 = vadd.f32 %v336_v61, %v6646_v25 }
 0x14c   :  { %v338_v1 = vpop.f32.mrf.mxu0  ;;  %6017 = vmatprep.subr.mxu1 %v7390_v3 }
 0x14d   :  { %v339_v6 = vadd.f32 %v338_v1, %v6644_v23 }
 0x14e   :  { %v342_v8 = vpop.f32.mrf.mxu0  ;;  %6010 = vmatmul.mubr.f32.vlgmr.msra.gmra.mxu1 %v331_v0 }
 0x14f   :  { %6013 = vmatpush3.xpose.msra.mxu0 %v339_v6  ;;  %6019 = vmatprep.mubr.msk.f32.mxu1 %vm6333_vm0, %v7390_v3  ;;  %v343_v18 = vadd.f32 %v342_v8, %v6646_v25 }
 0x150   :  { %v344_v13 = vpop.f32.mrf.mxu0  ;;  %6022 = vmatprep.subr.mxu0 %v7390_v3 }
 0x151   :  { %v345_v14 = vadd.f32 %v344_v13, %v6644_v23 }
 0x152   :  { %v348_v17 = vpop.f32.mrf.mxu0  ;;  %6015 = vmatmul.mubr.f32.vlgmr.msra.gmra.mxu0 %v337_v9 }
 0x153   :  { %6018 = vmatpush3.xpose.msra.mxu1 %v345_v14  ;;  %6024 = vmatprep.mubr.msk.f32.mxu0 %vm6333_vm0, %v7390_v3  ;;  %v349_v27 = vadd.f32 %v348_v17, %v6646_v25 }
 0x154   :  { %v350_v20 = vpop.f32.mrf.mxu0  ;;  %6027 = vmatprep.subr.mxu1 %v7390_v3 }
 0x155   :  { %v351_v22 = vadd.f32 %v350_v20, %v6644_v23 }
 0x156   :  { %v354_v26 = vpop.f32.mrf.mxu0  ;;  %6020 = vmatmul.mubr.f32.vlgmr.msra.gmra.mxu1 %v343_v18 }
 0x157   :  { %6023 = vmatpush3.xpose.msra.mxu0 %v351_v22  ;;  %6029 = vmatprep.mubr.msk.f32.mxu1 %vm6333_vm0, %v7390_v3  ;;  %v355_v35 = vadd.f32 %v354_v26, %v6646_v25 }
 0x158   :  { %v356_v30 = vpop.f32.mrf.mxu0  ;;  %6032 = vmatprep.subr.mxu0 %v7390_v3 }
 0x159   :  { %v357_v31 = vadd.f32 %v356_v30, %v6644_v23 }
 0x15a   :  { %v360_v32 = vpop.f32.mrf.mxu0  ;;  %6025 = vmatmul.mubr.f32.vlgmr.msra.gmra.mxu0 %v349_v27 }
 0x15b   :  { %6028 = vmatpush3.xpose.msra.mxu1 %v357_v31  ;;  %6034 = vmatprep.mubr.msk.f32.mxu0 %vm6333_vm0, %v7390_v3  ;;  %v361_v43 = vadd.f32 %v360_v32, %v6646_v25 }
 0x15c   :  { %v362_v36 = vpop.f32.mrf.mxu0  ;;  %6037 = vmatprep.subr.mxu1 %v7390_v3 }
 0x15d   :  { %v363_v38 = vadd.f32 %v362_v36, %v6644_v23 }
 0x15e   :  { %v366_v40 = vpop.f32.mrf.mxu0  ;;  %6030 = vmatmul.mubr.f32.vlgmr.msra.gmra.mxu1 %v355_v35 }
 0x15f   :  { %6033 = vmatpush3.xpose.msra.mxu0 %v363_v38  ;;  %6039 = vmatprep.mubr.msk.f32.mxu1 %vm6333_vm0, %v7390_v3  ;;  %v367_v55 = vadd.f32 %v366_v40, %v6646_v25 }
 0x160   :  { %v368_v48 = vpop.f32.mrf.mxu0  ;;  %6042 = vmatprep.subr.mxu0 %v7390_v3 }
 0x161   :  { %v369_v49 = vadd.f32 %v368_v48, %v6644_v23  ;;  %v6907_v23 = vpop.f32.mrf.mxu1 }
 0x162   :  { %6035 = vmatmul.mubr.f32.vlgmr.msra.gmra.mxu0 %v361_v43  ;;  %7404 = vst [vmem:[#allocation9_spill] sm:$0xff] %v6907_v23 }
 0x163   :  { %6038 = vmatpush3.xpose.msra.mxu1 %v369_v49  ;;  %6043 = vmatpush3.msra.mxu0 %v438_v42 }
 0x164   :  { %6047 = vmatprep.subr.mxu1 %v7390_v3  ;;  %6044 = vmatprep.mubr.msk.f32.mxu0 %vm6333_vm0, %v7390_v3 }
 0x165   :  { %6052 = vmatprep.subr.mxu0 %v7390_v3 }
 0x166   :  { %6040 = vmatmul.mubr.f32.vlgmr.msra.gmra.mxu1 %v367_v55 }
 0x167   :  { %6048 = vmatpush3.msra.mxu1 %v443_v51  ;;  %6049 = vmatprep.mubr.msk.f32.mxu1 %vm6333_vm0, %v7390_v3 }
 0x168   :  { %6057 = vmatprep.subr.mxu1 %v7390_v3 }
 0x1aa   :  { %v6909_v45 = vpop.f32.mrf.mxu1 }
 0x1ab   :  { %v2837_v25 = vsel %vm2836_vm1, %v6909_v45, -inf }
 0x1ac   :  { %2838 = vmax.xlane.f32.xlu0 %v2837_v25  ;;  %v5886_v47 = vpop.f32.mrf.mxu1 }
 0x1ae   :  { %v6913_v56 = vpop.f32.mrf.mxu1 }
 0x1af   :  { %v2840_v59 = vsel %vm2836_vm1, %v6913_v56, -inf }
 0x1b0   :  { %2841 = vmax.xlane.f32.xlu0 %v2840_v59  ;;  %v5891_v61 = vpop.f32.mrf.mxu1 }
 0x1b2   :  { %v6917_v0 = vpop.f32.mrf.mxu1 }
 0x1b3   :  { %v2843_v1 = vsel %vm2836_vm1, %v6917_v0, -inf }
 0x1b4   :  { %2844 = vmax.xlane.f32.xlu1 %v2843_v1  ;;  %v5896_v6 = vpop.f32.mrf.mxu1 }
 0x1b6   :  { %v6921_v8 = vpop.f32.mrf.mxu1 }
 0x1b7   :  { %v2846_v9 = vsel %vm2836_vm1, %v6921_v8, -inf }
 0x1b8   :  { %2847 = vmax.xlane.f32.xlu1 %v2846_v9  ;;  %v5901_v13 = vpop.f32.mrf.mxu1 }
 0x1ba   :  { %v6925_v14 = vpop.f32.mrf.mxu1 }
 0x1bb   :  { %v2849_v17 = vsel %vm2836_vm1, %v6925_v14, -inf }
 0x1bc   :  { %2850 = vmax.xlane.f32.xlu0 %v2849_v17  ;;  %v5906_v18 = vpop.f32.mrf.mxu1 }
 0x1be   :  { %v6929_v20 = vpop.f32.mrf.mxu1 }
 0x1bf   :  { %v2852_v22 = vsel %vm2836_vm1, %v6929_v20, -inf }
 0x1c0   :  { %2853 = vmax.xlane.f32.xlu1 %v2852_v22  ;;  %v5911_v26 = vpop.f32.mrf.mxu1 }
 0x1c2   :  { %v6933_v27 = vpop.f32.mrf.mxu1 }
 0x1c3   :  { %v2855_v30 = vsel %vm2836_vm1, %v6933_v27, -inf }
 0x1c4   :  { %2856 = vmax.xlane.f32.xlu0 %v2855_v30  ;;  %v5916_v31 = vpop.f32.mrf.mxu1 }
 0x1c6   :  { %v6937_v32 = vpop.f32.mrf.mxu1 }
 0x1c7   :  { %v2858_v35 = vsel %vm2836_vm1, %v6937_v32, -inf }
 0x1c8   :  { %2859 = vmax.xlane.f32.xlu1 %v2858_v35  ;;  %v5921_v36 = vpop.f32.mrf.mxu1 }
 0x1ca   :  { %v6941_v38 = vpop.f32.mrf.mxu1 }
 0x1cb   :  { %v2861_v40 = vsel %vm2836_vm1, %v6941_v38, -inf }
 0x1cc   :  { %2862 = vmax.xlane.f32.xlu0 %v2861_v40  ;;  %v5926_v42 = vpop.f32.mrf.mxu1 }
 0x1ce   :  { %v6945_v43 = vpop.f32.mrf.mxu1 }
 0x1cf   :  { %v2864_v48 = vsel %vm2836_vm1, %v6945_v43, -inf }
 0x1d0   :  { %2865 = vmax.xlane.f32.xlu1 %v2864_v48  ;;  %v5931_v49 = vpop.f32.mrf.mxu1 }
 0x1d2   :  { %v6949_v51 = vpop.f32.mrf.mxu1 }
 0x1d3   :  { %v2867_v55 = vsel %vm2836_vm1, %v6949_v51, -inf }
 0x1d4   :  { %2868 = vmax.xlane.f32.xlu0 %v2867_v55  ;;  %v5936_v25 = vpop.f32.mrf.mxu1 }
 0x1d6   :  { %v6953_v47 = vpop.f32.mrf.mxu1 }
 0x1d7   :  { %v2870_v59 = vsel %vm2836_vm1, %v6953_v47, -inf }
 0x1d8   :  { %2871 = vmax.xlane.f32.xlu1 %v2870_v59  ;;  %v5941_v61 = vpop.f32.mrf.mxu1 }
 0x1da   :  { %v6957_v1 = vpop.f32.mrf.mxu1 }
 0x1db   :  { %v2873_v6 = vsel %vm2836_vm1, %v6957_v1, -inf }
 0x1dc   :  { %2874 = vmax.xlane.f32.xlu0 %v2873_v6  ;;  %v5946_v9 = vpop.f32.mrf.mxu1 }
 0x1de   :  { %v6961_v13 = vpop.f32.mrf.mxu1 }
 0x1df   :  { %v2876_v17 = vsel %vm2836_vm1, %v6961_v13, -inf }
 0x1e0   :  { %2877 = vmax.xlane.f32.xlu1 %v2876_v17  ;;  %v5951_v18 = vpop.f32.mrf.mxu1 }
 0x1e2   :  { %v6965_v22 = vpop.f32.mrf.mxu1 }
 0x1e3   :  { %v2879_v26 = vsel %vm2836_vm1, %v6965_v22, -inf }
 0x1e4   :  { %2880 = vmax.xlane.f32.xlu0 %v2879_v26  ;;  %v5956_v30 = vpop.f32.mrf.mxu1 }
 0x1e6   :  { %v6969_v31 = vpop.f32.mrf.mxu1 }
 0x1e7   :  { %v2882_v35 = vsel %vm2836_vm1, %v6969_v31, -inf }
 0x1e8   :  { %2883 = vmax.xlane.f32.xlu1 %v2882_v35  ;;  %v5961_v36 = vpop.f32.mrf.mxu1 }
 0x1ea   :  { %v6973_v40 = vpop.f32.mrf.mxu0 }
 0x1eb   :  { %v2885_v42 = vsel %vm2836_vm1, %v6973_v40, -inf }
 0x1ec   :  { %v5966_v48 = vpop.f32.mrf.mxu0  ;;  %2886 = vmax.xlane.f32.xlu0 %v2885_v42 }
 0x1ee   :  { %v6977_v49 = vpop.f32.mrf.mxu1 }
 0x1ef   :  { %v2888_v55 = vsel %vm2836_vm1, %v6977_v49, -inf }
 0x1f0   :  { %2889 = vmax.xlane.f32.xlu1 %v2888_v55  ;;  %v5971_v25 = vpop.f32.mrf.mxu1 }
 0x1f2   :  { %v6981_v59 = vpop.f32.mrf.mxu0 }
 0x1f3   :  { %v2891_v61 = vsel %vm2836_vm1, %v6981_v59, -inf }
 0x1f4   :  { %2892 = vmax.xlane.f32.xlu0 %v2891_v61  ;;  %v5976_v6 = vpop.f32.mrf.mxu0 }
 0x1f6   :  { %v6985_v9 = vpop.f32.mrf.mxu1 }
 0x1f7   :  { %v2894_v17 = vsel %vm2836_vm1, %v6985_v9, -inf }
 0x1f8   :  { %2895 = vmax.xlane.f32.xlu1 %v2894_v17  ;;  %v5981_v18 = vpop.f32.mrf.mxu1 }
 0x1fa   :  { %v6989_v26 = vpop.f32.mrf.mxu0 }
 0x1fb   :  { %v2897_v30 = vsel %vm2836_vm1, %v6989_v26, -inf }
 0x1fc   :  { %2898 = vmax.xlane.f32.xlu0 %v2897_v30  ;;  %v5986_v35 = vpop.f32.mrf.mxu0 }
 0x1fe   :  { %v6993_v36 = vpop.f32.mrf.mxu1 }
 0x1ff   :  { %v2900_v42 = vsel %vm2836_vm1, %v6993_v36, -inf }
 0x200   :  { %2901 = vmax.xlane.f32.xlu1 %v2900_v42  ;;  %v5991_v48 = vpop.f32.mrf.mxu1 }
 0x202   :  { %v6997_v55 = vpop.f32.mrf.mxu0 }
 0x203   :  { %v2903_v25 = vsel %vm2836_vm1, %v6997_v55, -inf }
 0x204   :  { %2904 = vmax.xlane.f32.xlu0 %v2903_v25  ;;  %v5996_v61 = vpop.f32.mrf.mxu0 }
 0x206   :  { %v7001_v6 = vpop.f32.mrf.mxu1 }
 0x207   :  { %v2906_v17 = vsel %vm2836_vm1, %v7001_v6, -inf }
 0x208   :  { %2907 = vmax.xlane.f32.xlu1 %v2906_v17  ;;  %v6001_v18 = vpop.f32.mrf.mxu1 }
 0x20a   :  { %v7005_v30 = vpop.f32.mrf.mxu0 }
 0x20b   :  { %v2909_v35 = vsel %vm2836_vm1, %v7005_v30, -inf }
 0x20c   :  { %2910 = vmax.xlane.f32.xlu0 %v2909_v35  ;;  %v6006_v42 = vpop.f32.mrf.mxu0 }
 0x20e   :  { %v7009_v48 = vpop.f32.mrf.mxu1 }
 0x20f   :  { %v2912_v25 = vsel %vm2836_vm1, %v7009_v48, -inf }
 0x210   :  { %2913 = vmax.xlane.f32.xlu1 %v2912_v25  ;;  %v6011_v61 = vpop.f32.mrf.mxu1 }
 0x212   :  { %v7013_v3 = vpop.f32.mrf.mxu0 }
 0x213   :  { %v2915_v17 = vsel %vm2836_vm1, %v7013_v3, -inf }
 0x214   :  { %2916 = vmax.xlane.f32.xlu0 %v2915_v17  ;;  %v6016_v18 = vpop.f32.mrf.mxu0 }
 0x216   :  { %v7017_v12 = vpop.f32.mrf.mxu1 }
 0x217   :  { %v2918_v35 = vsel %vm2836_vm1, %v7017_v12, -inf }
 0x218   :  { %2919 = vmax.xlane.f32.xlu1 %v2918_v35  ;;  %v6021_v42 = vpop.f32.mrf.mxu1 }
 0x21a   :  { %v7021_v23 = vpop.f32.mrf.mxu0 }
 0x21b   :  { %7405 = vst [vmem:[#allocation10_spill] sm:$0xff] %v7021_v23  ;;  %v2921_v25 = vsel %vm2836_vm1, %v7021_v23, -inf }
 0x21c   :  { %2922 = vmax.xlane.f32.xlu0 %v2921_v25  ;;  %v6026_v61 = vpop.f32.mrf.mxu0 }
 0x21e   :  { %v7025_v50 = vpop.f32.mrf.mxu1 }
 0x21f   :  { %7406 = vst [vmem:[#allocation11_spill] sm:$0xff] %v7025_v50  ;;  %v2924_v17 = vsel %vm2836_vm1, %v7025_v50, -inf }
 0x220   :  { %2925 = vmax.xlane.f32.xlu1 %v2924_v17  ;;  %v6031_v18 = vpop.f32.mrf.mxu1 }
 0x222   :  { %v7029_v60 = vpop.f32.mrf.mxu0 }
 0x223   :  { %7407 = vst [vmem:[#allocation12_spill] sm:$0xff] %v7029_v60  ;;  %v2927_v35 = vsel %vm2836_vm1, %v7029_v60, -inf }
 0x224   :  { %2928 = vmax.xlane.f32.xlu0 %v2927_v35  ;;  %v6036_v42 = vpop.f32.mrf.mxu0 }
 0x226   :  { %v7033_v4 = vpop.f32.mrf.mxu1 }
 0x227   :  { %7408 = vst [vmem:[#allocation13_spill] sm:$0xff] %v7033_v4  ;;  %v2930_v25 = vsel %vm2836_vm1, %v7033_v4, -inf }
 0x228   :  { %2931 = vmax.xlane.f32.xlu1 %v2930_v25  ;;  %v6041_v61 = vpop.f32.mrf.mxu1 }
 0x235   :  { %v2839_v44 = vpop.xlane.xlu0 %2838 }
 0x236   :  { %v2933_v53 = vsub.f32 %v6909_v45, %v2839_v44  ;;  %v7044_v44 = vld [vmem:[%s7388_s3] sm:$0xff] }
 0x238   :  { %v2965_v50 = vmul.f32 1.442695, %v2933_v53 }
 0x239   :  { %v2842_v17 = vpop.xlane.xlu0 %2841 }
 0x23a   :  { %6204 = vpow2.f32 %v2965_v50  ;;  %v2934_v18 = vsub.f32 %v6913_v56, %v2842_v17 }
 0x23c   :  { %v2967_v34 = vmul.f32 1.442695, %v2934_v18 }
 0x23d   :  { %v2845_v23 = vpop.xlane.xlu1 %2844 }
 0x23e   :  { %6206 = vpow2.f32 %v2967_v34  ;;  %v2935_v35 = vsub.f32 %v6917_v0, %v2845_v23  ;;  %v7409_v0 = vmov 0.0  }
 0x240   :  { %v2969_v42 = vmul.f32 1.442695, %v2935_v35 }
 0x241   :  { %v2848_v60 = vpop.xlane.xlu1 %2847 }
 0x242   :  { %6208 = vpow2.f32 %v2969_v42  ;;  %v2936_v4 = vsub.f32 %v6921_v8, %v2848_v60 }
 0x244   :  { %v2971_v25 = vmul.f32 1.442695, %v2936_v4 }
 0x245   :  { %v2851_v61 = vpop.xlane.xlu0 %2850 }
 0x246   :  { %6210 = vpow2.f32 %v2971_v25  ;;  %v2937_v50 = vsub.f32 %v6925_v14, %v2851_v61 }
 0x247   :  { %v6205_v53 = vpop.eup %6204 }
 0x248   :  { %v2973_v45 = vmul.f32 1.442695, %v2937_v50  ;;  %v3029_v34 = vsel %vm2836_vm1, %v6205_v53, 0.0  ;;  %v3126_v23 = vmul.f32 %v6205_v53, %v7044_v44 }
 0x249   :  { %v2854_v56 = vpop.xlane.xlu1 %2853  ;;  %3030 = vadd.xlane.f32.xlu0 %v3029_v34 }
 0x24a   :  { %6212 = vpow2.f32 %v2973_v45  ;;  %v2938_v60 = vsub.f32 %v6929_v20, %v2854_v56  ;;  %6045 = vmatmul.mubr.msk.f32.vlgmr.msra.gmra.mxu0 %vm2836_vm1, %v3126_v23 }
 0x24b   :  { %v6207_v4 = vpop.eup %6206  ;;  %6053 = vmatpush3.msra.mxu0 %v6686_v58  ;;  %6054 = vmatprep.mubr.msk.f32.mxu0 %vm6333_vm0, %v7409_v0 }
 0x24c   :  { %v2975_v8 = vmul.f32 1.442695, %v2938_v60  ;;  %v3032_v14 = vsel %vm2836_vm1, %v6207_v4, 0.0  ;;  %v3127_v17 = vmul.f32 %v6207_v4, %v7044_v44  ;;  %6062 = vmatprep.subr.mxu0 %v7409_v0 }
 0x24d   :  { %v2857_v18 = vpop.xlane.xlu0 %2856  ;;  %3033 = vadd.xlane.f32.xlu1 %v3032_v14 }
 0x24e   :  { %6214 = vpow2.f32 %v2975_v8  ;;  %v2939_v20 = vsub.f32 %v6933_v27, %v2857_v18  ;;  %6050 = vmatmul.mubr.msk.f32.vlgmr.msra.gmra.mxu1 %vm2836_vm1, %v3127_v17 }
 0x24f   :  { %v6209_v35 = vpop.eup %6208  ;;  %6058 = vmatpush3.msra.mxu1 %v6679_v54  ;;  %6059 = vmatprep.mubr.msk.f32.mxu1 %vm6333_vm0, %v7409_v0 }
 0x250   :  { %v2977_v58 = vmul.f32 1.442695, %v2939_v20  ;;  %v3035_v42 = vsel %vm2836_vm1, %v6209_v35, 0.0  ;;  %v3128_v25 = vmul.f32 %v6209_v35, %v7044_v44  ;;  %6067 = vmatprep.subr.mxu1 %v7409_v0 }
 0x251   :  { %v2860_v61 = vpop.xlane.xlu1 %2859  ;;  %3036 = vadd.xlane.f32.xlu0 %v3035_v42 }
 0x252   :  { %6216 = vpow2.f32 %v2977_v58  ;;  %v2940_v27 = vsub.f32 %v6937_v32, %v2860_v61  ;;  %6055 = vmatmul.mubr.msk.f32.vlgmr.msra.gmra.mxu0 %vm2836_vm1, %v3128_v25 }
 0x253   :  { %v6211_v50 = vpop.eup %6210  ;;  %6063 = vmatpush3.msra.mxu0 %v6697_v2  ;;  %6064 = vmatprep.mubr.msk.f32.mxu0 %vm6333_vm0, %v7409_v0 }
 0x254   :  { %v2979_v54 = vmul.f32 1.442695, %v2940_v27  ;;  %v3038_v53 = vsel %vm2836_vm1, %v6211_v50, 0.0  ;;  %v3129_v45 = vmul.f32 %v6211_v50, %v7044_v44  ;;  %6072 = vmatprep.subr.mxu0 %v7409_v0 }
 0x255   :  { %v2863_v34 = vpop.xlane.xlu0 %2862  ;;  %3039 = vadd.xlane.f32.xlu1 %v3038_v53 }
 0x256   :  { %6218 = vpow2.f32 %v2979_v54  ;;  %v2941_v32 = vsub.f32 %v6941_v38, %v2863_v34  ;;  %6060 = vmatmul.mubr.msk.f32.vlgmr.msra.gmra.mxu1 %vm2836_vm1, %v3129_v45 }
 0x257   :  { %v6213_v23 = vpop.eup %6212  ;;  %6068 = vmatpush3.msra.mxu1 %v6690_v62  ;;  %6069 = vmatprep.mubr.msk.f32.mxu1 %vm6333_vm0, %v7409_v0 }
 0x258   :  { %v2981_v2 = vmul.f32 1.442695, %v2941_v32  ;;  %v3041_v56 = vsel %vm2836_vm1, %v6213_v23, 0.0  ;;  %v3130_v60 = vmul.f32 %v6213_v23, %v7044_v44  ;;  %6077 = vmatprep.subr.mxu1 %v7409_v0 }
 0x259   :  { %v2866_v4 = vpop.xlane.xlu1 %2865  ;;  %3042 = vadd.xlane.f32.xlu0 %v3041_v56 }
 0x25a   :  { %6220 = vpow2.f32 %v2981_v2  ;;  %v2942_v38 = vsub.f32 %v6945_v43, %v2866_v4  ;;  %6065 = vmatmul.mubr.msk.f32.vlgmr.msra.gmra.mxu0 %vm2836_vm1, %v3130_v60 }
 0x25b   :  { %v6215_v8 = vpop.eup %6214  ;;  %6073 = vmatpush3.msra.mxu0 %v6708_v11  ;;  %6074 = vmatprep.mubr.msk.f32.mxu0 %vm6333_vm0, %v7409_v0 }
 0x25c   :  { %v2983_v62 = vmul.f32 1.442695, %v2942_v38  ;;  %v3044_v14 = vsel %vm2836_vm1, %v6215_v8, 0.0  ;;  %v3131_v17 = vmul.f32 %v6215_v8, %v7044_v44  ;;  %6082 = vmatprep.subr.mxu0 %v7409_v0 }
 0x25d   :  { %v2869_v18 = vpop.xlane.xlu0 %2868  ;;  %3045 = vadd.xlane.f32.xlu1 %v3044_v14 }
 0x25e   :  { %6222 = vpow2.f32 %v2983_v62  ;;  %v2943_v43 = vsub.f32 %v6949_v51, %v2869_v18  ;;  %6070 = vmatmul.mubr.msk.f32.vlgmr.msra.gmra.mxu1 %vm2836_vm1, %v3131_v17 }
 0x25f   :  { %v6217_v20 = vpop.eup %6216  ;;  %6078 = vmatpush3.msra.mxu1 %v6701_v7  ;;  %6079 = vmatprep.mubr.msk.f32.mxu1 %vm6333_vm0, %v7409_v0 }
 0x260   :  { %v2985_v11 = vmul.f32 1.442695, %v2943_v43  ;;  %v3047_v35 = vsel %vm2836_vm1, %v6217_v20, 0.0  ;;  %v3132_v58 = vmul.f32 %v6217_v20, %v7044_v44  ;;  %6087 = vmatprep.subr.mxu1 %v7409_v0 }
 0x261   :  { %v2872_v42 = vpop.xlane.xlu1 %2871  ;;  %3048 = vadd.xlane.f32.xlu0 %v3047_v35 }
 0x262   :  { %6224 = vpow2.f32 %v2985_v11  ;;  %v2944_v51 = vsub.f32 %v6953_v47, %v2872_v42  ;;  %6075 = vmatmul.mubr.msk.f32.vlgmr.msra.gmra.mxu0 %vm2836_vm1, %v3132_v58 }
 0x263   :  { %v6219_v25 = vpop.eup %6218  ;;  %6083 = vmatpush3.msra.mxu0 %v6719_v19  ;;  %6084 = vmatprep.mubr.msk.f32.mxu0 %vm6333_vm0, %v7409_v0 }
 0x264   :  { %v2987_v7 = vmul.f32 1.442695, %v2944_v51  ;;  %v3050_v61 = vsel %vm2836_vm1, %v6219_v25, 0.0  ;;  %v3133_v27 = vmul.f32 %v6219_v25, %v7044_v44  ;;  %6092 = vmatprep.subr.mxu0 %v7409_v0 }
 0x265   :  { %v2875_v50 = vpop.xlane.xlu0 %2874  ;;  %3051 = vadd.xlane.f32.xlu1 %v3050_v61 }
 0x266   :  { %6226 = vpow2.f32 %v2987_v7  ;;  %v2945_v47 = vsub.f32 %v6957_v1, %v2875_v50  ;;  %6080 = vmatmul.mubr.msk.f32.vlgmr.msra.gmra.mxu1 %vm2836_vm1, %v3133_v27 }
 0x267   :  { %v6221_v54 = vpop.eup %6220  ;;  %6088 = vmatpush3.msra.mxu1 %v6712_v15  ;;  %6089 = vmatprep.mubr.msk.f32.mxu1 %vm6333_vm0, %v7409_v0 }
 0x268   :  { %v2989_v19 = vmul.f32 1.442695, %v2945_v47  ;;  %v3053_v53 = vsel %vm2836_vm1, %v6221_v54, 0.0  ;;  %v3134_v45 = vmul.f32 %v6221_v54, %v7044_v44  ;;  %6097 = vmatprep.subr.mxu1 %v7409_v0 }
 0x269   :  { %v2878_v34 = vpop.xlane.xlu1 %2877  ;;  %3054 = vadd.xlane.f32.xlu0 %v3053_v53 }
 0x26a   :  { %6228 = vpow2.f32 %v2989_v19  ;;  %v2946_v1 = vsub.f32 %v6961_v13, %v2878_v34  ;;  %6085 = vmatmul.mubr.msk.f32.vlgmr.msra.gmra.mxu0 %vm2836_vm1, %v3134_v45 }
 0x26b   :  { %v6223_v32 = vpop.eup %6222  ;;  %6093 = vmatpush3.msra.mxu0 %v6730_v29  ;;  %6094 = vmatprep.mubr.msk.f32.mxu0 %vm6333_vm0, %v7409_v0 }
 0x26c   :  { %v2991_v15 = vmul.f32 1.442695, %v2946_v1  ;;  %v3056_v23 = vsel %vm2836_vm1, %v6223_v32, 0.0  ;;  %v3135_v2 = vmul.f32 %v6223_v32, %v7044_v44  ;;  %6102 = vmatprep.subr.mxu0 %v7409_v0 }
 0x26d   :  { %v2881_v56 = vpop.xlane.xlu0 %2880  ;;  %3057 = vadd.xlane.f32.xlu1 %v3056_v23 }
 0x26e   :  { %6230 = vpow2.f32 %v2991_v15  ;;  %v2947_v13 = vsub.f32 %v6965_v22, %v2881_v56  ;;  %6090 = vmatmul.mubr.msk.f32.vlgmr.msra.gmra.mxu1 %vm2836_vm1, %v3135_v2 }
 0x26f   :  { %v6225_v60 = vpop.eup %6224  ;;  %6098 = vmatpush3.msra.mxu1 %v6723_v24  ;;  %6099 = vmatprep.mubr.msk.f32.mxu1 %vm6333_vm0, %v7409_v0 }
 0x270   :  { %v2993_v29 = vmul.f32 1.442695, %v2947_v13  ;;  %v3059_v4 = vsel %vm2836_vm1, %v6225_v60, 0.0  ;;  %v3136_v38 = vmul.f32 %v6225_v60, %v7044_v44  ;;  %6107 = vmatprep.subr.mxu1 %v7409_v0 }
 0x271   :  { %3060 = vadd.xlane.f32.xlu0 %v3059_v4  ;;  %v2884_v8 = vpop.xlane.xlu1 %2883 }
 0x272   :  { %6232 = vpow2.f32 %v2993_v29  ;;  %v2948_v22 = vsub.f32 %v6969_v31, %v2884_v8  ;;  %6095 = vmatmul.mubr.msk.f32.vlgmr.msra.gmra.mxu0 %vm2836_vm1, %v3136_v38 }
 0x273   :  { %v6227_v62 = vpop.eup %6226  ;;  %6103 = vmatpush3.msra.mxu0 %v6741_v37  ;;  %6104 = vmatprep.mubr.msk.f32.mxu0 %vm6333_vm0, %v7409_v0 }
 0x274   :  { %v2995_v24 = vmul.f32 1.442695, %v2948_v22  ;;  %v3062_v14 = vsel %vm2836_vm1, %v6227_v62, 0.0  ;;  %v3137_v17 = vmul.f32 %v6227_v62, %v7044_v44  ;;  %6112 = vmatprep.subr.mxu0 %v7409_v0 }
 0x275   :  { %v2887_v18 = vpop.xlane.xlu0 %2886  ;;  %3063 = vadd.xlane.f32.xlu1 %v3062_v14 }
 0x276   :  { %6234 = vpow2.f32 %v2995_v24  ;;  %v2949_v31 = vsub.f32 %v6973_v40, %v2887_v18  ;;  %6100 = vmatmul.mubr.msk.f32.vlgmr.msra.gmra.mxu1 %vm2836_vm1, %v3137_v17 }
 0x277   :  { %v6229_v43 = vpop.eup %6228  ;;  %6108 = vmatpush3.msra.mxu1 %v6734_v33  ;;  %6109 = vmatprep.mubr.msk.f32.mxu1 %vm6333_vm0, %v7409_v0 }
 0x278   :  { %v2997_v37 = vmul.f32 1.442695, %v2949_v31  ;;  %v3065_v20 = vsel %vm2836_vm1, %v6229_v43, 0.0  ;;  %v3138_v11 = vmul.f32 %v6229_v43, %v7044_v44  ;;  %6117 = vmatprep.subr.mxu1 %v7409_v0 }
 0x279   :  { %3066 = vadd.xlane.f32.xlu0 %v3065_v20  ;;  %v2890_v35 = vpop.xlane.xlu1 %2889 }
 0x27a   :  { %6236 = vpow2.f32 %v2997_v37  ;;  %v2950_v40 = vsub.f32 %v6977_v49, %v2890_v35  ;;  %6105 = vmatmul.mubr.msk.f32.vlgmr.msra.gmra.mxu0 %vm2836_vm1, %v3138_v11 }
 0x27b   :  { %v6231_v58 = vpop.eup %6230  ;;  %6113 = vmatpush3.msra.mxu0 %v6752_v46  ;;  %6114 = vmatprep.mubr.msk.f32.mxu0 %vm6333_vm0, %v7409_v0 }
 0x27c   :  { %v2999_v33 = vmul.f32 1.442695, %v2950_v40  ;;  %v3068_v42 = vsel %vm2836_vm1, %v6231_v58, 0.0  ;;  %v3139_v51 = vmul.f32 %v6231_v58, %v7044_v44  ;;  %6122 = vmatprep.subr.mxu0 %v7409_v0 }
 0x27d   :  { %v2893_v25 = vpop.xlane.xlu0 %2892  ;;  %3069 = vadd.xlane.f32.xlu1 %v3068_v42 }
 0x27e   :  { %6238 = vpow2.f32 %v2999_v33  ;;  %v2951_v49 = vsub.f32 %v6981_v59, %v2893_v25  ;;  %6110 = vmatmul.mubr.msk.f32.vlgmr.msra.gmra.mxu1 %vm2836_vm1, %v3139_v51 }
 0x27f   :  { %v6233_v7 = vpop.eup %6232  ;;  %6118 = vmatpush3.msra.mxu1 %v6745_v41  ;;  %6119 = vmatprep.mubr.msk.f32.mxu1 %vm6333_vm0, %v7409_v0 }
 0x280   :  { %v3001_v46 = vmul.f32 1.442695, %v2951_v49  ;;  %v3071_v61 = vsel %vm2836_vm1, %v6233_v7, 0.0  ;;  %v3140_v27 = vmul.f32 %v6233_v7, %v7044_v44  ;;  %6127 = vmatprep.subr.mxu1 %v7409_v0  ;;  %v7410_v49 = vld [vmem:[#allocation10_spill] sm:$0xff] }
 0x281   :  { %3072 = vadd.xlane.f32.xlu0 %v3071_v61  ;;  %v2896_v50 = vpop.xlane.xlu1 %2895 }
 0x282   :  { %6240 = vpow2.f32 %v3001_v46  ;;  %v2952_v59 = vsub.f32 %v6985_v9, %v2896_v50  ;;  %6115 = vmatmul.mubr.msk.f32.vlgmr.msra.gmra.mxu0 %vm2836_vm1, %v3140_v27  ;;  %v7411_v46 = vld [vmem:[#allocation3_spill] sm:$0xff] }
 0x283   :  { %v6235_v47 = vpop.eup %6234  ;;  %6123 = vmatpush3.msra.mxu0 %v6763_v57  ;;  %6124 = vmatprep.mubr.msk.f32.mxu0 %vm6333_vm0, %v7409_v0 }
 0x284   :  { %v3003_v41 = vmul.f32 1.442695, %v2952_v59  ;;  %v3074_v54 = vsel %vm2836_vm1, %v6235_v47, 0.0  ;;  %v3141_v19 = vmul.f32 %v6235_v47, %v7044_v44  ;;  %6132 = vmatprep.subr.mxu0 %v7409_v0  ;;  %v7412_v59 = vld [vmem:[#allocation11_spill] sm:$0xff] }
 0x285   :  { %v2899_v53 = vpop.xlane.xlu0 %2898  ;;  %3075 = vadd.xlane.f32.xlu1 %v3074_v54  ;;  %v7413_v54 = vld [vmem:[#allocation5_spill] sm:$0xff] }
 0x286   :  { %6242 = vpow2.f32 %v3003_v41  ;;  %v2953_v9 = vsub.f32 %v6989_v26, %v2899_v53  ;;  %6120 = vmatmul.mubr.msk.f32.vlgmr.msra.gmra.mxu1 %vm2836_vm1, %v3141_v19 }
 0x287   :  { %v6237_v45 = vpop.eup %6236  ;;  %6128 = vmatpush3.msra.mxu1 %v6756_v52  ;;  %6129 = vmatprep.mubr.msk.f32.mxu1 %vm6333_vm0, %v7409_v0 }
 0x288   :  { %v3005_v57 = vmul.f32 1.442695, %v2953_v9  ;;  %v3077_v34 = vsel %vm2836_vm1, %v6237_v45, 0.0  ;;  %v3142_v1 = vmul.f32 %v6237_v45, %v7044_v44  ;;  %6137 = vmatprep.subr.mxu1 %v7409_v0 }
 0x289   :  { %3078 = vadd.xlane.f32.xlu0 %v3077_v34  ;;  %v2902_v32 = vpop.xlane.xlu1 %2901 }
 0x28a   :  { %6244 = vpow2.f32 %v3005_v57  ;;  %v2954_v26 = vsub.f32 %v6993_v36, %v2902_v32  ;;  %6125 = vmatmul.mubr.msk.f32.vlgmr.msra.gmra.mxu0 %vm2836_vm1, %v3142_v1  ;;  %v7414_v57 = vld [vmem:[#allocation12_spill] sm:$0xff] }
 0x28b   :  { %v6239_v15 = vpop.eup %6238  ;;  %6133 = vmatpush3.msra.mxu0 %v6774_v5  ;;  %6134 = vmatprep.mubr.msk.f32.mxu0 %vm6333_vm0, %v7409_v0  ;;  %v7415_v32 = vld [vmem:[#allocation4_spill] sm:$0xff] }
 0x28c   :  { %v3007_v52 = vmul.f32 1.442695, %v2954_v26  ;;  %v3080_v23 = vsel %vm2836_vm1, %v6239_v15, 0.0  ;;  %v3143_v2 = vmul.f32 %v6239_v15, %v7044_v44  ;;  %6142 = vmatprep.subr.mxu0 %v7409_v0 }
 0x28d   :  { %v2905_v56 = vpop.xlane.xlu0 %2904  ;;  %3081 = vadd.xlane.f32.xlu1 %v3080_v23 }
 0x28e   :  { %6246 = vpow2.f32 %v3007_v52  ;;  %v2955_v36 = vsub.f32 %v6997_v55, %v2905_v56  ;;  %6130 = vmatmul.mubr.msk.f32.vlgmr.msra.gmra.mxu1 %vm2836_vm1, %v3143_v2  ;;  %v7416_v2 = vld [vmem:[#allocation13_spill] sm:$0xff] }
 0x28f   :  { %v6241_v13 = vpop.eup %6240  ;;  %6138 = vmatpush3.msra.mxu1 %v6767_v63  ;;  %6139 = vmatprep.mubr.msk.f32.mxu1 %vm6333_vm0, %v7409_v0 }
 0x290   :  { %v3009_v5 = vmul.f32 1.442695, %v2955_v36  ;;  %v3083_v60 = vsel %vm2836_vm1, %v6241_v13, 0.0  ;;  %v3144_v29 = vmul.f32 %v6241_v13, %v7044_v44  ;;  %6147 = vmatprep.subr.mxu1 %v7409_v0  ;;  %v7417_v13 = vld [vmem:[#allocation7_spill] sm:$0xff] }
 0x291   :  { %3084 = vadd.xlane.f32.xlu0 %v3083_v60  ;;  %v2908_v4 = vpop.xlane.xlu1 %2907 }
 0x292   :  { %6248 = vpow2.f32 %v3009_v5  ;;  %v2956_v55 = vsub.f32 %v7001_v6, %v2908_v4  ;;  %6135 = vmatmul.mubr.msk.f32.vlgmr.msra.gmra.mxu0 %vm2836_vm1, %v3144_v29 }
 0x293   :  { %v6243_v38 = vpop.eup %6242  ;;  %6143 = vmatpush3.msra.mxu0 %v6785_v16  ;;  %6144 = vmatprep.mubr.msk.f32.mxu0 %vm6333_vm0, %v7409_v0 }
 0x294   :  { %v3011_v63 = vmul.f32 1.442695, %v2956_v55  ;;  %v3086_v8 = vsel %vm2836_vm1, %v6243_v38, 0.0  ;;  %v3145_v22 = vmul.f32 %v6243_v38, %v7044_v44  ;;  %6152 = vmatprep.subr.mxu0 %v7409_v0  ;;  %v7418_v55 = vld [vmem:[#allocation6_spill] sm:$0xff] }
 0x295   :  { %v2911_v62 = vpop.xlane.xlu0 %2910  ;;  %3087 = vadd.xlane.f32.xlu1 %v3086_v8  ;;  %v7419_v8 = vld [vmem:[#allocation2_spill] sm:$0xff] }
 0x296   :  { %6250 = vpow2.f32 %v3011_v63  ;;  %v2957_v6 = vsub.f32 %v7005_v30, %v2911_v62  ;;  %6140 = vmatmul.mubr.msk.f32.vlgmr.msra.gmra.mxu1 %vm2836_vm1, %v3145_v22  ;;  %v7420_v22 = vld [vmem:[#allocation9_spill] sm:$0xff] }
 0x297   :  { %v6245_v24 = vpop.eup %6244  ;;  %6148 = vmatpush3.msra.mxu1 %v6778_v10  ;;  %6149 = vmatprep.mubr.msk.f32.mxu1 %vm6333_vm0, %v7409_v0  ;;  %v588_v62 = vadd.f32 %v7420_v22, %v7419_v8 }
 0x298   :  { %v3013_v16 = vmul.f32 1.442695, %v2957_v6  ;;  %v3089_v14 = vsel %vm2836_vm1, %v6245_v24, 0.0  ;;  %v3146_v17 = vmul.f32 %v6245_v24, %v7044_v44  ;;  %6157 = vmatprep.subr.mxu1 %v7409_v0 }
 0x299   :  { %3090 = vadd.xlane.f32.xlu0 %v3089_v14  ;;  %v2914_v18 = vpop.xlane.xlu1 %2913 }
 0x29a   :  { %6252 = vpow2.f32 %v3013_v16  ;;  %v2958_v30 = vsub.f32 %v7009_v48, %v2914_v18  ;;  %6145 = vmatmul.mubr.msk.f32.vlgmr.msra.gmra.mxu0 %vm2836_vm1, %v3146_v17  ;;  %v7421_v17 = vld [vmem:[#allocation8_spill] sm:$0xff] }
 0x29b   :  { %v6247_v31 = vpop.eup %6246  ;;  %6153 = vmatpush3.msra.mxu0 %v6796_v28  ;;  %6154 = vmatprep.mubr.msk.f32.mxu0 %vm6333_vm0, %v7409_v0 }
 0x29c   :  { %v3015_v10 = vmul.f32 1.442695, %v2958_v30  ;;  %v3092_v43 = vsel %vm2836_vm1, %v6247_v31, 0.0  ;;  %v3147_v37 = vmul.f32 %v6247_v31, %v7044_v44  ;;  %6162 = vmatprep.subr.mxu0 %v7409_v0 }
 0x29d   :  { %v2917_v20 = vpop.xlane.xlu0 %2916  ;;  %3093 = vadd.xlane.f32.xlu1 %v3092_v43 }
 0x29e   :  { %6254 = vpow2.f32 %v3015_v10  ;;  %v2959_v48 = vsub.f32 %v7013_v3, %v2917_v20  ;;  %6150 = vmatmul.mubr.msk.f32.vlgmr.msra.gmra.mxu1 %vm2836_vm1, %v3147_v37 }
 0x29f   :  { %v6249_v11 = vpop.eup %6248  ;;  %6158 = vmatpush3.msra.mxu1 %v6789_v21  ;;  %6159 = vmatprep.mubr.msk.f32.mxu1 %vm6333_vm0, %v7409_v0 }
 0x2a0   :  { %v3017_v28 = vmul.f32 1.442695, %v2959_v48  ;;  %v3095_v35 = vsel %vm2836_vm1, %v6249_v11, 0.0  ;;  %v3148_v40 = vmul.f32 %v6249_v11, %v7044_v44  ;;  %6167 = vmatprep.subr.mxu1 %v7409_v0 }
 0x2a1   :  { %3096 = vadd.xlane.f32.xlu0 %v3095_v35  ;;  %v2920_v58 = vpop.xlane.xlu1 %2919 }
 0x2a2   :  { %6256 = vpow2.f32 %v3017_v28  ;;  %v2960_v3 = vsub.f32 %v7017_v12, %v2920_v58  ;;  %6155 = vmatmul.mubr.msk.f32.vlgmr.msra.gmra.mxu0 %vm2836_vm1, %v3148_v40 }
 0x2a3   :  { %v6251_v33 = vpop.eup %6250  ;;  %6163 = vmatpush3.msra.mxu0 %v6807_v39  ;;  %6164 = vmatprep.mubr.msk.f32.mxu0 %vm6333_vm0, %v7409_v0 }
 0x2a4   :  { %v3019_v21 = vmul.f32 1.442695, %v2960_v3  ;;  %v3098_v42 = vsel %vm2836_vm1, %v6251_v33, 0.0  ;;  %v3149_v51 = vmul.f32 %v6251_v33, %v7044_v44  ;;  %6172 = vmatprep.subr.mxu0 %v7409_v0 }
 0x2a5   :  { %v2923_v25 = vpop.xlane.xlu0 %2922  ;;  %3099 = vadd.xlane.f32.xlu1 %v3098_v42 }
 0x2a6   :  { %6258 = vpow2.f32 %v3019_v21  ;;  %v2961_v12 = vsub.f32 %v7410_v49, %v2923_v25  ;;  %6160 = vmatmul.mubr.msk.f32.vlgmr.msra.gmra.mxu1 %vm2836_vm1, %v3149_v51 }
 0x2a7   :  { %v6253_v7 = vpop.eup %6252  ;;  %6168 = vmatpush3.msra.mxu1 %v7411_v46  ;;  %6169 = vmatprep.mubr.msk.f32.mxu1 %vm6333_vm0, %v7409_v0 }
 0x2a8   :  { %v3021_v39 = vmul.f32 1.442695, %v2961_v12  ;;  %v3101_v61 = vsel %vm2836_vm1, %v6253_v7, 0.0  ;;  %v3150_v27 = vmul.f32 %v6253_v7, %v7044_v44  ;;  %6177 = vmatprep.subr.mxu1 %v7409_v0 }
 0x2a9   :  { %3102 = vadd.xlane.f32.xlu0 %v3101_v61  ;;  %v2926_v50 = vpop.xlane.xlu1 %2925 }
 0x2aa   :  { %6260 = vpow2.f32 %v3021_v39  ;;  %v2962_v47 = vsub.f32 %v7412_v59, %v2926_v50  ;;  %6165 = vmatmul.mubr.msk.f32.vlgmr.msra.gmra.mxu0 %vm2836_vm1, %v3150_v27 }
 0x2ab   :  { %v6255_v41 = vpop.eup %6254  ;;  %6173 = vmatpush3.msra.mxu0 %v7413_v54  ;;  %6174 = vmatprep.mubr.msk.f32.mxu0 %vm6333_vm0, %v7409_v0 }
 0x2ac   :  { %v3023_v19 = vmul.f32 1.442695, %v2962_v47  ;;  %v3104_v53 = vsel %vm2836_vm1, %v6255_v41, 0.0  ;;  %v3151_v9 = vmul.f32 %v6255_v41, %v7044_v44  ;;  %6182 = vmatprep.subr.mxu0 %v7409_v0 }
 0x2ad   :  { %v2929_v45 = vpop.xlane.xlu0 %2928  ;;  %3105 = vadd.xlane.f32.xlu1 %v3104_v53 }
 0x2ae   :  { %6262 = vpow2.f32 %v3023_v19  ;;  %v2963_v34 = vsub.f32 %v7414_v57, %v2929_v45  ;;  %6170 = vmatmul.mubr.msk.f32.vlgmr.msra.gmra.mxu1 %vm2836_vm1, %v3151_v9 }
 0x2af   :  { %v6257_v1 = vpop.eup %6256  ;;  %6178 = vmatpush3.msra.mxu1 %v7415_v32  ;;  %6179 = vmatprep.mubr.msk.f32.mxu1 %vm6333_vm0, %v7409_v0 }
 0x2b0   :  { %v3025_v26 = vmul.f32 1.442695, %v2963_v34  ;;  %v3107_v15 = vsel %vm2836_vm1, %v6257_v1, 0.0  ;;  %v3152_v52 = vmul.f32 %v6257_v1, %v7044_v44  ;;  %6187 = vmatprep.subr.mxu1 %v7409_v0 }
 0x2b1   :  { %3108 = vadd.xlane.f32.xlu0 %v3107_v15  ;;  %v2932_v23 = vpop.xlane.xlu1 %2931 }
 0x2b2   :  { %6264 = vpow2.f32 %v3025_v26  ;;  %v2964_v56 = vsub.f32 %v7416_v2, %v2932_v23  ;;  %6175 = vmatmul.mubr.msk.f32.vlgmr.msra.gmra.mxu0 %vm2836_vm1, %v3152_v52 }
 0x2b3   :  { %v6259_v36 = vpop.eup %6258  ;;  %6183 = vmatpush3.msra.mxu0 %v7417_v13  ;;  %6184 = vmatprep.mubr.msk.f32.mxu0 %vm6333_vm0, %v7409_v0 }
 0x2b4   :  { %v3027_v5 = vmul.f32 1.442695, %v2964_v56  ;;  %v3110_v60 = vsel %vm2836_vm1, %v6259_v36, 0.0  ;;  %v3153_v29 = vmul.f32 %v6259_v36, %v7044_v44  ;;  %6192 = vmatprep.subr.mxu0 %v7409_v0 }
 0x2b5   :  { %3111 = vadd.xlane.f32.xlu1 %v3110_v60 }
 0x2b6   :  { %6266 = vpow2.f32 %v3027_v5  ;;  %6180 = vmatmul.mubr.msk.f32.vlgmr.msra.gmra.mxu1 %vm2836_vm1, %v3153_v29 }
 0x2b7   :  { %v6261_v4 = vpop.eup %6260  ;;  %6188 = vmatpush3.msra.mxu1 %v7418_v55  ;;  %6189 = vmatprep.mubr.msk.f32.mxu1 %vm6333_vm0, %v7409_v0 }
 0x2b8   :  { %v3113_v38 = vsel %vm2836_vm1, %v6261_v4, 0.0  ;;  %v3154_v63 = vmul.f32 %v6261_v4, %v7044_v44  ;;  %6197 = vmatprep.subr.mxu1 %v7409_v0 }
 0x2b9   :  { %3114 = vadd.xlane.f32.xlu0 %v3113_v38 }
 0x2ba   :  { %6185 = vmatmul.mubr.msk.f32.vlgmr.msra.gmra.mxu0 %vm2836_vm1, %v3154_v63 }
 0x2bb   :  { %v6263_v6 = vpop.eup %6262  ;;  %6193 = vmatpush3.msra.mxu0 %v588_v62  ;;  %6194 = vmatprep.mubr.msk.f32.mxu0 %vm6333_vm0, %v7409_v0 }
 0x2bc   :  { %v3116_v24 = vsel %vm2836_vm1, %v6263_v6, 0.0  ;;  %v3155_v16 = vmul.f32 %v6263_v6, %v7044_v44 }
 0x2bd   :  { %3117 = vadd.xlane.f32.xlu1 %v3116_v24 }
 0x2be   :  { %6190 = vmatmul.mubr.msk.f32.vlgmr.msra.gmra.mxu1 %vm2836_vm1, %v3155_v16 }
 0x2bf   :  { %v6265_v14 = vpop.eup %6264  ;;  %6198 = vmatpush3.msra.mxu1 %v7421_v17  ;;  %6199 = vmatprep.mubr.msk.f32.mxu1 %vm6333_vm0, %v7409_v0 }
 0x2c0   :  { %v3119_v18 = vsel %vm2836_vm1, %v6265_v14, 0.0  ;;  %v3156_v30 = vmul.f32 %v6265_v14, %v7044_v44 }
 0x2c1   :  { %3120 = vadd.xlane.f32.xlu0 %v3119_v18 }
 0x2c2   :  { %6195 = vmatmul.mubr.msk.f32.vlgmr.msra.gmra.mxu0 %vm2836_vm1, %v3156_v30 }
 0x2c3   :  { %v6267_v31 = vpop.eup %6266 }
 0x2c4   :  { %v3122_v10 = vsel %vm2836_vm1, %v6267_v31, 0.0  ;;  %v3157_v43 = vmul.f32 %v6267_v31, %v7044_v44 }
 0x2c5   :  { %3123 = vadd.xlane.f32.xlu1 %v3122_v10 }
 0x2c6   :  { %6200 = vmatmul.mubr.msk.f32.vlgmr.msra.gmra.mxu1 %vm2836_vm1, %v3157_v43 }
 0x2d2   :  { %v3031_v37 = vpop.xlane.xlu0 %3030 }
 0x2d3   :  { %6268 = vrcp.f32 %v3031_v37 }
 0x2d6   :  { %v3034_v20 = vpop.xlane.xlu1 %3033 }
 0x2d7   :  { %6270 = vrcp.f32 %v3034_v20 }
 0x2da   :  { %v3037_v0 = vpop.xlane.xlu0 %3036 }
 0x2db   :  { %6272 = vrcp.f32 %v3037_v0 }
 0x2de   :  { %v3040_v48 = vpop.xlane.xlu1 %3039 }
 0x2df   :  { %6274 = vrcp.f32 %v3040_v48 }
 0x2e0   :  { %v6269_v11 = vpop.eup %6268 }
 0x2e2   :  { %v3043_v28 = vpop.xlane.xlu0 %3042 }
 0x2e3   :  { %6276 = vrcp.f32 %v3043_v28 }
 0x2e4   :  { %v6271_v44 = vpop.eup %6270 }
 0x2e6   :  { %v3046_v3 = vpop.xlane.xlu1 %3045 }
 0x2e7   :  { %6278 = vrcp.f32 %v3046_v3 }
 0x2e8   :  { %v6273_v51 = vpop.eup %6272 }
 0x2ea   :  { %v3049_v25 = vpop.xlane.xlu0 %3048 }
 0x2eb   :  { %6280 = vrcp.f32 %v3049_v25 }
 0x2ec   :  { %v6275_v46 = vpop.eup %6274 }
 0x2ee   :  { %v3052_v39 = vpop.xlane.xlu1 %3051 }
 0x2ef   :  { %6282 = vrcp.f32 %v3052_v39 }
 0x2f0   :  { %v6277_v59 = vpop.eup %6276 }
 0x2f2   :  { %v3055_v47 = vpop.xlane.xlu0 %3054 }
 0x2f3   :  { %6284 = vrcp.f32 %v3055_v47 }
 0x2f4   :  { %v6279_v53 = vpop.eup %6278 }
 0x2f6   :  { %v3058_v9 = vpop.xlane.xlu1 %3057 }
 0x2f7   :  { %6286 = vrcp.f32 %v3058_v9 }
 0x2f8   :  { %v6281_v1 = vpop.eup %6280 }
 0x2fa   :  { %v3061_v32 = vpop.xlane.xlu0 %3060 }
 0x2fb   :  { %6288 = vrcp.f32 %v3061_v32 }
 0x2fc   :  { %v6283_v23 = vpop.eup %6282 }
 0x2fe   :  { %v3064_v2 = vpop.xlane.xlu1 %3063 }
 0x2ff   :  { %6290 = vrcp.f32 %v3064_v2 }
 0x300   :  { %v6285_v5 = vpop.eup %6284 }
 0x302   :  { %v3067_v60 = vpop.xlane.xlu0 %3066 }
 0x303   :  { %6292 = vrcp.f32 %v3067_v60 }
 0x304   :  { %v6287_v38 = vpop.eup %6286 }
 0x306   :  { %v3070_v63 = vpop.xlane.xlu1 %3069 }
 0x307   :  { %6294 = vrcp.f32 %v3070_v63 }
 0x308   :  { %v6289_v6 = vpop.eup %6288 }
 0x30a   :  { %v3227_v35 = vpop.f32.mrf.mxu0  ;;  %v3073_v24 = vpop.xlane.xlu0 %3072 }
 0x30b   :  { %v5526_v40 = vmul.f32 %v6269_v11, %v3227_v35  ;;  %6296 = vrcp.f32 %v3073_v24 }
 0x30c   :  { %v6046_v58 = vpop.f32.mrf.mxu0  ;;  %v6291_v18 = vpop.eup %6290 }
 0x30d   :  { %5558 = vst [vmem:[%s7389_s4] sm:$0xff] %v5526_v40 }
 0x30e   :  { %v3300_v33 = vpop.f32.mrf.mxu1  ;;  %v3076_v30 = vpop.xlane.xlu1 %3075 }
 0x30f   :  { %v5527_v21 = vmul.f32 %v6271_v44, %v3300_v33  ;;  %6298 = vrcp.f32 %v3076_v30 }
 0x310   :  { %v6051_v42 = vpop.f32.mrf.mxu1  ;;  %v6293_v37 = vpop.eup %6292 }
 0x311   :  { %5559 = vst [vmem:[%s7389_s4 + $0x8] sm:$0xff] %v5527_v21 }
 0x312   :  { %v3373_v49 = vpop.f32.mrf.mxu0  ;;  %v3079_v20 = vpop.xlane.xlu0 %3078 }
 0x313   :  { %v5528_v12 = vmul.f32 %v6273_v51, %v3373_v49  ;;  %6300 = vrcp.f32 %v3079_v20 }
 0x314   :  { %v6056_v7 = vpop.f32.mrf.mxu0  ;;  %v6295_v28 = vpop.eup %6294 }
 0x315   :  { %5560 = vst [vmem:[%s7389_s4 + $0x10] sm:$0xff] %v5528_v12 }
 0x316   :  { %v3446_v61 = vpop.f32.mrf.mxu1  ;;  %v3082_v35 = vpop.xlane.xlu1 %3081 }
 0x317   :  { %v5529_v27 = vmul.f32 %v6275_v46, %v3446_v61  ;;  %6302 = vrcp.f32 %v3082_v35 }
 0x318   :  { %v6061_v50 = vpop.f32.mrf.mxu1  ;;  %v6297_v3 = vpop.eup %6296 }
 0x319   :  { %5561 = vst [vmem:[%s7389_s4 + $0x18] sm:$0xff] %v5529_v27 }
 0x31a   :  { %v3519_v41 = vpop.f32.mrf.mxu0  ;;  %v3085_v33 = vpop.xlane.xlu0 %3084 }
 0x31b   :  { %v5530_v54 = vmul.f32 %v6277_v59, %v3519_v41  ;;  %6304 = vrcp.f32 %v3085_v33 }
 0x31c   :  { %v6066_v19 = vpop.f32.mrf.mxu0  ;;  %v6299_v25 = vpop.eup %6298 }
 0x31d   :  { %5562 = vst [vmem:[%s7389_s4 + $0x20] sm:$0xff] %v5530_v54 }
 0x31e   :  { %v3592_v45 = vpop.f32.mrf.mxu1  ;;  %v3088_v49 = vpop.xlane.xlu1 %3087 }
 0x31f   :  { %v5531_v57 = vmul.f32 %v6279_v53, %v3592_v45  ;;  %6306 = vrcp.f32 %v3088_v49 }
 0x320   :  { %v6071_v34 = vpop.f32.mrf.mxu1  ;;  %v6301_v39 = vpop.eup %6300 }
 0x321   :  { %5563 = vst [vmem:[%s7389_s4 + $0x28] sm:$0xff] %v5531_v57 }
 0x322   :  { %v3665_v26 = vpop.f32.mrf.mxu0  ;;  %v3091_v61 = vpop.xlane.xlu0 %3090 }
 0x323   :  { %v5532_v15 = vmul.f32 %v6281_v1, %v3665_v26  ;;  %6308 = vrcp.f32 %v3091_v61 }
 0x324   :  { %v6076_v52 = vpop.f32.mrf.mxu0  ;;  %v6303_v47 = vpop.eup %6302 }
 0x325   :  { %5564 = vst [vmem:[%s7389_s4 + $0x30] sm:$0xff] %v5532_v15 }
 0x326   :  { %v3738_v56 = vpop.f32.mrf.mxu1  ;;  %v3094_v41 = vpop.xlane.xlu1 %3093 }
 0x327   :  { %v5533_v36 = vmul.f32 %v6283_v23, %v3738_v56  ;;  %6310 = vrcp.f32 %v3094_v41 }
 0x328   :  { %v6081_v13 = vpop.f32.mrf.mxu1  ;;  %v6305_v9 = vpop.eup %6304 }
 0x329   :  { %5565 = vst [vmem:[%s7389_s4 + $0x38] sm:$0xff] %v5533_v36 }
 0x32a   :  { %v3811_v29 = vpop.f32.mrf.mxu0  ;;  %v3097_v45 = vpop.xlane.xlu0 %3096 }
 0x32b   :  { %v5534_v4 = vmul.f32 %v6285_v5, %v3811_v29  ;;  %6312 = vrcp.f32 %v3097_v45 }
 0x32c   :  { %v6086_v55 = vpop.f32.mrf.mxu0  ;;  %v6307_v32 = vpop.eup %6306 }
 0x32d   :  { %5566 = vst [vmem:[%s7389_s4 + $0x40] sm:$0xff] %v5534_v4 }
 0x32e   :  { %v3884_v8 = vpop.f32.mrf.mxu1  ;;  %v3100_v26 = vpop.xlane.xlu1 %3099 }
 0x32f   :  { %v5535_v22 = vmul.f32 %v6287_v38, %v3884_v8  ;;  %6314 = vrcp.f32 %v3100_v26 }
 0x330   :  { %v6091_v62 = vpop.f32.mrf.mxu1  ;;  %v6309_v2 = vpop.eup %6308 }
 0x331   :  { %5567 = vst [vmem:[%s7389_s4 + $0x48] sm:$0xff] %v5535_v22 }
 0x332   :  { %v3957_v16 = vpop.f32.mrf.mxu0  ;;  %v3103_v56 = vpop.xlane.xlu0 %3102 }
 0x333   :  { %v5536_v14 = vmul.f32 %v6289_v6, %v3957_v16  ;;  %6316 = vrcp.f32 %v3103_v56 }
 0x334   :  { %v6096_v17 = vpop.f32.mrf.mxu0  ;;  %v6311_v60 = vpop.eup %6310 }
 0x335   :  { %5568 = vst [vmem:[%s7389_s4 + $0x50] sm:$0xff] %v5536_v14 }
 0x336   :  { %v4030_v31 = vpop.f32.mrf.mxu1  ;;  %v3106_v29 = vpop.xlane.xlu1 %3105 }
 0x337   :  { %v5537_v10 = vmul.f32 %v6291_v18, %v4030_v31  ;;  %6318 = vrcp.f32 %v3106_v29 }
 0x338   :  { %v6101_v43 = vpop.f32.mrf.mxu1  ;;  %v6313_v63 = vpop.eup %6312 }
 0x339   :  { %5569 = vst [vmem:[%s7389_s4 + $0x58] sm:$0xff] %v5537_v10 }
 0x33a   :  { %v4103_v0 = vpop.f32.mrf.mxu0  ;;  %v3109_v8 = vpop.xlane.xlu0 %3108 }
 0x33b   :  { %v5538_v48 = vmul.f32 %v6293_v37, %v4103_v0  ;;  %6320 = vrcp.f32 %v3109_v8 }
 0x33c   :  { %v6106_v11 = vpop.f32.mrf.mxu0  ;;  %v6315_v24 = vpop.eup %6314 }
 0x33d   :  { %5570 = vst [vmem:[%s7389_s4 + $0x60] sm:$0xff] %v5538_v48 }
 0x33e   :  { %v4176_v40 = vpop.f32.mrf.mxu1  ;;  %v3112_v16 = vpop.xlane.xlu1 %3111 }
 0x33f   :  { %v5539_v58 = vmul.f32 %v6295_v28, %v4176_v40  ;;  %6322 = vrcp.f32 %v3112_v16 }
 0x340   :  { %v6111_v44 = vpop.f32.mrf.mxu1  ;;  %v6317_v30 = vpop.eup %6316 }
 0x341   :  { %5571 = vst [vmem:[%s7389_s4 + $0x68] sm:$0xff] %v5539_v58 }
 0x342   :  { %v4249_v21 = vpop.f32.mrf.mxu0  ;;  %v3115_v31 = vpop.xlane.xlu0 %3114 }
 0x343   :  { %v5540_v42 = vmul.f32 %v6297_v3, %v4249_v21  ;;  %6324 = vrcp.f32 %v3115_v31 }
 0x344   :  { %v6116_v51 = vpop.f32.mrf.mxu0  ;;  %v6319_v20 = vpop.eup %6318 }
 0x345   :  { %5572 = vst [vmem:[%s7389_s4 + $0x70] sm:$0xff] %v5540_v42 }
 0x346   :  { %v4322_v12 = vpop.f32.mrf.mxu1  ;;  %v3118_v0 = vpop.xlane.xlu1 %3117 }
 0x347   :  { %v5541_v7 = vmul.f32 %v6299_v25, %v4322_v12  ;;  %6326 = vrcp.f32 %v3118_v0 }
 0x348   :  { %v6121_v46 = vpop.f32.mrf.mxu1  ;;  %v6321_v35 = vpop.eup %6320 }
 0x349   :  { %5573 = vst [vmem:[%s7389_s4 + $0x78] sm:$0xff] %v5541_v7 }
 0x34a   :  { %v4395_v27 = vpop.f32.mrf.mxu0  ;;  %v3121_v40 = vpop.xlane.xlu0 %3120 }
 0x34b   :  { %v5542_v50 = vmul.f32 %v6301_v39, %v4395_v27  ;;  %6328 = vrcp.f32 %v3121_v40 }
 0x34c   :  { %v6126_v59 = vpop.f32.mrf.mxu0  ;;  %v6323_v33 = vpop.eup %6322 }
 0x34d   :  { %5574 = vst [vmem:[%s7389_s4 + $0x80] sm:$0xff] %v5542_v50 }
 0x34e   :  { %v4468_v54 = vpop.f32.mrf.mxu1  ;;  %v3124_v21 = vpop.xlane.xlu1 %3123 }
 0x34f   :  { %v5543_v19 = vmul.f32 %v6303_v47, %v4468_v54  ;;  %6330 = vrcp.f32 %v3124_v21 }
 0x350   :  { %v6131_v53 = vpop.f32.mrf.mxu1  ;;  %v6325_v49 = vpop.eup %6324 }
 0x351   :  { %5575 = vst [vmem:[%s7389_s4 + $0x88] sm:$0xff] %v5543_v19 }
 0x352   :  { %v4541_v57 = vpop.f32.mrf.mxu0 }
 0x353   :  { %v5544_v34 = vmul.f32 %v6305_v9, %v4541_v57 }
 0x354   :  { %v6136_v1 = vpop.f32.mrf.mxu0  ;;  %v6327_v39 = vpop.eup %6326 }
 0x355   :  { %5576 = vst [vmem:[%s7389_s4 + $0x90] sm:$0xff] %v5544_v34 }
 0x356   :  { %v4614_v15 = vpop.f32.mrf.mxu1 }
 0x357   :  { %v5545_v52 = vmul.f32 %v6307_v32, %v4614_v15 }
 0x358   :  { %v6141_v23 = vpop.f32.mrf.mxu1  ;;  %v6329_v59 = vpop.eup %6328 }
 0x359   :  { %5577 = vst [vmem:[%s7389_s4 + $0x98] sm:$0xff] %v5545_v52 }
 0x35a   :  { %v4687_v36 = vpop.f32.mrf.mxu0 }
 0x35b   :  { %v5546_v13 = vmul.f32 %v6309_v2, %v4687_v36 }
 0x35c   :  { %v6146_v5 = vpop.f32.mrf.mxu0  ;;  %v6331_v19 = vpop.eup %6330 }
 0x35d   :  { %5578 = vst [vmem:[%s7389_s4 + $0xa0] sm:$0xff] %v5546_v13 }
 0x35e   :  { %v4760_v4 = vpop.f32.mrf.mxu1 }
 0x35f   :  { %v5547_v55 = vmul.f32 %v6311_v60, %v4760_v4 }
 0x360   :  { %v6151_v38 = vpop.f32.mrf.mxu1 }
 0x361   :  { %5579 = vst [vmem:[%s7389_s4 + $0xa8] sm:$0xff] %v5547_v55 }
 0x362   :  { %v4833_v22 = vpop.f32.mrf.mxu0 }
 0x363   :  { %v5548_v62 = vmul.f32 %v6313_v63, %v4833_v22 }
 0x364   :  { %v6156_v6 = vpop.f32.mrf.mxu0 }
 0x365   :  { %5580 = vst [vmem:[%s7389_s4 + $0xb0] sm:$0xff] %v5548_v62 }
 0x366   :  { %v4906_v14 = vpop.f32.mrf.mxu1 }
 0x367   :  { %v5549_v17 = vmul.f32 %v6315_v24, %v4906_v14 }
 0x368   :  { %v6161_v18 = vpop.f32.mrf.mxu1 }
 0x369   :  { %5581 = vst [vmem:[%s7389_s4 + $0xb8] sm:$0xff] %v5549_v17 }
 0x36a   :  { %v4979_v10 = vpop.f32.mrf.mxu0 }
 0x36b   :  { %v5550_v43 = vmul.f32 %v6317_v30, %v4979_v10 }
 0x36c   :  { %v6166_v37 = vpop.f32.mrf.mxu0 }
 0x36d   :  { %5582 = vst [vmem:[%s7389_s4 + $0xc0] sm:$0xff] %v5550_v43 }
 0x36e   :  { %v5052_v48 = vpop.f32.mrf.mxu1 }
 0x36f   :  { %v5551_v11 = vmul.f32 %v6319_v20, %v5052_v48 }
 0x370   :  { %v6171_v28 = vpop.f32.mrf.mxu1 }
 0x371   :  { %5583 = vst [vmem:[%s7389_s4 + $0xc8] sm:$0xff] %v5551_v11 }
 0x372   :  { %v5125_v58 = vpop.f32.mrf.mxu0 }
 0x373   :  { %v5552_v44 = vmul.f32 %v6321_v35, %v5125_v58 }
 0x374   :  { %v6176_v3 = vpop.f32.mrf.mxu0 }
 0x375   :  { %5584 = vst [vmem:[%s7389_s4 + $0xd0] sm:$0xff] %v5552_v44 }
 0x376   :  { %v5198_v42 = vpop.f32.mrf.mxu1 }
 0x377   :  { %v5553_v51 = vmul.f32 %v6323_v33, %v5198_v42 }
 0x378   :  { %v6181_v25 = vpop.f32.mrf.mxu1 }
 0x379   :  { %5585 = vst [vmem:[%s7389_s4 + $0xd8] sm:$0xff] %v5553_v51 }
 0x37a   :  { %v5271_v12 = vpop.f32.mrf.mxu0 }
 0x37b   :  { %v5554_v7 = vmul.f32 %v6325_v49, %v5271_v12 }
 0x37c   :  { %v6186_v46 = vpop.f32.mrf.mxu0 }
 0x37d   :  { %5586 = vst [vmem:[%s7389_s4 + $0xe0] sm:$0xff] %v5554_v7 }
 0x37e   :  { %v5344_v61 = vpop.f32.mrf.mxu1 }
 0x37f   :  { %v5555_v27 = vmul.f32 %v6327_v39, %v5344_v61 }
 0x380   :  { %v6191_v50 = vpop.f32.mrf.mxu1 }
 0x381   :  { %5587 = vst [vmem:[%s7389_s4 + $0xe8] sm:$0xff] %v5555_v27 }
 0x382   :  { %v5417_v47 = vpop.f32.mrf.mxu0 }
 0x383   :  { %v5556_v41 = vmul.f32 %v6329_v59, %v5417_v47 }
 0x384   :  { %v6196_v54 = vpop.f32.mrf.mxu0 }
 0x385   :  { %5588 = vst [vmem:[%s7389_s4 + $0xf0] sm:$0xff] %v5556_v41 }
 0x386   :  { %v5490_v53 = vpop.f32.mrf.mxu1 }
 0x387   :  { %v5557_v9 = vmul.f32 %v6331_v19, %v5490_v53 }
 0x388   :  { %v6201_v45 = vpop.f32.mrf.mxu1 }
 0x389   :  { %5589 = vst [vmem:[%s7389_s4 + $0xf8] sm:$0xff] %v5557_v9 }

</bundles_post_ra>
